<compile_context>
chip_gen: v7x
topology: tpu7x:2x2x1
jax: 0.10.0
libtpu: 0.0.40
codegen_flags: <defaults>
</compile_context>

<pallas_src>
import jax
import jax.numpy as jnp
from jax.experimental import pallas as pl
from jax.experimental.pallas import tpu as pltpu


_MB = 1024 * 1024
_LANE_CANDIDATES = (1024, 512, 256, 128)   # prefer the widest lane-dense layout
_SMALL_INPUT_BYTES = 2 * _MB               # below this, the XLA fused add wins


def _add_kernel(x_ref, p_ref, o_ref):
    # Streaming elementwise add with in-kernel dtype promotion.  The cast is a
    # free VPU op in a memory-bound kernel and avoids a separate XLA astype
    # pass (an extra full HBM read+write per converted array).
    o_ref[...] = x_ref[...].astype(o_ref.dtype) + p_ref[...].astype(o_ref.dtype)


def _target_tile_bytes():
    """Per-array tile size tuned per TPU generation (safe default: 2 MiB)."""
    try:
        kind = jax.devices()[0].device_kind.lower()
    except Exception:  # pragma: no cover - defensive
        return 2 * _MB
    if "v6" in kind:
        return 4 * _MB   # v6e: 24 MiB double-buffered, fits 32 MiB scoped default
    if "7" in kind:
        return 6 * _MB   # v7x: amortize ~0.35us/step against ~3.2 TB/s HBM
    return 2 * _MB       # v5e / older / unknown: 12 MiB double-buffered, safe


def _sublane_multiple(min_itemsize):
    # Packed sublane granularity: 8 rows (32-bit), 16 (16-bit), 32 (8-bit).
    return 8 * max(1, 4 // max(1, int(min_itemsize)))


def base_model_forward(batched_data, perturb=None, *, donate_input=False):
    """Pallas equivalent of BaseModel.forward.

    batched_data: [B, N, D] node features
    perturb:      [B, N, D] additive perturbation or None
    returns:      batched_data (+ perturb)
    """
    x = jnp.asarray(batched_data)

    if perturb is None:
        # Identity: no kernel, no extra HBM streams.
        return x

    p = jnp.asarray(perturb)
    out_dtype = jnp.result_type(x.dtype, p.dtype)
    orig_shape = x.shape
    total = x.size

    x_it = jnp.dtype(x.dtype).itemsize
    p_it = jnp.dtype(p.dtype).itemsize
    o_it = jnp.dtype(out_dtype).itemsize
    total_bytes = total * (x_it + p_it + o_it)

    # Pick the widest lane width that exactly divides the flattened size.
    lane_width = 0
    for cand in _LANE_CANDIDATES:
        if total > 0 and total % cand == 0:
            lane_width = cand
            break

    # Fast paths where the Pallas kernel cannot win:
    #   * tiny inputs: pallas_call dispatch + per-step overhead dominates;
    #   * ragged totals: padding/slicing (or re-concatenating a tail) would
    #     add whole extra HBM passes, while XLA's fused add is already at the
    #     bandwidth roofline;
    #   * shape mismatch (broadcasting): defer to XLA semantics.
    if (p.shape != x.shape or total == 0 or lane_width == 0
            or total_bytes < _SMALL_INPUT_BYTES):
        return x + p

    rows = total // lane_width
    xf = x.reshape(rows, lane_width)   # free (contiguous) reshape, no copy
    pf = p.reshape(rows, lane_width)

    max_it = max(x_it, p_it, o_it)
    min_it = min(x_it, p_it, o_it)
    sub = _sublane_multiple(min_it)

    # --- tile sizing: biggest row-block ~tile_bytes for the widest dtype ----
    tile_bytes = _target_tile_bytes()
    block_r = max(sub, (tile_bytes // (lane_width * max_it)) // sub * sub)

    if block_r >= rows:
        if rows >= 2 * sub:
            # Keep at least 2 grid steps so both v7x TensorCores get work
            # ("parallel" grid axis); the last block may be partial (masked).
            block_r = ((rows + 1) // 2 + sub - 1) // sub * sub
        else:
            block_r = rows   # single full-extent block (always legal)

    grid = (pl.cdiv(rows, block_r),)
    x_spec = pl.BlockSpec((block_r, lane_width), lambda i: (i, 0))
    p_spec = pl.BlockSpec((block_r, lane_width), lambda i: (i, 0))
    o_spec = pl.BlockSpec((block_r, lane_width), lambda i: (i, 0))

    # Double-buffered VMEM footprint: 2 buffers x (x + p + out) tiles.
    block_bytes = block_r * lane_width * (x_it + p_it + o_it)
    vmem_limit = int(min(56 * _MB, max(32 * _MB, 2 * block_bytes + 2 * _MB)))

    aliases = {}
    if donate_input and x.dtype == out_dtype:
        aliases = {0: 0}   # reuse batched_data's HBM buffer for the output

    out = pl.pallas_call(
        _add_kernel,
        out_shape=jax.ShapeDtypeStruct((rows, lane_width), out_dtype),
        grid_spec=pl.GridSpec(
            grid=grid, in_specs=[x_spec, p_spec], out_specs=o_spec),
        compiler_params=pltpu.CompilerParams(
            dimension_semantics=("parallel",),
            vmem_limit_bytes=vmem_limit,
        ),
        input_output_aliases=aliases,
    )(xf, pf)

    return out.reshape(orig_shape)


if __name__ == "__main__":
    key = jax.random.PRNGKey(0)
    k1, k2, k3, k4 = jax.random.split(key, 4)

    # --- small shape consistent with the module (exercises the fast path) ---
    B, N, D = 2, 8, 32
    x_small = jax.random.normal(k1, (B, N, D), dtype=jnp.float32)
    p_small = 0.01 * jax.random.normal(k2, (B, N, D), dtype=jnp.float32)

    out_small = jax.block_until_ready(base_model_forward(x_small, p_small))
    assert out_small.shape == (B, N, D)
    assert jnp.allclose(out_small, x_small + p_small, atol=1e-6)

    # perturb=None -> identity (no kernel, no HBM traffic).
    out_id = jax.block_until_ready(base_model_forward(x_small, None))
    assert jnp.array_equal(out_id, x_small)

    # --- larger shape that exercises the Pallas kernel path -----------------
    Bb, Nb, Db = 4, 512, 512   # 4 MiB per f32 array -> kernel path, grid >= 2
    x_big = jax.random.normal(k3, (Bb, Nb, Db), dtype=jnp.float32)
    p_big = 0.01 * jax.random.normal(k4, (Bb, Nb, Db), dtype=jnp.float32)

    out_big = jax.block_until_ready(base_model_forward(x_big, p_big))
    assert out_big.shape == (Bb, Nb, Db)
    assert out_big.dtype == jnp.float32
    assert jnp.allclose(out_big, x_big + p_big, atol=1e-6)

    # Mixed dtypes: bf16 features + f32 perturb, promotion happens in-kernel.
    x_bf16 = x_big.astype(jnp.bfloat16)
    out_mix = jax.block_until_ready(base_model_forward(x_bf16, p_big))
    ref_mix = x_bf16.astype(jnp.float32) + p_big
    assert out_mix.dtype == ref_mix.dtype
    assert jnp.allclose(out_mix, ref_mix, atol=1e-6)

    print("KERNEL_OK")
</pallas_src>

<mosaic_0001>
module attributes {stable_mosaic.version = 11 : i64} {
  func.func @_add_kernel(%arg0: i32, %arg1: memref<512x1024xf32, #tpu.memory_space<vmem>>, %arg2: memref<512x1024xf32, #tpu.memory_space<vmem>>, %arg3: memref<512x1024xf32, #tpu.memory_space<vmem>>) attributes {dimension_semantics = [#tpu.dimension_semantics<parallel>], iteration_bounds = array<i64: 2>, scalar_prefetch = 0 : i64, scratch_operands = 0 : i64, tpu.core_type = #tpu.core_type<tc>, window_params = [{transform_indices = @transform_0, window_bounds = array<i64: 512, 1024>}, {transform_indices = @transform_1, window_bounds = array<i64: 512, 1024>}, {transform_indices = @transform_2, window_bounds = array<i64: 512, 1024>}]} {
    %c0 = arith.constant 0 : index
    %c0_0 = arith.constant 0 : index
    %0 = vector.load %arg1[%c0, %c0_0] : memref<512x1024xf32, #tpu.memory_space<vmem>>, vector<512x1024xf32>
    %c0_1 = arith.constant 0 : index
    %c0_2 = arith.constant 0 : index
    %1 = vector.load %arg2[%c0_1, %c0_2] : memref<512x1024xf32, #tpu.memory_space<vmem>>, vector<512x1024xf32>
    %2 = arith.addf %0, %1 : vector<512x1024xf32>
    %c0_3 = arith.constant 0 : index
    %c0_4 = arith.constant 0 : index
    %3 = vector.load %arg3[%c0_3, %c0_4] : memref<512x1024xf32, #tpu.memory_space<vmem>>, vector<512x1024xf32>
    tpu.vector_store %arg3[%c0_3, %c0_4], %2 {strides = array<i32>} : memref<512x1024xf32, #tpu.memory_space<vmem>>, vector<512x1024xf32>,
    return
  }
  func.func @transform_0(%arg0: i32) -> (i32, i32) {
    %c0_i32 = arith.constant 0 : i32
    %c0_i32_0 = arith.constant 0 : i32
    return %arg0, %c0_i32 : i32, i32
  }
  func.func @transform_1(%arg0: i32) -> (i32, i32) {
    %c0_i32 = arith.constant 0 : i32
    %c0_i32_0 = arith.constant 0 : i32
    return %arg0, %c0_i32 : i32, i32
  }
  func.func @transform_2(%arg0: i32) -> (i32, i32) {
    %c0_i32 = arith.constant 0 : i32
    %c0_i32_0 = arith.constant 0 : i32
    return %arg0, %c0_i32 : i32, i32
  }
}

</mosaic_0001>

<bundles_post_ra>
// kernel: tpu_custom_call.1
= control target key start
LH: loop header
LB: loop body
LE: loop exit
PB: predicated region body
PF: predicated region fallthrough
CT: control target
= control target key end

     0   :  { %7 = vsyncpa [#allocation3], 0  ;;  %s4368_s0 = inlined_call_operand.hbm [shape: f32[1024,1024], index: 0, kind: input, shape index: {}]   ;;  %s4369_s1 = inlined_call_operand.hbm [shape: f32[1024,1024], index: 1, kind: input, shape index: {}]   ;;  %s4370_s2 = inlined_call_operand.hbm [shape: f32[1024,1024], index: 2, kind: output, shape index: {}]  }
   0x1   :  { %9 = vsyncpa [#allocation3 + $0x1], 0 }
   0x2   :  { %10 = vsyncpa [#allocation6], 0 }
   0x3   :  { %12 = vsyncpa [#allocation6 + $0x1], 0 }
   0x4   :  { %13 = vsyncpa [#allocation4], 0 }
   0x5   :  { %15 = vsyncpa [#allocation4 + $0x1], 0  ;;  %s2602_s9 = smov 0   ;;  %s2604_s10 = smov 0  }
   0x6   :  { %s2606_s11 = smov 0   ;;  %s2608_s12 = smov 0  }
   0x7 LB: > { %s2623_s13 = sadd.s32 4294967295, %s2578_s12   ;;  %s2366_s14 = sadd.s32 4294967294, %s2578_s12   ;;  %s2578_s12 = sphi %s2608_s12, %s4386_s12   ;;  %s2574_s11 = sphi %s2606_s11, %s4385_s11   ;;  %s2570_s10 = sphi %s2604_s10, %s4384_s10   ;;  %s2566_s9 = sphi %s2602_s9, %s4383_s9  }
   0x8   : > { %s2627_s15 = sadd.s32 1, %s2578_s12   ;;  %s28_s16 = sadd.s32 1, %s2574_s11 }
   0x9   : > { %s25_s17 = ssub.s32 %s2578_s12, %s2627_s15  ;;  %p35_p0 = scmp.ne.s32.totalorder %s2574_s11, %s2570_s10 }
   0xa   : > { %p26_p1 = scmp.eq.s32.totalorder %s25_s17, 0  ;;  %p36_p2 = scmp.eq.s32.totalorder %s2578_s12, 0 }
   0xb   : > { %p41_p3 = scmp.ne.s32.totalorder %s2570_s10, %s2566_s9  ;;  %p42_p4 = scmp.eq.s32.totalorder %s2623_s13, 0 }
   0xc   : > { %s2639_s18 = scalar_select %p26_p1, %s2574_s11, %s28_s16  }
   0xd   : > { %p2641_p5 = por %p36_p2, %p35_p0  ;;  %p2645_p6 = por %p42_p4, %p41_p3 }
   0xe   : > { %p91_p7 = scmp.eq.s32.totalorder %s2623_s13, 1  ;;  %p97_p8 = scmp.eq.s32.totalorder %s2366_s14, 1 }
   0xf   : > { %s4374_s20 = scalar_select %p2645_p6, 1, 0 }
  0x10   : > { %p2410_p10 = scmp.lt.s32.totalorder %s2578_s12, 2  ;;  %p2652_p11 = por %p91_p7, %p35_p0 }
  0x11   : > { %p2656_p12 = por %p97_p8, %p41_p3  ;;  %s2661_s23 = sand.u32 1, %s2574_s11  }
  0x12   : > { %s4375_s21 = scalar_select %p2652_p11, 1, 0 }
  0x13   : > { %s4376_s22 = scalar_select %p2656_p12, 1, 0 }
  0x14   : > { %s2388_s24 = sshll.u32 %s2578_s12, 16  ;;  %s2369_s25 = sshll.u32 %s2661_s23, 12 }
  0x15   : > { %s2670_s28 = scalar_lea.hbm %s4368_s0, %s2388_s24  ;;  %s121_s29 = scalar_lea.vmem [#allocation2], %s2369_s25 }
  0x16   : > { %s129_s30 = sshll.u32 %s121_s29, 4  ;;  %p2676_p13 = pnand %p2410_p10, %p2641_p5  ;;  %s2680_s30 = int_to_ptr.vmem [resolvable:$true] %s129_s30 }
  0x17   : > { %s118_s4 = scalar_lea.sflag [#allocation3], %s2661_s23  ;;  %s2448_s5 = scalar_lea.hbm %s2670_s28, 65536 }
  0x18   : > { %p2449_p0 = scmp.ne.s32.totalorder %s2670_s28, %s2448_s5  ;;  %p2450_p1 = pneg %p2676_p13 }
  0x19   : > { %s2453_s8 = scalar_lea.hbm %s4368_s0, 131072  ;;  %p2454_p4 = scmp.lt.u32.totalorder %s2670_s28, %s4368_s0 }
  0x1a   : > { %p2451_p2 = pnand %p2450_p1, %p2449_p0  ;;  %p2455_p5 = scmp.lt.u32.totalorder %s2453_s8, %s2448_s5 }
  0x1b   : > { %p2457_p8 = scmp.lt.u32.totalorder %s2448_s5, %s2670_s28 }
  0x1c   : > { %p2452_p3 = pneg %p2451_p2  ;;  %p2456_p7 = por %p2455_p5, %p2454_p4 }
  0x1e   : > { %p2458_p10 = por %p2457_p8, %p2456_p7 }
  0x20   : > { %p2459_p9 = pnand %p2458_p10, %p2452_p3 }
  0x22   : > { %2462 = shalt.err (!%p2459_p9)
}
  0x23   : > { %s2463_s17 = scalar_lea.vmem %s2680_s30, 65536  ;;  %s2580_s19 = smov [#allocation2]  }
  0x24   : > { %p2464_p0 = scmp.ne.s32.totalorder %s2680_s30, %s2463_s17  ;;  %s2468_s26 = sshll.u32 %s2580_s19, 4  ;;  %s2469_s26 = int_to_ptr.vmem [resolvable:$false] %s2468_s26 }
  0x25   : > { %s2470_s27 = scalar_lea.vmem %s2469_s26, 131072  ;;  %p2471_p11 = scmp.lt.s32.totalorder %s2680_s30, %s2469_s26 }
  0x26   : > { %p2466_p2 = pnand %p2464_p0, %p2450_p1  ;;  %p2472_p4 = scmp.lt.s32.totalorder %s2470_s27, %s2463_s17 }
  0x28   : > { %p2467_p12 = pneg %p2466_p2  ;;  %p2473_p5 = por %p2472_p4, %p2471_p11 }
  0x2a   : > { %p2474_p7 = pnand %p2473_p5, %p2467_p12 }
  0x2c   : > { %2477 = shalt.err (!%p2474_p7)
}
  0x2d   : > { %s2581_s29 = smov 1024   ;;  %s2582_s5 = smov 64  }
  0x2e   : > { %2402 = dma.hbm_to_vmem [thread:$0]  (!%p2676_p13), %s2670_s28, 65536, %s2680_s30, %s118_s4, %s2581_s29, %s2581_s29, %s2582_s5  }
  0x2f   : > { %p2377_p9 = scmp.ge.s32.totalorder %s2578_s12, 1  ;;  %p159_p11 = scmp.lt.s32.totalorder %s2578_s12, 3 }
  0x30   : > { %s2724_s14 = scalar_lea.hbm %s4369_s1, %s2388_s24  ;;  %s143_s16 = scalar_lea.vmem [#allocation5], %s2369_s25 }
  0x31   : > { %p2715_p12 = pnand %p2377_p9, %p159_p11  ;;  %s151_s17 = sshll.u32 %s143_s16, 4  ;;  %s2728_s17 = int_to_ptr.vmem [resolvable:$true] %s151_s17 }
  0x32   : > { %s140_s28 = scalar_lea.sflag [#allocation6], %s2661_s23  ;;  %s2478_s30 = scalar_lea.hbm %s2724_s14, 65536 }
  0x33   : > { %p2479_p3 = scmp.ne.s32.totalorder %s2724_s14, %s2478_s30  ;;  %s2483_s24 = scalar_lea.hbm %s4369_s1, 131072 }
  0x34   : > { %p2484_p0 = scmp.lt.u32.totalorder %s2724_s14, %s4369_s1  ;;  %p2485_p2 = scmp.lt.u32.totalorder %s2483_s24, %s2478_s30 }
  0x35   : > { %p2481_p8 = pnand %p2479_p3, %p2450_p1  ;;  %p2487_p5 = scmp.lt.u32.totalorder %s2478_s30, %s2724_s14 }
  0x36   : > { %p2486_p4 = por %p2485_p2, %p2484_p0 }
  0x37   : > { %p2482_p10 = pneg %p2481_p8 }
  0x38   : > { %p2488_p7 = por %p2487_p5, %p2486_p4 }
  0x3a   : > { %p2489_p9 = pnand %p2488_p7, %p2482_p10 }
  0x3c   : > { %2492 = shalt.err (!%p2489_p9)
}
  0x3d   : > { %s2493_s25 = scalar_lea.vmem %s2728_s17, 65536  ;;  %s2583_s7 = smov [#allocation5]  }
  0x3e   : > { %p2494_p11 = scmp.ne.s32.totalorder %s2728_s17, %s2493_s25  ;;  %s2498_s8 = sshll.u32 %s2583_s7, 4  ;;  %s2499_s8 = int_to_ptr.vmem [resolvable:$false] %s2498_s8 }
  0x3f   : > { %s2500_s16 = scalar_lea.vmem %s2499_s8, 131072  ;;  %p2501_p6 = scmp.lt.s32.totalorder %s2728_s17, %s2499_s8 }
  0x40   : > { %p2496_p3 = pnand %p2494_p11, %p2450_p1  ;;  %p2502_p0 = scmp.lt.s32.totalorder %s2500_s16, %s2493_s25 }
  0x42   : > { %p2497_p8 = pneg %p2496_p3  ;;  %p2503_p2 = por %p2502_p0, %p2501_p6 }
  0x44   : > { %p2504_p4 = pnand %p2503_p2, %p2497_p8 }
  0x46   : > { %2507 = shalt.err (!%p2504_p4)
}
  0x47   : > { %2405 = dma.hbm_to_vmem [thread:$0]  (!%p2676_p13), %s2724_s14, 65536, %s2728_s17, %s140_s28, %s2581_s29, %s2581_s29, %s2582_s5  }
  0x48   : > { %163 = sbr.rel (%p2715_p12) target bundleno = 498 (0x1f2), region = 28  ;;  %s2762_s30 = sand.u32 (!%p2715_p12), 1, %s2570_s10  }
  0x49   : > { %s2378_s4 = sshll.u32 (!%p2715_p12), %s2762_s30, 12  ;;  %s166_s19 = scalar_lea.sflag (!%p2715_p12), [#allocation3], %s2762_s30 }
  0x4a   : > { %s2766_s3 = scalar_lea.vmem (!%p2715_p12), [#allocation2], %s2378_s4  ;;  %p4379_p6 = scmp.ne.s32.totalorder (!%p2715_p12), %s4374_s20, 0 }
  0x4f   : > { %2553 = dma.done.wait (%p4379_p6), %s166_s19, 65536  }
  0x50   : > { %2555 = vsyncadd (%p4379_p6), %s166_s19, 4294901760  ;;  %s175_s23 = scalar_lea.sflag [#allocation6], %s2762_s30  ;;  %s2773_s29 = scalar_lea.vmem [#allocation5], %s2378_s4 }
  0x51   : > { %2557 = dma.done.wait (%p4379_p6), %s175_s23, 65536  }
  0x52   : > { %2559 = vsyncadd (%p4379_p6), %s175_s23, 4294901760  ;;  %v207_v0 = vld [vmem:[%s2766_s3] sm:$0xff]  ;;  %v208_v2 = vld [vmem:[%s2766_s3 + $0x8] sm:$0xff]  ;;  %s2788_s20 = scalar_lea.vmem [#allocation7], %s2378_s4  ;;  %s2392_s5 = sshll.u32 %s2623_s13, 16 }
  0x53   : > { %v719_v1 = vld [vmem:[%s2773_s29] sm:$0xff]  ;;  %v720_v4 = vld [vmem:[%s2773_s29 + $0x8] sm:$0xff]  ;;  %v209_v5 = vld [vmem:[%s2766_s3 + $0x10] sm:$0xff]  ;;  %s2270_s6 = sshll.u32 %s2788_s20, 4  ;;  %s4318_s17 = scalar_lea.hbm %s4370_s2, %s2392_s5  ;;  %s4320_s6 = int_to_ptr.vmem [resolvable:$true] %s2270_s6 }
  0x54   : > { %v1231_v3 = vadd.f32 %v719_v1, %v207_v0  ;;  %v721_v6 = vld [vmem:[%s2773_s29 + $0x10] sm:$0xff]  ;;  %v1232_v7 = vadd.f32 %v720_v4, %v208_v2  ;;  %v210_v9 = vld [vmem:[%s2766_s3 + $0x18] sm:$0xff]  ;;  %v211_v11 = vld [vmem:[%s2766_s3 + $0x20] sm:$0xff]  ;;  %s2256_s28 = scalar_lea.sflag [#allocation4], %s2762_s30  ;;  %s2508_s24 = scalar_lea.vmem %s4320_s6, 65536 }
  0x55   : > { %v1233_v8 = vadd.f32 %v721_v6, %v209_v5  ;;  %v722_v10 = vld [vmem:[%s2773_s29 + $0x18] sm:$0xff]  ;;  %v723_v13 = vld [vmem:[%s2773_s29 + $0x20] sm:$0xff]  ;;  %v212_v14 = vld [vmem:[%s2766_s3 + $0x28] sm:$0xff]  ;;  %p2509_p13 = scmp.ne.s32.totalorder %s4320_s6, %s2508_s24  ;;  %p4380_p1 = scmp.ne.s32.totalorder %s4375_s21, 0 }
  0x56   : > { %1743 = vst [vmem:[%s2788_s20] sm:$0xff] %v1231_v3  ;;  %v1234_v12 = vadd.f32 %v722_v10, %v210_v9  ;;  %v724_v15 = vld [vmem:[%s2773_s29 + $0x28] sm:$0xff]  ;;  %1744 = vst [vmem:[%s2788_s20 + $0x8] sm:$0xff] %v1232_v7  ;;  %v1235_v16 = vadd.f32 %v723_v13, %v211_v11  ;;  %v213_v18 = vld [vmem:[%s2766_s3 + $0x30] sm:$0xff]  ;;  %s2584_s26 = smov [#allocation7]  }
  0x57   : > { %1745 = vst [vmem:[%s2788_s20 + $0x10] sm:$0xff] %v1233_v8  ;;  %v1236_v17 = vadd.f32 %v724_v15, %v212_v14  ;;  %v725_v19 = vld [vmem:[%s2773_s29 + $0x30] sm:$0xff]  ;;  %v214_v20 = vld [vmem:[%s2766_s3 + $0x38] sm:$0xff]  ;;  %v215_v23 = vld [vmem:[%s2766_s3 + $0x40] sm:$0xff]  ;;  %p2510_p12 = pnand %p2509_p13, %p4380_p1  ;;  %s2512_s27 = sshll.u32 %s2584_s26, 4  ;;  %s2513_s27 = int_to_ptr.vmem [resolvable:$false] %s2512_s27 }
  0x58   : > { %1746 = vst [vmem:[%s2788_s20 + $0x18] sm:$0xff] %v1234_v12  ;;  %v1237_v21 = vadd.f32 %v725_v19, %v213_v18  ;;  %v726_v22 = vld [vmem:[%s2773_s29 + $0x38] sm:$0xff]  ;;  %v727_v24 = vld [vmem:[%s2773_s29 + $0x40] sm:$0xff]  ;;  %1747 = vst [vmem:[%s2788_s20 + $0x20] sm:$0xff] %v1235_v16  ;;  %s2514_s25 = scalar_lea.vmem %s2513_s27, 131072  ;;  %p2515_p5 = scmp.lt.s32.totalorder %s4320_s6, %s2513_s27 }
  0x59   : > { %1748 = vst [vmem:[%s2788_s20 + $0x28] sm:$0xff] %v1236_v17  ;;  %v1238_v25 = vadd.f32 %v726_v22, %v214_v20  ;;  %v1239_v26 = vadd.f32 %v727_v24, %v215_v23  ;;  %v216_v27 = vld [vmem:[%s2766_s3 + $0x48] sm:$0xff]  ;;  %v217_v29 = vld [vmem:[%s2766_s3 + $0x50] sm:$0xff]  ;;  %v218_v32 = vld [vmem:[%s2766_s3 + $0x58] sm:$0xff]  ;;  %p2511_p10 = pneg %p2510_p12  ;;  %p2516_p7 = scmp.lt.s32.totalorder %s2514_s25, %s2508_s24 }
  0x5a   : > { %v728_v28 = vld [vmem:[%s2773_s29 + $0x48] sm:$0xff]  ;;  %1749 = vst [vmem:[%s2788_s20 + $0x30] sm:$0xff] %v1237_v21  ;;  %v729_v31 = vld [vmem:[%s2773_s29 + $0x50] sm:$0xff]  ;;  %v730_v33 = vld [vmem:[%s2773_s29 + $0x58] sm:$0xff] }
  0x5b   : > { %v1240_v30 = vadd.f32 %v728_v28, %v216_v27  ;;  %1750 = vst [vmem:[%s2788_s20 + $0x38] sm:$0xff] %v1238_v25  ;;  %1751 = vst [vmem:[%s2788_s20 + $0x40] sm:$0xff] %v1239_v26  ;;  %v1241_v34 = vadd.f32 %v729_v31, %v217_v29  ;;  %v1242_v35 = vadd.f32 %v730_v33, %v218_v32  ;;  %v219_v36 = vld [vmem:[%s2766_s3 + $0x60] sm:$0xff]  ;;  %v220_v38 = vld [vmem:[%s2766_s3 + $0x68] sm:$0xff]  ;;  %p2517_p9 = por %p2516_p7, %p2515_p5 }
  0x5c   : > { %v731_v37 = vld [vmem:[%s2773_s29 + $0x60] sm:$0xff]  ;;  %v732_v40 = vld [vmem:[%s2773_s29 + $0x68] sm:$0xff]  ;;  %v221_v41 = vld [vmem:[%s2766_s3 + $0x70] sm:$0xff] }
  0x5d   : > { %1752 = vst [vmem:[%s2788_s20 + $0x48] sm:$0xff] %v1240_v30  ;;  %v1243_v39 = vadd.f32 %v731_v37, %v219_v36  ;;  %v733_v42 = vld [vmem:[%s2773_s29 + $0x70] sm:$0xff]  ;;  %1753 = vst [vmem:[%s2788_s20 + $0x50] sm:$0xff] %v1241_v34  ;;  %v1244_v43 = vadd.f32 %v732_v40, %v220_v38  ;;  %v222_v45 = vld [vmem:[%s2766_s3 + $0x78] sm:$0xff]  ;;  %p2518_p11 = pnand %p2517_p9, %p2511_p10 }
  0x5e   : > { %1754 = vst [vmem:[%s2788_s20 + $0x58] sm:$0xff] %v1242_v35  ;;  %v1245_v44 = vadd.f32 %v733_v42, %v221_v41  ;;  %v734_v46 = vld [vmem:[%s2773_s29 + $0x78] sm:$0xff]  ;;  %v223_v47 = vld [vmem:[%s2766_s3 + $0x80] sm:$0xff]  ;;  %v224_v50 = vld [vmem:[%s2766_s3 + $0x88] sm:$0xff] }
  0x5f   : > { %1755 = vst [vmem:[%s2788_s20 + $0x60] sm:$0xff] %v1243_v39  ;;  %v1246_v48 = vadd.f32 %v734_v46, %v222_v45  ;;  %v735_v49 = vld [vmem:[%s2773_s29 + $0x80] sm:$0xff]  ;;  %v736_v51 = vld [vmem:[%s2773_s29 + $0x88] sm:$0xff]  ;;  %1756 = vst [vmem:[%s2788_s20 + $0x68] sm:$0xff] %v1244_v43 }
  0x60   : > { %1757 = vst [vmem:[%s2788_s20 + $0x70] sm:$0xff] %v1245_v44  ;;  %v1247_v52 = vadd.f32 %v735_v49, %v223_v47  ;;  %v1248_v53 = vadd.f32 %v736_v51, %v224_v50  ;;  %v225_v54 = vld [vmem:[%s2766_s3 + $0x90] sm:$0xff]  ;;  %v226_v56 = vld [vmem:[%s2766_s3 + $0x98] sm:$0xff]  ;;  %v227_v59 = vld [vmem:[%s2766_s3 + $0xa0] sm:$0xff] }
  0x61   : > { %v737_v55 = vld [vmem:[%s2773_s29 + $0x90] sm:$0xff]  ;;  %1758 = vst [vmem:[%s2788_s20 + $0x78] sm:$0xff] %v1246_v48  ;;  %v738_v58 = vld [vmem:[%s2773_s29 + $0x98] sm:$0xff]  ;;  %v739_v60 = vld [vmem:[%s2773_s29 + $0xa0] sm:$0xff] }
  0x62   : > { %v1249_v57 = vadd.f32 %v737_v55, %v225_v54  ;;  %1759 = vst [vmem:[%s2788_s20 + $0x80] sm:$0xff] %v1247_v52  ;;  %1760 = vst [vmem:[%s2788_s20 + $0x88] sm:$0xff] %v1248_v53  ;;  %v1250_v61 = vadd.f32 %v738_v58, %v226_v56  ;;  %v1251_v62 = vadd.f32 %v739_v60, %v227_v59  ;;  %v228_v63 = vld [vmem:[%s2766_s3 + $0xa8] sm:$0xff]  ;;  %v229_v1 = vld [vmem:[%s2766_s3 + $0xb0] sm:$0xff] }
  0x63   : > { %v740_v0 = vld [vmem:[%s2773_s29 + $0xa8] sm:$0xff]  ;;  %v741_v3 = vld [vmem:[%s2773_s29 + $0xb0] sm:$0xff]  ;;  %v230_v4 = vld [vmem:[%s2766_s3 + $0xb8] sm:$0xff] }
  0x64   : > { %1761 = vst [vmem:[%s2788_s20 + $0x90] sm:$0xff] %v1249_v57  ;;  %v1252_v2 = vadd.f32 %v740_v0, %v228_v63  ;;  %v742_v5 = vld [vmem:[%s2773_s29 + $0xb8] sm:$0xff]  ;;  %1762 = vst [vmem:[%s2788_s20 + $0x98] sm:$0xff] %v1250_v61  ;;  %v1253_v6 = vadd.f32 %v741_v3, %v229_v1  ;;  %v231_v8 = vld [vmem:[%s2766_s3 + $0xc0] sm:$0xff] }
  0x65   : > { %1763 = vst [vmem:[%s2788_s20 + $0xa0] sm:$0xff] %v1251_v62  ;;  %v1254_v7 = vadd.f32 %v742_v5, %v230_v4  ;;  %v743_v9 = vld [vmem:[%s2773_s29 + $0xc0] sm:$0xff]  ;;  %v232_v10 = vld [vmem:[%s2766_s3 + $0xc8] sm:$0xff]  ;;  %v233_v13 = vld [vmem:[%s2766_s3 + $0xd0] sm:$0xff] }
  0x66   : > { %1764 = vst [vmem:[%s2788_s20 + $0xa8] sm:$0xff] %v1252_v2  ;;  %v1255_v11 = vadd.f32 %v743_v9, %v231_v8  ;;  %v744_v12 = vld [vmem:[%s2773_s29 + $0xc8] sm:$0xff]  ;;  %v745_v14 = vld [vmem:[%s2773_s29 + $0xd0] sm:$0xff]  ;;  %1765 = vst [vmem:[%s2788_s20 + $0xb0] sm:$0xff] %v1253_v6 }
  0x67   : > { %1766 = vst [vmem:[%s2788_s20 + $0xb8] sm:$0xff] %v1254_v7  ;;  %v1256_v15 = vadd.f32 %v744_v12, %v232_v10  ;;  %v1257_v16 = vadd.f32 %v745_v14, %v233_v13  ;;  %v234_v17 = vld [vmem:[%s2766_s3 + $0xd8] sm:$0xff]  ;;  %v235_v19 = vld [vmem:[%s2766_s3 + $0xe0] sm:$0xff]  ;;  %v236_v22 = vld [vmem:[%s2766_s3 + $0xe8] sm:$0xff] }
  0x68   : > { %v746_v18 = vld [vmem:[%s2773_s29 + $0xd8] sm:$0xff]  ;;  %1767 = vst [vmem:[%s2788_s20 + $0xc0] sm:$0xff] %v1255_v11  ;;  %v747_v21 = vld [vmem:[%s2773_s29 + $0xe0] sm:$0xff]  ;;  %v748_v23 = vld [vmem:[%s2773_s29 + $0xe8] sm:$0xff] }
  0x69   : > { %v1258_v20 = vadd.f32 %v746_v18, %v234_v17  ;;  %1768 = vst [vmem:[%s2788_s20 + $0xc8] sm:$0xff] %v1256_v15  ;;  %1769 = vst [vmem:[%s2788_s20 + $0xd0] sm:$0xff] %v1257_v16  ;;  %v1259_v24 = vadd.f32 %v747_v21, %v235_v19  ;;  %v1260_v25 = vadd.f32 %v748_v23, %v236_v22  ;;  %v237_v26 = vld [vmem:[%s2766_s3 + $0xf0] sm:$0xff]  ;;  %v238_v28 = vld [vmem:[%s2766_s3 + $0xf8] sm:$0xff] }
  0x6a   : > { %v749_v27 = vld [vmem:[%s2773_s29 + $0xf0] sm:$0xff]  ;;  %v750_v30 = vld [vmem:[%s2773_s29 + $0xf8] sm:$0xff]  ;;  %v239_v31 = vld [vmem:[%s2766_s3 + $0x100] sm:$0xff] }
  0x6b   : > { %1770 = vst [vmem:[%s2788_s20 + $0xd8] sm:$0xff] %v1258_v20  ;;  %v1261_v29 = vadd.f32 %v749_v27, %v237_v26  ;;  %v751_v32 = vld [vmem:[%s2773_s29 + $0x100] sm:$0xff]  ;;  %1771 = vst [vmem:[%s2788_s20 + $0xe0] sm:$0xff] %v1259_v24  ;;  %v1262_v33 = vadd.f32 %v750_v30, %v238_v28  ;;  %v240_v35 = vld [vmem:[%s2766_s3 + $0x108] sm:$0xff] }
  0x6c   : > { %1772 = vst [vmem:[%s2788_s20 + $0xe8] sm:$0xff] %v1260_v25  ;;  %v1263_v34 = vadd.f32 %v751_v32, %v239_v31  ;;  %v752_v36 = vld [vmem:[%s2773_s29 + $0x108] sm:$0xff]  ;;  %v241_v37 = vld [vmem:[%s2766_s3 + $0x110] sm:$0xff]  ;;  %v242_v40 = vld [vmem:[%s2766_s3 + $0x118] sm:$0xff] }
  0x6d   : > { %1773 = vst [vmem:[%s2788_s20 + $0xf0] sm:$0xff] %v1261_v29  ;;  %v1264_v38 = vadd.f32 %v752_v36, %v240_v35  ;;  %v753_v39 = vld [vmem:[%s2773_s29 + $0x110] sm:$0xff]  ;;  %v754_v41 = vld [vmem:[%s2773_s29 + $0x118] sm:$0xff]  ;;  %1774 = vst [vmem:[%s2788_s20 + $0xf8] sm:$0xff] %v1262_v33 }
  0x6e   : > { %1775 = vst [vmem:[%s2788_s20 + $0x100] sm:$0xff] %v1263_v34  ;;  %v1265_v42 = vadd.f32 %v753_v39, %v241_v37  ;;  %v1266_v43 = vadd.f32 %v754_v41, %v242_v40  ;;  %v243_v44 = vld [vmem:[%s2766_s3 + $0x120] sm:$0xff]  ;;  %v244_v46 = vld [vmem:[%s2766_s3 + $0x128] sm:$0xff]  ;;  %v245_v49 = vld [vmem:[%s2766_s3 + $0x130] sm:$0xff] }
  0x6f   : > { %v755_v45 = vld [vmem:[%s2773_s29 + $0x120] sm:$0xff]  ;;  %1776 = vst [vmem:[%s2788_s20 + $0x108] sm:$0xff] %v1264_v38  ;;  %v756_v48 = vld [vmem:[%s2773_s29 + $0x128] sm:$0xff]  ;;  %v757_v50 = vld [vmem:[%s2773_s29 + $0x130] sm:$0xff] }
  0x70   : > { %v1267_v47 = vadd.f32 %v755_v45, %v243_v44  ;;  %1777 = vst [vmem:[%s2788_s20 + $0x110] sm:$0xff] %v1265_v42  ;;  %1778 = vst [vmem:[%s2788_s20 + $0x118] sm:$0xff] %v1266_v43  ;;  %v1268_v51 = vadd.f32 %v756_v48, %v244_v46  ;;  %v1269_v52 = vadd.f32 %v757_v50, %v245_v49  ;;  %v246_v53 = vld [vmem:[%s2766_s3 + $0x138] sm:$0xff]  ;;  %v247_v55 = vld [vmem:[%s2766_s3 + $0x140] sm:$0xff] }
  0x71   : > { %v758_v54 = vld [vmem:[%s2773_s29 + $0x138] sm:$0xff]  ;;  %v759_v57 = vld [vmem:[%s2773_s29 + $0x140] sm:$0xff]  ;;  %v248_v58 = vld [vmem:[%s2766_s3 + $0x148] sm:$0xff] }
  0x72   : > { %1779 = vst [vmem:[%s2788_s20 + $0x120] sm:$0xff] %v1267_v47  ;;  %v1270_v56 = vadd.f32 %v758_v54, %v246_v53  ;;  %v760_v59 = vld [vmem:[%s2773_s29 + $0x148] sm:$0xff]  ;;  %1780 = vst [vmem:[%s2788_s20 + $0x128] sm:$0xff] %v1268_v51  ;;  %v1271_v60 = vadd.f32 %v759_v57, %v247_v55  ;;  %v249_v62 = vld [vmem:[%s2766_s3 + $0x150] sm:$0xff] }
  0x73   : > { %1781 = vst [vmem:[%s2788_s20 + $0x130] sm:$0xff] %v1269_v52  ;;  %v1272_v61 = vadd.f32 %v760_v59, %v248_v58  ;;  %v761_v63 = vld [vmem:[%s2773_s29 + $0x150] sm:$0xff]  ;;  %v250_v0 = vld [vmem:[%s2766_s3 + $0x158] sm:$0xff]  ;;  %v251_v3 = vld [vmem:[%s2766_s3 + $0x160] sm:$0xff] }
  0x74   : > { %1782 = vst [vmem:[%s2788_s20 + $0x138] sm:$0xff] %v1270_v56  ;;  %v1273_v1 = vadd.f32 %v761_v63, %v249_v62  ;;  %v762_v2 = vld [vmem:[%s2773_s29 + $0x158] sm:$0xff]  ;;  %v763_v4 = vld [vmem:[%s2773_s29 + $0x160] sm:$0xff]  ;;  %1783 = vst [vmem:[%s2788_s20 + $0x140] sm:$0xff] %v1271_v60 }
  0x75   : > { %1784 = vst [vmem:[%s2788_s20 + $0x148] sm:$0xff] %v1272_v61  ;;  %v1274_v5 = vadd.f32 %v762_v2, %v250_v0  ;;  %v1275_v6 = vadd.f32 %v763_v4, %v251_v3  ;;  %v252_v7 = vld [vmem:[%s2766_s3 + $0x168] sm:$0xff]  ;;  %v253_v9 = vld [vmem:[%s2766_s3 + $0x170] sm:$0xff]  ;;  %v254_v12 = vld [vmem:[%s2766_s3 + $0x178] sm:$0xff] }
  0x76   : > { %v764_v8 = vld [vmem:[%s2773_s29 + $0x168] sm:$0xff]  ;;  %1785 = vst [vmem:[%s2788_s20 + $0x150] sm:$0xff] %v1273_v1  ;;  %v765_v11 = vld [vmem:[%s2773_s29 + $0x170] sm:$0xff]  ;;  %v766_v13 = vld [vmem:[%s2773_s29 + $0x178] sm:$0xff] }
  0x77   : > { %v1276_v10 = vadd.f32 %v764_v8, %v252_v7  ;;  %1786 = vst [vmem:[%s2788_s20 + $0x158] sm:$0xff] %v1274_v5  ;;  %1787 = vst [vmem:[%s2788_s20 + $0x160] sm:$0xff] %v1275_v6  ;;  %v1277_v14 = vadd.f32 %v765_v11, %v253_v9  ;;  %v1278_v15 = vadd.f32 %v766_v13, %v254_v12  ;;  %v255_v16 = vld [vmem:[%s2766_s3 + $0x180] sm:$0xff]  ;;  %v256_v18 = vld [vmem:[%s2766_s3 + $0x188] sm:$0xff] }
  0x78   : > { %v767_v17 = vld [vmem:[%s2773_s29 + $0x180] sm:$0xff]  ;;  %v768_v20 = vld [vmem:[%s2773_s29 + $0x188] sm:$0xff]  ;;  %v257_v21 = vld [vmem:[%s2766_s3 + $0x190] sm:$0xff] }
  0x79   : > { %1788 = vst [vmem:[%s2788_s20 + $0x168] sm:$0xff] %v1276_v10  ;;  %v1279_v19 = vadd.f32 %v767_v17, %v255_v16  ;;  %v769_v22 = vld [vmem:[%s2773_s29 + $0x190] sm:$0xff]  ;;  %1789 = vst [vmem:[%s2788_s20 + $0x170] sm:$0xff] %v1277_v14  ;;  %v1280_v23 = vadd.f32 %v768_v20, %v256_v18  ;;  %v258_v25 = vld [vmem:[%s2766_s3 + $0x198] sm:$0xff] }
  0x7a   : > { %1790 = vst [vmem:[%s2788_s20 + $0x178] sm:$0xff] %v1278_v15  ;;  %v1281_v24 = vadd.f32 %v769_v22, %v257_v21  ;;  %v770_v26 = vld [vmem:[%s2773_s29 + $0x198] sm:$0xff]  ;;  %v259_v27 = vld [vmem:[%s2766_s3 + $0x1a0] sm:$0xff]  ;;  %v260_v30 = vld [vmem:[%s2766_s3 + $0x1a8] sm:$0xff] }
  0x7b   : > { %1791 = vst [vmem:[%s2788_s20 + $0x180] sm:$0xff] %v1279_v19  ;;  %v1282_v28 = vadd.f32 %v770_v26, %v258_v25  ;;  %v771_v29 = vld [vmem:[%s2773_s29 + $0x1a0] sm:$0xff]  ;;  %v772_v31 = vld [vmem:[%s2773_s29 + $0x1a8] sm:$0xff]  ;;  %1792 = vst [vmem:[%s2788_s20 + $0x188] sm:$0xff] %v1280_v23 }
  0x7c   : > { %1793 = vst [vmem:[%s2788_s20 + $0x190] sm:$0xff] %v1281_v24  ;;  %v1283_v32 = vadd.f32 %v771_v29, %v259_v27  ;;  %v1284_v33 = vadd.f32 %v772_v31, %v260_v30  ;;  %v261_v34 = vld [vmem:[%s2766_s3 + $0x1b0] sm:$0xff]  ;;  %v262_v36 = vld [vmem:[%s2766_s3 + $0x1b8] sm:$0xff]  ;;  %v263_v39 = vld [vmem:[%s2766_s3 + $0x1c0] sm:$0xff] }
  0x7d   : > { %v773_v35 = vld [vmem:[%s2773_s29 + $0x1b0] sm:$0xff]  ;;  %1794 = vst [vmem:[%s2788_s20 + $0x198] sm:$0xff] %v1282_v28  ;;  %v774_v38 = vld [vmem:[%s2773_s29 + $0x1b8] sm:$0xff]  ;;  %v775_v40 = vld [vmem:[%s2773_s29 + $0x1c0] sm:$0xff] }
  0x7e   : > { %v1285_v37 = vadd.f32 %v773_v35, %v261_v34  ;;  %1795 = vst [vmem:[%s2788_s20 + $0x1a0] sm:$0xff] %v1283_v32  ;;  %1796 = vst [vmem:[%s2788_s20 + $0x1a8] sm:$0xff] %v1284_v33  ;;  %v1286_v41 = vadd.f32 %v774_v38, %v262_v36  ;;  %v1287_v42 = vadd.f32 %v775_v40, %v263_v39  ;;  %v264_v43 = vld [vmem:[%s2766_s3 + $0x1c8] sm:$0xff]  ;;  %v265_v45 = vld [vmem:[%s2766_s3 + $0x1d0] sm:$0xff] }
  0x7f   : > { %v776_v44 = vld [vmem:[%s2773_s29 + $0x1c8] sm:$0xff]  ;;  %v777_v47 = vld [vmem:[%s2773_s29 + $0x1d0] sm:$0xff]  ;;  %v266_v48 = vld [vmem:[%s2766_s3 + $0x1d8] sm:$0xff] }
  0x80   : > { %1797 = vst [vmem:[%s2788_s20 + $0x1b0] sm:$0xff] %v1285_v37  ;;  %v1288_v46 = vadd.f32 %v776_v44, %v264_v43  ;;  %v778_v49 = vld [vmem:[%s2773_s29 + $0x1d8] sm:$0xff]  ;;  %1798 = vst [vmem:[%s2788_s20 + $0x1b8] sm:$0xff] %v1286_v41  ;;  %v1289_v50 = vadd.f32 %v777_v47, %v265_v45  ;;  %v267_v52 = vld [vmem:[%s2766_s3 + $0x1e0] sm:$0xff] }
  0x81   : > { %1799 = vst [vmem:[%s2788_s20 + $0x1c0] sm:$0xff] %v1287_v42  ;;  %v1290_v51 = vadd.f32 %v778_v49, %v266_v48  ;;  %v779_v53 = vld [vmem:[%s2773_s29 + $0x1e0] sm:$0xff]  ;;  %v268_v54 = vld [vmem:[%s2766_s3 + $0x1e8] sm:$0xff]  ;;  %v269_v57 = vld [vmem:[%s2766_s3 + $0x1f0] sm:$0xff] }
  0x82   : > { %1800 = vst [vmem:[%s2788_s20 + $0x1c8] sm:$0xff] %v1288_v46  ;;  %v1291_v55 = vadd.f32 %v779_v53, %v267_v52  ;;  %v780_v56 = vld [vmem:[%s2773_s29 + $0x1e8] sm:$0xff]  ;;  %v781_v58 = vld [vmem:[%s2773_s29 + $0x1f0] sm:$0xff]  ;;  %1801 = vst [vmem:[%s2788_s20 + $0x1d0] sm:$0xff] %v1289_v50 }
  0x83   : > { %1802 = vst [vmem:[%s2788_s20 + $0x1d8] sm:$0xff] %v1290_v51  ;;  %v1292_v59 = vadd.f32 %v780_v56, %v268_v54  ;;  %v1293_v60 = vadd.f32 %v781_v58, %v269_v57  ;;  %v270_v61 = vld [vmem:[%s2766_s3 + $0x1f8] sm:$0xff]  ;;  %v271_v63 = vld [vmem:[%s2766_s3 + $0x200] sm:$0xff]  ;;  %v272_v2 = vld [vmem:[%s2766_s3 + $0x208] sm:$0xff] }
  0x84   : > { %v782_v62 = vld [vmem:[%s2773_s29 + $0x1f8] sm:$0xff]  ;;  %1803 = vst [vmem:[%s2788_s20 + $0x1e0] sm:$0xff] %v1291_v55  ;;  %v783_v1 = vld [vmem:[%s2773_s29 + $0x200] sm:$0xff]  ;;  %v784_v3 = vld [vmem:[%s2773_s29 + $0x208] sm:$0xff] }
  0x85   : > { %v1294_v0 = vadd.f32 %v782_v62, %v270_v61  ;;  %1804 = vst [vmem:[%s2788_s20 + $0x1e8] sm:$0xff] %v1292_v59  ;;  %1805 = vst [vmem:[%s2788_s20 + $0x1f0] sm:$0xff] %v1293_v60  ;;  %v1295_v4 = vadd.f32 %v783_v1, %v271_v63  ;;  %v1296_v5 = vadd.f32 %v784_v3, %v272_v2  ;;  %v273_v6 = vld [vmem:[%s2766_s3 + $0x210] sm:$0xff]  ;;  %v274_v8 = vld [vmem:[%s2766_s3 + $0x218] sm:$0xff] }
  0x86   : > { %v785_v7 = vld [vmem:[%s2773_s29 + $0x210] sm:$0xff]  ;;  %v786_v10 = vld [vmem:[%s2773_s29 + $0x218] sm:$0xff]  ;;  %v275_v11 = vld [vmem:[%s2766_s3 + $0x220] sm:$0xff] }
  0x87   : > { %1806 = vst [vmem:[%s2788_s20 + $0x1f8] sm:$0xff] %v1294_v0  ;;  %v1297_v9 = vadd.f32 %v785_v7, %v273_v6  ;;  %v787_v12 = vld [vmem:[%s2773_s29 + $0x220] sm:$0xff]  ;;  %1807 = vst [vmem:[%s2788_s20 + $0x200] sm:$0xff] %v1295_v4  ;;  %v1298_v13 = vadd.f32 %v786_v10, %v274_v8  ;;  %v276_v15 = vld [vmem:[%s2766_s3 + $0x228] sm:$0xff] }
  0x88   : > { %1808 = vst [vmem:[%s2788_s20 + $0x208] sm:$0xff] %v1296_v5  ;;  %v1299_v14 = vadd.f32 %v787_v12, %v275_v11  ;;  %v788_v16 = vld [vmem:[%s2773_s29 + $0x228] sm:$0xff]  ;;  %v277_v17 = vld [vmem:[%s2766_s3 + $0x230] sm:$0xff]  ;;  %v278_v20 = vld [vmem:[%s2766_s3 + $0x238] sm:$0xff] }
  0x89   : > { %1809 = vst [vmem:[%s2788_s20 + $0x210] sm:$0xff] %v1297_v9  ;;  %v1300_v18 = vadd.f32 %v788_v16, %v276_v15  ;;  %v789_v19 = vld [vmem:[%s2773_s29 + $0x230] sm:$0xff]  ;;  %v790_v21 = vld [vmem:[%s2773_s29 + $0x238] sm:$0xff]  ;;  %1810 = vst [vmem:[%s2788_s20 + $0x218] sm:$0xff] %v1298_v13 }
  0x8a   : > { %1811 = vst [vmem:[%s2788_s20 + $0x220] sm:$0xff] %v1299_v14  ;;  %v1301_v22 = vadd.f32 %v789_v19, %v277_v17  ;;  %v1302_v23 = vadd.f32 %v790_v21, %v278_v20  ;;  %v279_v24 = vld [vmem:[%s2766_s3 + $0x240] sm:$0xff]  ;;  %v280_v26 = vld [vmem:[%s2766_s3 + $0x248] sm:$0xff]  ;;  %v281_v29 = vld [vmem:[%s2766_s3 + $0x250] sm:$0xff] }
  0x8b   : > { %v791_v25 = vld [vmem:[%s2773_s29 + $0x240] sm:$0xff]  ;;  %1812 = vst [vmem:[%s2788_s20 + $0x228] sm:$0xff] %v1300_v18  ;;  %v792_v28 = vld [vmem:[%s2773_s29 + $0x248] sm:$0xff]  ;;  %v793_v30 = vld [vmem:[%s2773_s29 + $0x250] sm:$0xff] }
  0x8c   : > { %v1303_v27 = vadd.f32 %v791_v25, %v279_v24  ;;  %1813 = vst [vmem:[%s2788_s20 + $0x230] sm:$0xff] %v1301_v22  ;;  %1814 = vst [vmem:[%s2788_s20 + $0x238] sm:$0xff] %v1302_v23  ;;  %v1304_v31 = vadd.f32 %v792_v28, %v280_v26  ;;  %v1305_v32 = vadd.f32 %v793_v30, %v281_v29  ;;  %v282_v33 = vld [vmem:[%s2766_s3 + $0x258] sm:$0xff]  ;;  %v283_v35 = vld [vmem:[%s2766_s3 + $0x260] sm:$0xff] }
  0x8d   : > { %v794_v34 = vld [vmem:[%s2773_s29 + $0x258] sm:$0xff]  ;;  %v795_v37 = vld [vmem:[%s2773_s29 + $0x260] sm:$0xff]  ;;  %v284_v38 = vld [vmem:[%s2766_s3 + $0x268] sm:$0xff] }
  0x8e   : > { %1815 = vst [vmem:[%s2788_s20 + $0x240] sm:$0xff] %v1303_v27  ;;  %v1306_v36 = vadd.f32 %v794_v34, %v282_v33  ;;  %v796_v39 = vld [vmem:[%s2773_s29 + $0x268] sm:$0xff]  ;;  %1816 = vst [vmem:[%s2788_s20 + $0x248] sm:$0xff] %v1304_v31  ;;  %v1307_v40 = vadd.f32 %v795_v37, %v283_v35  ;;  %v285_v42 = vld [vmem:[%s2766_s3 + $0x270] sm:$0xff] }
  0x8f   : > { %1817 = vst [vmem:[%s2788_s20 + $0x250] sm:$0xff] %v1305_v32  ;;  %v1308_v41 = vadd.f32 %v796_v39, %v284_v38  ;;  %v797_v43 = vld [vmem:[%s2773_s29 + $0x270] sm:$0xff]  ;;  %v286_v44 = vld [vmem:[%s2766_s3 + $0x278] sm:$0xff]  ;;  %v287_v47 = vld [vmem:[%s2766_s3 + $0x280] sm:$0xff] }
  0x90   : > { %1818 = vst [vmem:[%s2788_s20 + $0x258] sm:$0xff] %v1306_v36  ;;  %v1309_v45 = vadd.f32 %v797_v43, %v285_v42  ;;  %v798_v46 = vld [vmem:[%s2773_s29 + $0x278] sm:$0xff]  ;;  %v799_v48 = vld [vmem:[%s2773_s29 + $0x280] sm:$0xff]  ;;  %1819 = vst [vmem:[%s2788_s20 + $0x260] sm:$0xff] %v1307_v40 }
  0x91   : > { %1820 = vst [vmem:[%s2788_s20 + $0x268] sm:$0xff] %v1308_v41  ;;  %v1310_v49 = vadd.f32 %v798_v46, %v286_v44  ;;  %v1311_v50 = vadd.f32 %v799_v48, %v287_v47  ;;  %v288_v51 = vld [vmem:[%s2766_s3 + $0x288] sm:$0xff]  ;;  %v289_v53 = vld [vmem:[%s2766_s3 + $0x290] sm:$0xff]  ;;  %v290_v56 = vld [vmem:[%s2766_s3 + $0x298] sm:$0xff] }
  0x92   : > { %v800_v52 = vld [vmem:[%s2773_s29 + $0x288] sm:$0xff]  ;;  %1821 = vst [vmem:[%s2788_s20 + $0x270] sm:$0xff] %v1309_v45  ;;  %v801_v55 = vld [vmem:[%s2773_s29 + $0x290] sm:$0xff]  ;;  %v802_v57 = vld [vmem:[%s2773_s29 + $0x298] sm:$0xff] }
  0x93   : > { %v1312_v54 = vadd.f32 %v800_v52, %v288_v51  ;;  %1822 = vst [vmem:[%s2788_s20 + $0x278] sm:$0xff] %v1310_v49  ;;  %1823 = vst [vmem:[%s2788_s20 + $0x280] sm:$0xff] %v1311_v50  ;;  %v1313_v58 = vadd.f32 %v801_v55, %v289_v53  ;;  %v1314_v59 = vadd.f32 %v802_v57, %v290_v56  ;;  %v291_v60 = vld [vmem:[%s2766_s3 + $0x2a0] sm:$0xff]  ;;  %v292_v62 = vld [vmem:[%s2766_s3 + $0x2a8] sm:$0xff] }
  0x94   : > { %v803_v61 = vld [vmem:[%s2773_s29 + $0x2a0] sm:$0xff]  ;;  %v804_v0 = vld [vmem:[%s2773_s29 + $0x2a8] sm:$0xff]  ;;  %v293_v1 = vld [vmem:[%s2766_s3 + $0x2b0] sm:$0xff] }
  0x95   : > { %1824 = vst [vmem:[%s2788_s20 + $0x288] sm:$0xff] %v1312_v54  ;;  %v1315_v63 = vadd.f32 %v803_v61, %v291_v60  ;;  %v805_v2 = vld [vmem:[%s2773_s29 + $0x2b0] sm:$0xff]  ;;  %1825 = vst [vmem:[%s2788_s20 + $0x290] sm:$0xff] %v1313_v58  ;;  %v1316_v3 = vadd.f32 %v804_v0, %v292_v62  ;;  %v294_v5 = vld [vmem:[%s2766_s3 + $0x2b8] sm:$0xff] }
  0x96   : > { %1826 = vst [vmem:[%s2788_s20 + $0x298] sm:$0xff] %v1314_v59  ;;  %v1317_v4 = vadd.f32 %v805_v2, %v293_v1  ;;  %v806_v6 = vld [vmem:[%s2773_s29 + $0x2b8] sm:$0xff]  ;;  %v295_v7 = vld [vmem:[%s2766_s3 + $0x2c0] sm:$0xff]  ;;  %v296_v10 = vld [vmem:[%s2766_s3 + $0x2c8] sm:$0xff] }
  0x97   : > { %1827 = vst [vmem:[%s2788_s20 + $0x2a0] sm:$0xff] %v1315_v63  ;;  %v1318_v8 = vadd.f32 %v806_v6, %v294_v5  ;;  %v807_v9 = vld [vmem:[%s2773_s29 + $0x2c0] sm:$0xff]  ;;  %v808_v11 = vld [vmem:[%s2773_s29 + $0x2c8] sm:$0xff]  ;;  %1828 = vst [vmem:[%s2788_s20 + $0x2a8] sm:$0xff] %v1316_v3 }
  0x98   : > { %1829 = vst [vmem:[%s2788_s20 + $0x2b0] sm:$0xff] %v1317_v4  ;;  %v1319_v12 = vadd.f32 %v807_v9, %v295_v7  ;;  %v1320_v13 = vadd.f32 %v808_v11, %v296_v10  ;;  %v297_v14 = vld [vmem:[%s2766_s3 + $0x2d0] sm:$0xff]  ;;  %v298_v16 = vld [vmem:[%s2766_s3 + $0x2d8] sm:$0xff]  ;;  %v299_v19 = vld [vmem:[%s2766_s3 + $0x2e0] sm:$0xff] }
  0x99   : > { %v809_v15 = vld [vmem:[%s2773_s29 + $0x2d0] sm:$0xff]  ;;  %1830 = vst [vmem:[%s2788_s20 + $0x2b8] sm:$0xff] %v1318_v8  ;;  %v810_v18 = vld [vmem:[%s2773_s29 + $0x2d8] sm:$0xff]  ;;  %v811_v20 = vld [vmem:[%s2773_s29 + $0x2e0] sm:$0xff] }
  0x9a   : > { %v1321_v17 = vadd.f32 %v809_v15, %v297_v14  ;;  %1831 = vst [vmem:[%s2788_s20 + $0x2c0] sm:$0xff] %v1319_v12  ;;  %1832 = vst [vmem:[%s2788_s20 + $0x2c8] sm:$0xff] %v1320_v13  ;;  %v1322_v21 = vadd.f32 %v810_v18, %v298_v16  ;;  %v1323_v22 = vadd.f32 %v811_v20, %v299_v19  ;;  %v300_v23 = vld [vmem:[%s2766_s3 + $0x2e8] sm:$0xff]  ;;  %v301_v25 = vld [vmem:[%s2766_s3 + $0x2f0] sm:$0xff] }
  0x9b   : > { %v812_v24 = vld [vmem:[%s2773_s29 + $0x2e8] sm:$0xff]  ;;  %v813_v27 = vld [vmem:[%s2773_s29 + $0x2f0] sm:$0xff]  ;;  %v302_v28 = vld [vmem:[%s2766_s3 + $0x2f8] sm:$0xff] }
  0x9c   : > { %1833 = vst [vmem:[%s2788_s20 + $0x2d0] sm:$0xff] %v1321_v17  ;;  %v1324_v26 = vadd.f32 %v812_v24, %v300_v23  ;;  %v814_v29 = vld [vmem:[%s2773_s29 + $0x2f8] sm:$0xff]  ;;  %1834 = vst [vmem:[%s2788_s20 + $0x2d8] sm:$0xff] %v1322_v21  ;;  %v1325_v30 = vadd.f32 %v813_v27, %v301_v25  ;;  %v303_v32 = vld [vmem:[%s2766_s3 + $0x300] sm:$0xff] }
  0x9d   : > { %1835 = vst [vmem:[%s2788_s20 + $0x2e0] sm:$0xff] %v1323_v22  ;;  %v1326_v31 = vadd.f32 %v814_v29, %v302_v28  ;;  %v815_v33 = vld [vmem:[%s2773_s29 + $0x300] sm:$0xff]  ;;  %v304_v34 = vld [vmem:[%s2766_s3 + $0x308] sm:$0xff]  ;;  %v305_v37 = vld [vmem:[%s2766_s3 + $0x310] sm:$0xff] }
  0x9e   : > { %1836 = vst [vmem:[%s2788_s20 + $0x2e8] sm:$0xff] %v1324_v26  ;;  %v1327_v35 = vadd.f32 %v815_v33, %v303_v32  ;;  %v816_v36 = vld [vmem:[%s2773_s29 + $0x308] sm:$0xff]  ;;  %v817_v38 = vld [vmem:[%s2773_s29 + $0x310] sm:$0xff]  ;;  %1837 = vst [vmem:[%s2788_s20 + $0x2f0] sm:$0xff] %v1325_v30 }
  0x9f   : > { %1838 = vst [vmem:[%s2788_s20 + $0x2f8] sm:$0xff] %v1326_v31  ;;  %v1328_v39 = vadd.f32 %v816_v36, %v304_v34  ;;  %v1329_v40 = vadd.f32 %v817_v38, %v305_v37  ;;  %v306_v41 = vld [vmem:[%s2766_s3 + $0x318] sm:$0xff]  ;;  %v307_v43 = vld [vmem:[%s2766_s3 + $0x320] sm:$0xff]  ;;  %v308_v46 = vld [vmem:[%s2766_s3 + $0x328] sm:$0xff] }
  0xa0   : > { %v818_v42 = vld [vmem:[%s2773_s29 + $0x318] sm:$0xff]  ;;  %1839 = vst [vmem:[%s2788_s20 + $0x300] sm:$0xff] %v1327_v35  ;;  %v819_v45 = vld [vmem:[%s2773_s29 + $0x320] sm:$0xff]  ;;  %v820_v47 = vld [vmem:[%s2773_s29 + $0x328] sm:$0xff] }
  0xa1   : > { %v1330_v44 = vadd.f32 %v818_v42, %v306_v41  ;;  %1840 = vst [vmem:[%s2788_s20 + $0x308] sm:$0xff] %v1328_v39  ;;  %1841 = vst [vmem:[%s2788_s20 + $0x310] sm:$0xff] %v1329_v40  ;;  %v1331_v48 = vadd.f32 %v819_v45, %v307_v43  ;;  %v1332_v49 = vadd.f32 %v820_v47, %v308_v46  ;;  %v309_v50 = vld [vmem:[%s2766_s3 + $0x330] sm:$0xff]  ;;  %v310_v52 = vld [vmem:[%s2766_s3 + $0x338] sm:$0xff] }
  0xa2   : > { %v821_v51 = vld [vmem:[%s2773_s29 + $0x330] sm:$0xff]  ;;  %v822_v54 = vld [vmem:[%s2773_s29 + $0x338] sm:$0xff]  ;;  %v311_v55 = vld [vmem:[%s2766_s3 + $0x340] sm:$0xff] }
  0xa3   : > { %1842 = vst [vmem:[%s2788_s20 + $0x318] sm:$0xff] %v1330_v44  ;;  %v1333_v53 = vadd.f32 %v821_v51, %v309_v50  ;;  %v823_v56 = vld [vmem:[%s2773_s29 + $0x340] sm:$0xff]  ;;  %1843 = vst [vmem:[%s2788_s20 + $0x320] sm:$0xff] %v1331_v48  ;;  %v1334_v57 = vadd.f32 %v822_v54, %v310_v52  ;;  %v312_v59 = vld [vmem:[%s2766_s3 + $0x348] sm:$0xff] }
  0xa4   : > { %1844 = vst [vmem:[%s2788_s20 + $0x328] sm:$0xff] %v1332_v49  ;;  %v1335_v58 = vadd.f32 %v823_v56, %v311_v55  ;;  %v824_v60 = vld [vmem:[%s2773_s29 + $0x348] sm:$0xff]  ;;  %v313_v61 = vld [vmem:[%s2766_s3 + $0x350] sm:$0xff]  ;;  %v314_v0 = vld [vmem:[%s2766_s3 + $0x358] sm:$0xff] }
  0xa5   : > { %1845 = vst [vmem:[%s2788_s20 + $0x330] sm:$0xff] %v1333_v53  ;;  %v1336_v62 = vadd.f32 %v824_v60, %v312_v59  ;;  %v825_v63 = vld [vmem:[%s2773_s29 + $0x350] sm:$0xff]  ;;  %v826_v1 = vld [vmem:[%s2773_s29 + $0x358] sm:$0xff]  ;;  %1846 = vst [vmem:[%s2788_s20 + $0x338] sm:$0xff] %v1334_v57 }
  0xa6   : > { %1847 = vst [vmem:[%s2788_s20 + $0x340] sm:$0xff] %v1335_v58  ;;  %v1337_v2 = vadd.f32 %v825_v63, %v313_v61  ;;  %v1338_v3 = vadd.f32 %v826_v1, %v314_v0  ;;  %v315_v4 = vld [vmem:[%s2766_s3 + $0x360] sm:$0xff]  ;;  %v316_v6 = vld [vmem:[%s2766_s3 + $0x368] sm:$0xff]  ;;  %v317_v9 = vld [vmem:[%s2766_s3 + $0x370] sm:$0xff] }
  0xa7   : > { %v827_v5 = vld [vmem:[%s2773_s29 + $0x360] sm:$0xff]  ;;  %1848 = vst [vmem:[%s2788_s20 + $0x348] sm:$0xff] %v1336_v62  ;;  %v828_v8 = vld [vmem:[%s2773_s29 + $0x368] sm:$0xff]  ;;  %v829_v10 = vld [vmem:[%s2773_s29 + $0x370] sm:$0xff] }
  0xa8   : > { %v1339_v7 = vadd.f32 %v827_v5, %v315_v4  ;;  %1849 = vst [vmem:[%s2788_s20 + $0x350] sm:$0xff] %v1337_v2  ;;  %1850 = vst [vmem:[%s2788_s20 + $0x358] sm:$0xff] %v1338_v3  ;;  %v1340_v11 = vadd.f32 %v828_v8, %v316_v6  ;;  %v1341_v12 = vadd.f32 %v829_v10, %v317_v9  ;;  %v318_v13 = vld [vmem:[%s2766_s3 + $0x378] sm:$0xff]  ;;  %v319_v15 = vld [vmem:[%s2766_s3 + $0x380] sm:$0xff] }
  0xa9   : > { %v830_v14 = vld [vmem:[%s2773_s29 + $0x378] sm:$0xff]  ;;  %v831_v17 = vld [vmem:[%s2773_s29 + $0x380] sm:$0xff]  ;;  %v320_v18 = vld [vmem:[%s2766_s3 + $0x388] sm:$0xff] }
  0xaa   : > { %1851 = vst [vmem:[%s2788_s20 + $0x360] sm:$0xff] %v1339_v7  ;;  %v1342_v16 = vadd.f32 %v830_v14, %v318_v13  ;;  %v832_v19 = vld [vmem:[%s2773_s29 + $0x388] sm:$0xff]  ;;  %1852 = vst [vmem:[%s2788_s20 + $0x368] sm:$0xff] %v1340_v11  ;;  %v1343_v20 = vadd.f32 %v831_v17, %v319_v15  ;;  %v321_v22 = vld [vmem:[%s2766_s3 + $0x390] sm:$0xff] }
  0xab   : > { %1853 = vst [vmem:[%s2788_s20 + $0x370] sm:$0xff] %v1341_v12  ;;  %v1344_v21 = vadd.f32 %v832_v19, %v320_v18  ;;  %v833_v23 = vld [vmem:[%s2773_s29 + $0x390] sm:$0xff]  ;;  %v322_v24 = vld [vmem:[%s2766_s3 + $0x398] sm:$0xff]  ;;  %v323_v27 = vld [vmem:[%s2766_s3 + $0x3a0] sm:$0xff] }
  0xac   : > { %1854 = vst [vmem:[%s2788_s20 + $0x378] sm:$0xff] %v1342_v16  ;;  %v1345_v25 = vadd.f32 %v833_v23, %v321_v22  ;;  %v834_v26 = vld [vmem:[%s2773_s29 + $0x398] sm:$0xff]  ;;  %v835_v28 = vld [vmem:[%s2773_s29 + $0x3a0] sm:$0xff]  ;;  %1855 = vst [vmem:[%s2788_s20 + $0x380] sm:$0xff] %v1343_v20 }
  0xad   : > { %1856 = vst [vmem:[%s2788_s20 + $0x388] sm:$0xff] %v1344_v21  ;;  %v1346_v29 = vadd.f32 %v834_v26, %v322_v24  ;;  %v1347_v30 = vadd.f32 %v835_v28, %v323_v27  ;;  %v324_v31 = vld [vmem:[%s2766_s3 + $0x3a8] sm:$0xff]  ;;  %v325_v33 = vld [vmem:[%s2766_s3 + $0x3b0] sm:$0xff]  ;;  %v326_v36 = vld [vmem:[%s2766_s3 + $0x3b8] sm:$0xff] }
  0xae   : > { %v836_v32 = vld [vmem:[%s2773_s29 + $0x3a8] sm:$0xff]  ;;  %1857 = vst [vmem:[%s2788_s20 + $0x390] sm:$0xff] %v1345_v25  ;;  %v837_v35 = vld [vmem:[%s2773_s29 + $0x3b0] sm:$0xff]  ;;  %v838_v37 = vld [vmem:[%s2773_s29 + $0x3b8] sm:$0xff] }
  0xaf   : > { %v1348_v34 = vadd.f32 %v836_v32, %v324_v31  ;;  %1858 = vst [vmem:[%s2788_s20 + $0x398] sm:$0xff] %v1346_v29  ;;  %1859 = vst [vmem:[%s2788_s20 + $0x3a0] sm:$0xff] %v1347_v30  ;;  %v1349_v38 = vadd.f32 %v837_v35, %v325_v33  ;;  %v1350_v39 = vadd.f32 %v838_v37, %v326_v36  ;;  %v327_v40 = vld [vmem:[%s2766_s3 + $0x3c0] sm:$0xff]  ;;  %v328_v42 = vld [vmem:[%s2766_s3 + $0x3c8] sm:$0xff] }
  0xb0   : > { %v839_v41 = vld [vmem:[%s2773_s29 + $0x3c0] sm:$0xff]  ;;  %v840_v44 = vld [vmem:[%s2773_s29 + $0x3c8] sm:$0xff]  ;;  %v329_v45 = vld [vmem:[%s2766_s3 + $0x3d0] sm:$0xff] }
  0xb1   : > { %1860 = vst [vmem:[%s2788_s20 + $0x3a8] sm:$0xff] %v1348_v34  ;;  %v1351_v43 = vadd.f32 %v839_v41, %v327_v40  ;;  %v841_v46 = vld [vmem:[%s2773_s29 + $0x3d0] sm:$0xff]  ;;  %1861 = vst [vmem:[%s2788_s20 + $0x3b0] sm:$0xff] %v1349_v38  ;;  %v1352_v47 = vadd.f32 %v840_v44, %v328_v42  ;;  %v330_v49 = vld [vmem:[%s2766_s3 + $0x3d8] sm:$0xff] }
  0xb2   : > { %1862 = vst [vmem:[%s2788_s20 + $0x3b8] sm:$0xff] %v1350_v39  ;;  %v1353_v48 = vadd.f32 %v841_v46, %v329_v45  ;;  %v842_v50 = vld [vmem:[%s2773_s29 + $0x3d8] sm:$0xff]  ;;  %v331_v51 = vld [vmem:[%s2766_s3 + $0x3e0] sm:$0xff]  ;;  %v332_v54 = vld [vmem:[%s2766_s3 + $0x3e8] sm:$0xff] }
  0xb3   : > { %1863 = vst [vmem:[%s2788_s20 + $0x3c0] sm:$0xff] %v1351_v43  ;;  %v1354_v52 = vadd.f32 %v842_v50, %v330_v49  ;;  %v843_v53 = vld [vmem:[%s2773_s29 + $0x3e0] sm:$0xff]  ;;  %v844_v55 = vld [vmem:[%s2773_s29 + $0x3e8] sm:$0xff]  ;;  %1864 = vst [vmem:[%s2788_s20 + $0x3c8] sm:$0xff] %v1352_v47 }
  0xb4   : > { %1865 = vst [vmem:[%s2788_s20 + $0x3d0] sm:$0xff] %v1353_v48  ;;  %v1355_v56 = vadd.f32 %v843_v53, %v331_v51  ;;  %v1356_v57 = vadd.f32 %v844_v55, %v332_v54  ;;  %v333_v58 = vld [vmem:[%s2766_s3 + $0x3f0] sm:$0xff]  ;;  %v334_v60 = vld [vmem:[%s2766_s3 + $0x3f8] sm:$0xff]  ;;  %v335_v63 = vld [vmem:[%s2766_s3 + $0x400] sm:$0xff] }
  0xb5   : > { %v845_v59 = vld [vmem:[%s2773_s29 + $0x3f0] sm:$0xff]  ;;  %1866 = vst [vmem:[%s2788_s20 + $0x3d8] sm:$0xff] %v1354_v52  ;;  %v846_v62 = vld [vmem:[%s2773_s29 + $0x3f8] sm:$0xff]  ;;  %v847_v0 = vld [vmem:[%s2773_s29 + $0x400] sm:$0xff] }
  0xb6   : > { %v1357_v61 = vadd.f32 %v845_v59, %v333_v58  ;;  %1867 = vst [vmem:[%s2788_s20 + $0x3e0] sm:$0xff] %v1355_v56  ;;  %1868 = vst [vmem:[%s2788_s20 + $0x3e8] sm:$0xff] %v1356_v57  ;;  %v1358_v1 = vadd.f32 %v846_v62, %v334_v60  ;;  %v1359_v2 = vadd.f32 %v847_v0, %v335_v63  ;;  %v336_v3 = vld [vmem:[%s2766_s3 + $0x408] sm:$0xff]  ;;  %v337_v5 = vld [vmem:[%s2766_s3 + $0x410] sm:$0xff] }
  0xb7   : > { %v848_v4 = vld [vmem:[%s2773_s29 + $0x408] sm:$0xff]  ;;  %v849_v7 = vld [vmem:[%s2773_s29 + $0x410] sm:$0xff]  ;;  %v338_v8 = vld [vmem:[%s2766_s3 + $0x418] sm:$0xff] }
  0xb8   : > { %1869 = vst [vmem:[%s2788_s20 + $0x3f0] sm:$0xff] %v1357_v61  ;;  %v1360_v6 = vadd.f32 %v848_v4, %v336_v3  ;;  %v850_v9 = vld [vmem:[%s2773_s29 + $0x418] sm:$0xff]  ;;  %1870 = vst [vmem:[%s2788_s20 + $0x3f8] sm:$0xff] %v1358_v1  ;;  %v1361_v10 = vadd.f32 %v849_v7, %v337_v5  ;;  %v339_v12 = vld [vmem:[%s2766_s3 + $0x420] sm:$0xff] }
  0xb9   : > { %1871 = vst [vmem:[%s2788_s20 + $0x400] sm:$0xff] %v1359_v2  ;;  %v1362_v11 = vadd.f32 %v850_v9, %v338_v8  ;;  %v851_v13 = vld [vmem:[%s2773_s29 + $0x420] sm:$0xff]  ;;  %v340_v14 = vld [vmem:[%s2766_s3 + $0x428] sm:$0xff]  ;;  %v341_v17 = vld [vmem:[%s2766_s3 + $0x430] sm:$0xff] }
  0xba   : > { %1872 = vst [vmem:[%s2788_s20 + $0x408] sm:$0xff] %v1360_v6  ;;  %v1363_v15 = vadd.f32 %v851_v13, %v339_v12  ;;  %v852_v16 = vld [vmem:[%s2773_s29 + $0x428] sm:$0xff]  ;;  %v853_v18 = vld [vmem:[%s2773_s29 + $0x430] sm:$0xff]  ;;  %1873 = vst [vmem:[%s2788_s20 + $0x410] sm:$0xff] %v1361_v10 }
  0xbb   : > { %1874 = vst [vmem:[%s2788_s20 + $0x418] sm:$0xff] %v1362_v11  ;;  %v1364_v19 = vadd.f32 %v852_v16, %v340_v14  ;;  %v1365_v20 = vadd.f32 %v853_v18, %v341_v17  ;;  %v342_v21 = vld [vmem:[%s2766_s3 + $0x438] sm:$0xff]  ;;  %v343_v23 = vld [vmem:[%s2766_s3 + $0x440] sm:$0xff]  ;;  %v344_v26 = vld [vmem:[%s2766_s3 + $0x448] sm:$0xff] }
  0xbc   : > { %v854_v22 = vld [vmem:[%s2773_s29 + $0x438] sm:$0xff]  ;;  %1875 = vst [vmem:[%s2788_s20 + $0x420] sm:$0xff] %v1363_v15  ;;  %v855_v25 = vld [vmem:[%s2773_s29 + $0x440] sm:$0xff]  ;;  %v856_v27 = vld [vmem:[%s2773_s29 + $0x448] sm:$0xff] }
  0xbd   : > { %v1366_v24 = vadd.f32 %v854_v22, %v342_v21  ;;  %1876 = vst [vmem:[%s2788_s20 + $0x428] sm:$0xff] %v1364_v19  ;;  %1877 = vst [vmem:[%s2788_s20 + $0x430] sm:$0xff] %v1365_v20  ;;  %v1367_v28 = vadd.f32 %v855_v25, %v343_v23  ;;  %v1368_v29 = vadd.f32 %v856_v27, %v344_v26  ;;  %v345_v30 = vld [vmem:[%s2766_s3 + $0x450] sm:$0xff]  ;;  %v346_v32 = vld [vmem:[%s2766_s3 + $0x458] sm:$0xff] }
  0xbe   : > { %v857_v31 = vld [vmem:[%s2773_s29 + $0x450] sm:$0xff]  ;;  %v858_v34 = vld [vmem:[%s2773_s29 + $0x458] sm:$0xff]  ;;  %v347_v35 = vld [vmem:[%s2766_s3 + $0x460] sm:$0xff] }
  0xbf   : > { %1878 = vst [vmem:[%s2788_s20 + $0x438] sm:$0xff] %v1366_v24  ;;  %v1369_v33 = vadd.f32 %v857_v31, %v345_v30  ;;  %v859_v36 = vld [vmem:[%s2773_s29 + $0x460] sm:$0xff]  ;;  %1879 = vst [vmem:[%s2788_s20 + $0x440] sm:$0xff] %v1367_v28  ;;  %v1370_v37 = vadd.f32 %v858_v34, %v346_v32  ;;  %v348_v39 = vld [vmem:[%s2766_s3 + $0x468] sm:$0xff] }
  0xc0   : > { %1880 = vst [vmem:[%s2788_s20 + $0x448] sm:$0xff] %v1368_v29  ;;  %v1371_v38 = vadd.f32 %v859_v36, %v347_v35  ;;  %v860_v40 = vld [vmem:[%s2773_s29 + $0x468] sm:$0xff]  ;;  %v349_v41 = vld [vmem:[%s2766_s3 + $0x470] sm:$0xff]  ;;  %v350_v44 = vld [vmem:[%s2766_s3 + $0x478] sm:$0xff] }
  0xc1   : > { %1881 = vst [vmem:[%s2788_s20 + $0x450] sm:$0xff] %v1369_v33  ;;  %v1372_v42 = vadd.f32 %v860_v40, %v348_v39  ;;  %v861_v43 = vld [vmem:[%s2773_s29 + $0x470] sm:$0xff]  ;;  %v862_v45 = vld [vmem:[%s2773_s29 + $0x478] sm:$0xff]  ;;  %1882 = vst [vmem:[%s2788_s20 + $0x458] sm:$0xff] %v1370_v37 }
  0xc2   : > { %1883 = vst [vmem:[%s2788_s20 + $0x460] sm:$0xff] %v1371_v38  ;;  %v1373_v46 = vadd.f32 %v861_v43, %v349_v41  ;;  %v1374_v47 = vadd.f32 %v862_v45, %v350_v44  ;;  %v351_v48 = vld [vmem:[%s2766_s3 + $0x480] sm:$0xff]  ;;  %v352_v50 = vld [vmem:[%s2766_s3 + $0x488] sm:$0xff]  ;;  %v353_v53 = vld [vmem:[%s2766_s3 + $0x490] sm:$0xff] }
  0xc3   : > { %v863_v49 = vld [vmem:[%s2773_s29 + $0x480] sm:$0xff]  ;;  %1884 = vst [vmem:[%s2788_s20 + $0x468] sm:$0xff] %v1372_v42  ;;  %v864_v52 = vld [vmem:[%s2773_s29 + $0x488] sm:$0xff]  ;;  %v865_v54 = vld [vmem:[%s2773_s29 + $0x490] sm:$0xff] }
  0xc4   : > { %v1375_v51 = vadd.f32 %v863_v49, %v351_v48  ;;  %1885 = vst [vmem:[%s2788_s20 + $0x470] sm:$0xff] %v1373_v46  ;;  %1886 = vst [vmem:[%s2788_s20 + $0x478] sm:$0xff] %v1374_v47  ;;  %v1376_v55 = vadd.f32 %v864_v52, %v352_v50  ;;  %v1377_v56 = vadd.f32 %v865_v54, %v353_v53  ;;  %v354_v57 = vld [vmem:[%s2766_s3 + $0x498] sm:$0xff]  ;;  %v355_v59 = vld [vmem:[%s2766_s3 + $0x4a0] sm:$0xff] }
  0xc5   : > { %v866_v58 = vld [vmem:[%s2773_s29 + $0x498] sm:$0xff]  ;;  %v867_v61 = vld [vmem:[%s2773_s29 + $0x4a0] sm:$0xff]  ;;  %v356_v62 = vld [vmem:[%s2766_s3 + $0x4a8] sm:$0xff] }
  0xc6   : > { %1887 = vst [vmem:[%s2788_s20 + $0x480] sm:$0xff] %v1375_v51  ;;  %v1378_v60 = vadd.f32 %v866_v58, %v354_v57  ;;  %v868_v63 = vld [vmem:[%s2773_s29 + $0x4a8] sm:$0xff]  ;;  %1888 = vst [vmem:[%s2788_s20 + $0x488] sm:$0xff] %v1376_v55  ;;  %v1379_v0 = vadd.f32 %v867_v61, %v355_v59  ;;  %v357_v2 = vld [vmem:[%s2766_s3 + $0x4b0] sm:$0xff] }
  0xc7   : > { %1889 = vst [vmem:[%s2788_s20 + $0x490] sm:$0xff] %v1377_v56  ;;  %v1380_v1 = vadd.f32 %v868_v63, %v356_v62  ;;  %v869_v3 = vld [vmem:[%s2773_s29 + $0x4b0] sm:$0xff]  ;;  %v358_v4 = vld [vmem:[%s2766_s3 + $0x4b8] sm:$0xff]  ;;  %v359_v7 = vld [vmem:[%s2766_s3 + $0x4c0] sm:$0xff] }
  0xc8   : > { %1890 = vst [vmem:[%s2788_s20 + $0x498] sm:$0xff] %v1378_v60  ;;  %v1381_v5 = vadd.f32 %v869_v3, %v357_v2  ;;  %v870_v6 = vld [vmem:[%s2773_s29 + $0x4b8] sm:$0xff]  ;;  %v871_v8 = vld [vmem:[%s2773_s29 + $0x4c0] sm:$0xff]  ;;  %1891 = vst [vmem:[%s2788_s20 + $0x4a0] sm:$0xff] %v1379_v0 }
  0xc9   : > { %1892 = vst [vmem:[%s2788_s20 + $0x4a8] sm:$0xff] %v1380_v1  ;;  %v1382_v9 = vadd.f32 %v870_v6, %v358_v4  ;;  %v1383_v10 = vadd.f32 %v871_v8, %v359_v7  ;;  %v360_v11 = vld [vmem:[%s2766_s3 + $0x4c8] sm:$0xff]  ;;  %v361_v13 = vld [vmem:[%s2766_s3 + $0x4d0] sm:$0xff]  ;;  %v362_v16 = vld [vmem:[%s2766_s3 + $0x4d8] sm:$0xff] }
  0xca   : > { %v872_v12 = vld [vmem:[%s2773_s29 + $0x4c8] sm:$0xff]  ;;  %1893 = vst [vmem:[%s2788_s20 + $0x4b0] sm:$0xff] %v1381_v5  ;;  %v873_v15 = vld [vmem:[%s2773_s29 + $0x4d0] sm:$0xff]  ;;  %v874_v17 = vld [vmem:[%s2773_s29 + $0x4d8] sm:$0xff] }
  0xcb   : > { %v1384_v14 = vadd.f32 %v872_v12, %v360_v11  ;;  %1894 = vst [vmem:[%s2788_s20 + $0x4b8] sm:$0xff] %v1382_v9  ;;  %1895 = vst [vmem:[%s2788_s20 + $0x4c0] sm:$0xff] %v1383_v10  ;;  %v1385_v18 = vadd.f32 %v873_v15, %v361_v13  ;;  %v1386_v19 = vadd.f32 %v874_v17, %v362_v16  ;;  %v363_v20 = vld [vmem:[%s2766_s3 + $0x4e0] sm:$0xff]  ;;  %v364_v22 = vld [vmem:[%s2766_s3 + $0x4e8] sm:$0xff] }
  0xcc   : > { %v875_v21 = vld [vmem:[%s2773_s29 + $0x4e0] sm:$0xff]  ;;  %v876_v24 = vld [vmem:[%s2773_s29 + $0x4e8] sm:$0xff]  ;;  %v365_v25 = vld [vmem:[%s2766_s3 + $0x4f0] sm:$0xff] }
  0xcd   : > { %1896 = vst [vmem:[%s2788_s20 + $0x4c8] sm:$0xff] %v1384_v14  ;;  %v1387_v23 = vadd.f32 %v875_v21, %v363_v20  ;;  %v877_v26 = vld [vmem:[%s2773_s29 + $0x4f0] sm:$0xff]  ;;  %1897 = vst [vmem:[%s2788_s20 + $0x4d0] sm:$0xff] %v1385_v18  ;;  %v1388_v27 = vadd.f32 %v876_v24, %v364_v22  ;;  %v366_v29 = vld [vmem:[%s2766_s3 + $0x4f8] sm:$0xff] }
  0xce   : > { %1898 = vst [vmem:[%s2788_s20 + $0x4d8] sm:$0xff] %v1386_v19  ;;  %v1389_v28 = vadd.f32 %v877_v26, %v365_v25  ;;  %v878_v30 = vld [vmem:[%s2773_s29 + $0x4f8] sm:$0xff]  ;;  %v367_v31 = vld [vmem:[%s2766_s3 + $0x500] sm:$0xff]  ;;  %v368_v34 = vld [vmem:[%s2766_s3 + $0x508] sm:$0xff] }
  0xcf   : > { %1899 = vst [vmem:[%s2788_s20 + $0x4e0] sm:$0xff] %v1387_v23  ;;  %v1390_v32 = vadd.f32 %v878_v30, %v366_v29  ;;  %v879_v33 = vld [vmem:[%s2773_s29 + $0x500] sm:$0xff]  ;;  %v880_v35 = vld [vmem:[%s2773_s29 + $0x508] sm:$0xff]  ;;  %1900 = vst [vmem:[%s2788_s20 + $0x4e8] sm:$0xff] %v1388_v27 }
  0xd0   : > { %1901 = vst [vmem:[%s2788_s20 + $0x4f0] sm:$0xff] %v1389_v28  ;;  %v1391_v36 = vadd.f32 %v879_v33, %v367_v31  ;;  %v1392_v37 = vadd.f32 %v880_v35, %v368_v34  ;;  %v369_v38 = vld [vmem:[%s2766_s3 + $0x510] sm:$0xff]  ;;  %v370_v40 = vld [vmem:[%s2766_s3 + $0x518] sm:$0xff]  ;;  %v371_v43 = vld [vmem:[%s2766_s3 + $0x520] sm:$0xff] }
  0xd1   : > { %v881_v39 = vld [vmem:[%s2773_s29 + $0x510] sm:$0xff]  ;;  %1902 = vst [vmem:[%s2788_s20 + $0x4f8] sm:$0xff] %v1390_v32  ;;  %v882_v42 = vld [vmem:[%s2773_s29 + $0x518] sm:$0xff]  ;;  %v883_v44 = vld [vmem:[%s2773_s29 + $0x520] sm:$0xff] }
  0xd2   : > { %v1393_v41 = vadd.f32 %v881_v39, %v369_v38  ;;  %1903 = vst [vmem:[%s2788_s20 + $0x500] sm:$0xff] %v1391_v36  ;;  %1904 = vst [vmem:[%s2788_s20 + $0x508] sm:$0xff] %v1392_v37  ;;  %v1394_v45 = vadd.f32 %v882_v42, %v370_v40  ;;  %v1395_v46 = vadd.f32 %v883_v44, %v371_v43  ;;  %v372_v47 = vld [vmem:[%s2766_s3 + $0x528] sm:$0xff]  ;;  %v373_v49 = vld [vmem:[%s2766_s3 + $0x530] sm:$0xff] }
  0xd3   : > { %v884_v48 = vld [vmem:[%s2773_s29 + $0x528] sm:$0xff]  ;;  %v885_v51 = vld [vmem:[%s2773_s29 + $0x530] sm:$0xff]  ;;  %v374_v52 = vld [vmem:[%s2766_s3 + $0x538] sm:$0xff] }
  0xd4   : > { %1905 = vst [vmem:[%s2788_s20 + $0x510] sm:$0xff] %v1393_v41  ;;  %v1396_v50 = vadd.f32 %v884_v48, %v372_v47  ;;  %v886_v53 = vld [vmem:[%s2773_s29 + $0x538] sm:$0xff]  ;;  %1906 = vst [vmem:[%s2788_s20 + $0x518] sm:$0xff] %v1394_v45  ;;  %v1397_v54 = vadd.f32 %v885_v51, %v373_v49  ;;  %v375_v56 = vld [vmem:[%s2766_s3 + $0x540] sm:$0xff] }
  0xd5   : > { %1907 = vst [vmem:[%s2788_s20 + $0x520] sm:$0xff] %v1395_v46  ;;  %v1398_v55 = vadd.f32 %v886_v53, %v374_v52  ;;  %v887_v57 = vld [vmem:[%s2773_s29 + $0x540] sm:$0xff]  ;;  %v376_v58 = vld [vmem:[%s2766_s3 + $0x548] sm:$0xff]  ;;  %v377_v61 = vld [vmem:[%s2766_s3 + $0x550] sm:$0xff] }
  0xd6   : > { %1908 = vst [vmem:[%s2788_s20 + $0x528] sm:$0xff] %v1396_v50  ;;  %v1399_v59 = vadd.f32 %v887_v57, %v375_v56  ;;  %v888_v60 = vld [vmem:[%s2773_s29 + $0x548] sm:$0xff]  ;;  %v889_v62 = vld [vmem:[%s2773_s29 + $0x550] sm:$0xff]  ;;  %1909 = vst [vmem:[%s2788_s20 + $0x530] sm:$0xff] %v1397_v54 }
  0xd7   : > { %1910 = vst [vmem:[%s2788_s20 + $0x538] sm:$0xff] %v1398_v55  ;;  %v1400_v63 = vadd.f32 %v888_v60, %v376_v58  ;;  %v1401_v0 = vadd.f32 %v889_v62, %v377_v61  ;;  %v378_v1 = vld [vmem:[%s2766_s3 + $0x558] sm:$0xff]  ;;  %v379_v3 = vld [vmem:[%s2766_s3 + $0x560] sm:$0xff]  ;;  %v380_v6 = vld [vmem:[%s2766_s3 + $0x568] sm:$0xff] }
  0xd8   : > { %v890_v2 = vld [vmem:[%s2773_s29 + $0x558] sm:$0xff]  ;;  %1911 = vst [vmem:[%s2788_s20 + $0x540] sm:$0xff] %v1399_v59  ;;  %v891_v5 = vld [vmem:[%s2773_s29 + $0x560] sm:$0xff]  ;;  %v892_v7 = vld [vmem:[%s2773_s29 + $0x568] sm:$0xff] }
  0xd9   : > { %v1402_v4 = vadd.f32 %v890_v2, %v378_v1  ;;  %1912 = vst [vmem:[%s2788_s20 + $0x548] sm:$0xff] %v1400_v63  ;;  %1913 = vst [vmem:[%s2788_s20 + $0x550] sm:$0xff] %v1401_v0  ;;  %v1403_v8 = vadd.f32 %v891_v5, %v379_v3  ;;  %v1404_v9 = vadd.f32 %v892_v7, %v380_v6  ;;  %v381_v10 = vld [vmem:[%s2766_s3 + $0x570] sm:$0xff]  ;;  %v382_v12 = vld [vmem:[%s2766_s3 + $0x578] sm:$0xff] }
  0xda   : > { %v893_v11 = vld [vmem:[%s2773_s29 + $0x570] sm:$0xff]  ;;  %v894_v14 = vld [vmem:[%s2773_s29 + $0x578] sm:$0xff]  ;;  %v383_v15 = vld [vmem:[%s2766_s3 + $0x580] sm:$0xff] }
  0xdb   : > { %1914 = vst [vmem:[%s2788_s20 + $0x558] sm:$0xff] %v1402_v4  ;;  %v1405_v13 = vadd.f32 %v893_v11, %v381_v10  ;;  %v895_v16 = vld [vmem:[%s2773_s29 + $0x580] sm:$0xff]  ;;  %1915 = vst [vmem:[%s2788_s20 + $0x560] sm:$0xff] %v1403_v8  ;;  %v1406_v17 = vadd.f32 %v894_v14, %v382_v12  ;;  %v384_v19 = vld [vmem:[%s2766_s3 + $0x588] sm:$0xff] }
  0xdc   : > { %1916 = vst [vmem:[%s2788_s20 + $0x568] sm:$0xff] %v1404_v9  ;;  %v1407_v18 = vadd.f32 %v895_v16, %v383_v15  ;;  %v896_v20 = vld [vmem:[%s2773_s29 + $0x588] sm:$0xff]  ;;  %v385_v21 = vld [vmem:[%s2766_s3 + $0x590] sm:$0xff]  ;;  %v386_v24 = vld [vmem:[%s2766_s3 + $0x598] sm:$0xff] }
  0xdd   : > { %1917 = vst [vmem:[%s2788_s20 + $0x570] sm:$0xff] %v1405_v13  ;;  %v1408_v22 = vadd.f32 %v896_v20, %v384_v19  ;;  %v897_v23 = vld [vmem:[%s2773_s29 + $0x590] sm:$0xff]  ;;  %v898_v25 = vld [vmem:[%s2773_s29 + $0x598] sm:$0xff]  ;;  %1918 = vst [vmem:[%s2788_s20 + $0x578] sm:$0xff] %v1406_v17 }
  0xde   : > { %1919 = vst [vmem:[%s2788_s20 + $0x580] sm:$0xff] %v1407_v18  ;;  %v1409_v26 = vadd.f32 %v897_v23, %v385_v21  ;;  %v1410_v27 = vadd.f32 %v898_v25, %v386_v24  ;;  %v387_v28 = vld [vmem:[%s2766_s3 + $0x5a0] sm:$0xff]  ;;  %v388_v30 = vld [vmem:[%s2766_s3 + $0x5a8] sm:$0xff]  ;;  %v389_v33 = vld [vmem:[%s2766_s3 + $0x5b0] sm:$0xff] }
  0xdf   : > { %v899_v29 = vld [vmem:[%s2773_s29 + $0x5a0] sm:$0xff]  ;;  %1920 = vst [vmem:[%s2788_s20 + $0x588] sm:$0xff] %v1408_v22  ;;  %v900_v32 = vld [vmem:[%s2773_s29 + $0x5a8] sm:$0xff]  ;;  %v901_v34 = vld [vmem:[%s2773_s29 + $0x5b0] sm:$0xff] }
  0xe0   : > { %v1411_v31 = vadd.f32 %v899_v29, %v387_v28  ;;  %1921 = vst [vmem:[%s2788_s20 + $0x590] sm:$0xff] %v1409_v26  ;;  %1922 = vst [vmem:[%s2788_s20 + $0x598] sm:$0xff] %v1410_v27  ;;  %v1412_v35 = vadd.f32 %v900_v32, %v388_v30  ;;  %v1413_v36 = vadd.f32 %v901_v34, %v389_v33  ;;  %v390_v37 = vld [vmem:[%s2766_s3 + $0x5b8] sm:$0xff]  ;;  %v391_v39 = vld [vmem:[%s2766_s3 + $0x5c0] sm:$0xff] }
  0xe1   : > { %v902_v38 = vld [vmem:[%s2773_s29 + $0x5b8] sm:$0xff]  ;;  %v903_v41 = vld [vmem:[%s2773_s29 + $0x5c0] sm:$0xff]  ;;  %v392_v42 = vld [vmem:[%s2766_s3 + $0x5c8] sm:$0xff] }
  0xe2   : > { %1923 = vst [vmem:[%s2788_s20 + $0x5a0] sm:$0xff] %v1411_v31  ;;  %v1414_v40 = vadd.f32 %v902_v38, %v390_v37  ;;  %v904_v43 = vld [vmem:[%s2773_s29 + $0x5c8] sm:$0xff]  ;;  %1924 = vst [vmem:[%s2788_s20 + $0x5a8] sm:$0xff] %v1412_v35  ;;  %v1415_v44 = vadd.f32 %v903_v41, %v391_v39  ;;  %v393_v46 = vld [vmem:[%s2766_s3 + $0x5d0] sm:$0xff] }
  0xe3   : > { %1925 = vst [vmem:[%s2788_s20 + $0x5b0] sm:$0xff] %v1413_v36  ;;  %v1416_v45 = vadd.f32 %v904_v43, %v392_v42  ;;  %v905_v47 = vld [vmem:[%s2773_s29 + $0x5d0] sm:$0xff]  ;;  %v394_v48 = vld [vmem:[%s2766_s3 + $0x5d8] sm:$0xff]  ;;  %v395_v51 = vld [vmem:[%s2766_s3 + $0x5e0] sm:$0xff] }
  0xe4   : > { %1926 = vst [vmem:[%s2788_s20 + $0x5b8] sm:$0xff] %v1414_v40  ;;  %v1417_v49 = vadd.f32 %v905_v47, %v393_v46  ;;  %v906_v50 = vld [vmem:[%s2773_s29 + $0x5d8] sm:$0xff]  ;;  %v907_v52 = vld [vmem:[%s2773_s29 + $0x5e0] sm:$0xff]  ;;  %1927 = vst [vmem:[%s2788_s20 + $0x5c0] sm:$0xff] %v1415_v44 }
  0xe5   : > { %1928 = vst [vmem:[%s2788_s20 + $0x5c8] sm:$0xff] %v1416_v45  ;;  %v1418_v53 = vadd.f32 %v906_v50, %v394_v48  ;;  %v1419_v54 = vadd.f32 %v907_v52, %v395_v51  ;;  %v396_v55 = vld [vmem:[%s2766_s3 + $0x5e8] sm:$0xff]  ;;  %v397_v57 = vld [vmem:[%s2766_s3 + $0x5f0] sm:$0xff]  ;;  %v398_v60 = vld [vmem:[%s2766_s3 + $0x5f8] sm:$0xff] }
  0xe6   : > { %v908_v56 = vld [vmem:[%s2773_s29 + $0x5e8] sm:$0xff]  ;;  %1929 = vst [vmem:[%s2788_s20 + $0x5d0] sm:$0xff] %v1417_v49  ;;  %v909_v59 = vld [vmem:[%s2773_s29 + $0x5f0] sm:$0xff]  ;;  %v910_v61 = vld [vmem:[%s2773_s29 + $0x5f8] sm:$0xff] }
  0xe7   : > { %v1420_v58 = vadd.f32 %v908_v56, %v396_v55  ;;  %1930 = vst [vmem:[%s2788_s20 + $0x5d8] sm:$0xff] %v1418_v53  ;;  %1931 = vst [vmem:[%s2788_s20 + $0x5e0] sm:$0xff] %v1419_v54  ;;  %v1421_v62 = vadd.f32 %v909_v59, %v397_v57  ;;  %v1422_v63 = vadd.f32 %v910_v61, %v398_v60  ;;  %v399_v0 = vld [vmem:[%s2766_s3 + $0x600] sm:$0xff]  ;;  %v400_v2 = vld [vmem:[%s2766_s3 + $0x608] sm:$0xff] }
  0xe8   : > { %v911_v1 = vld [vmem:[%s2773_s29 + $0x600] sm:$0xff]  ;;  %v912_v4 = vld [vmem:[%s2773_s29 + $0x608] sm:$0xff]  ;;  %v401_v5 = vld [vmem:[%s2766_s3 + $0x610] sm:$0xff] }
  0xe9   : > { %1932 = vst [vmem:[%s2788_s20 + $0x5e8] sm:$0xff] %v1420_v58  ;;  %v1423_v3 = vadd.f32 %v911_v1, %v399_v0  ;;  %v913_v6 = vld [vmem:[%s2773_s29 + $0x610] sm:$0xff]  ;;  %1933 = vst [vmem:[%s2788_s20 + $0x5f0] sm:$0xff] %v1421_v62  ;;  %v1424_v7 = vadd.f32 %v912_v4, %v400_v2  ;;  %v402_v9 = vld [vmem:[%s2766_s3 + $0x618] sm:$0xff] }
  0xea   : > { %1934 = vst [vmem:[%s2788_s20 + $0x5f8] sm:$0xff] %v1422_v63  ;;  %v1425_v8 = vadd.f32 %v913_v6, %v401_v5  ;;  %v914_v10 = vld [vmem:[%s2773_s29 + $0x618] sm:$0xff]  ;;  %v403_v11 = vld [vmem:[%s2766_s3 + $0x620] sm:$0xff]  ;;  %v404_v14 = vld [vmem:[%s2766_s3 + $0x628] sm:$0xff] }
  0xeb   : > { %1935 = vst [vmem:[%s2788_s20 + $0x600] sm:$0xff] %v1423_v3  ;;  %v1426_v12 = vadd.f32 %v914_v10, %v402_v9  ;;  %v915_v13 = vld [vmem:[%s2773_s29 + $0x620] sm:$0xff]  ;;  %v916_v15 = vld [vmem:[%s2773_s29 + $0x628] sm:$0xff]  ;;  %1936 = vst [vmem:[%s2788_s20 + $0x608] sm:$0xff] %v1424_v7 }
  0xec   : > { %1937 = vst [vmem:[%s2788_s20 + $0x610] sm:$0xff] %v1425_v8  ;;  %v1427_v16 = vadd.f32 %v915_v13, %v403_v11  ;;  %v1428_v17 = vadd.f32 %v916_v15, %v404_v14  ;;  %v405_v18 = vld [vmem:[%s2766_s3 + $0x630] sm:$0xff]  ;;  %v406_v20 = vld [vmem:[%s2766_s3 + $0x638] sm:$0xff]  ;;  %v407_v23 = vld [vmem:[%s2766_s3 + $0x640] sm:$0xff] }
  0xed   : > { %v917_v19 = vld [vmem:[%s2773_s29 + $0x630] sm:$0xff]  ;;  %1938 = vst [vmem:[%s2788_s20 + $0x618] sm:$0xff] %v1426_v12  ;;  %v918_v22 = vld [vmem:[%s2773_s29 + $0x638] sm:$0xff]  ;;  %v919_v24 = vld [vmem:[%s2773_s29 + $0x640] sm:$0xff] }
  0xee   : > { %v1429_v21 = vadd.f32 %v917_v19, %v405_v18  ;;  %1939 = vst [vmem:[%s2788_s20 + $0x620] sm:$0xff] %v1427_v16  ;;  %1940 = vst [vmem:[%s2788_s20 + $0x628] sm:$0xff] %v1428_v17  ;;  %v1430_v25 = vadd.f32 %v918_v22, %v406_v20  ;;  %v1431_v26 = vadd.f32 %v919_v24, %v407_v23  ;;  %v408_v27 = vld [vmem:[%s2766_s3 + $0x648] sm:$0xff]  ;;  %v409_v29 = vld [vmem:[%s2766_s3 + $0x650] sm:$0xff] }
  0xef   : > { %v920_v28 = vld [vmem:[%s2773_s29 + $0x648] sm:$0xff]  ;;  %v921_v31 = vld [vmem:[%s2773_s29 + $0x650] sm:$0xff]  ;;  %v410_v32 = vld [vmem:[%s2766_s3 + $0x658] sm:$0xff] }
  0xf0   : > { %1941 = vst [vmem:[%s2788_s20 + $0x630] sm:$0xff] %v1429_v21  ;;  %v1432_v30 = vadd.f32 %v920_v28, %v408_v27  ;;  %v922_v33 = vld [vmem:[%s2773_s29 + $0x658] sm:$0xff]  ;;  %1942 = vst [vmem:[%s2788_s20 + $0x638] sm:$0xff] %v1430_v25  ;;  %v1433_v34 = vadd.f32 %v921_v31, %v409_v29  ;;  %v411_v36 = vld [vmem:[%s2766_s3 + $0x660] sm:$0xff] }
  0xf1   : > { %1943 = vst [vmem:[%s2788_s20 + $0x640] sm:$0xff] %v1431_v26  ;;  %v1434_v35 = vadd.f32 %v922_v33, %v410_v32  ;;  %v923_v37 = vld [vmem:[%s2773_s29 + $0x660] sm:$0xff]  ;;  %v412_v38 = vld [vmem:[%s2766_s3 + $0x668] sm:$0xff]  ;;  %v413_v41 = vld [vmem:[%s2766_s3 + $0x670] sm:$0xff] }
  0xf2   : > { %1944 = vst [vmem:[%s2788_s20 + $0x648] sm:$0xff] %v1432_v30  ;;  %v1435_v39 = vadd.f32 %v923_v37, %v411_v36  ;;  %v924_v40 = vld [vmem:[%s2773_s29 + $0x668] sm:$0xff]  ;;  %v925_v42 = vld [vmem:[%s2773_s29 + $0x670] sm:$0xff]  ;;  %1945 = vst [vmem:[%s2788_s20 + $0x650] sm:$0xff] %v1433_v34 }
  0xf3   : > { %1946 = vst [vmem:[%s2788_s20 + $0x658] sm:$0xff] %v1434_v35  ;;  %v1436_v43 = vadd.f32 %v924_v40, %v412_v38  ;;  %v1437_v44 = vadd.f32 %v925_v42, %v413_v41  ;;  %v414_v45 = vld [vmem:[%s2766_s3 + $0x678] sm:$0xff]  ;;  %v415_v47 = vld [vmem:[%s2766_s3 + $0x680] sm:$0xff]  ;;  %v416_v50 = vld [vmem:[%s2766_s3 + $0x688] sm:$0xff] }
  0xf4   : > { %v926_v46 = vld [vmem:[%s2773_s29 + $0x678] sm:$0xff]  ;;  %1947 = vst [vmem:[%s2788_s20 + $0x660] sm:$0xff] %v1435_v39  ;;  %v927_v49 = vld [vmem:[%s2773_s29 + $0x680] sm:$0xff]  ;;  %v928_v51 = vld [vmem:[%s2773_s29 + $0x688] sm:$0xff] }
  0xf5   : > { %v1438_v48 = vadd.f32 %v926_v46, %v414_v45  ;;  %1948 = vst [vmem:[%s2788_s20 + $0x668] sm:$0xff] %v1436_v43  ;;  %1949 = vst [vmem:[%s2788_s20 + $0x670] sm:$0xff] %v1437_v44  ;;  %v1439_v52 = vadd.f32 %v927_v49, %v415_v47  ;;  %v1440_v53 = vadd.f32 %v928_v51, %v416_v50  ;;  %v417_v54 = vld [vmem:[%s2766_s3 + $0x690] sm:$0xff]  ;;  %v418_v56 = vld [vmem:[%s2766_s3 + $0x698] sm:$0xff] }
  0xf6   : > { %v929_v55 = vld [vmem:[%s2773_s29 + $0x690] sm:$0xff]  ;;  %v930_v58 = vld [vmem:[%s2773_s29 + $0x698] sm:$0xff]  ;;  %v419_v59 = vld [vmem:[%s2766_s3 + $0x6a0] sm:$0xff] }
  0xf7   : > { %1950 = vst [vmem:[%s2788_s20 + $0x678] sm:$0xff] %v1438_v48  ;;  %v1441_v57 = vadd.f32 %v929_v55, %v417_v54  ;;  %v931_v60 = vld [vmem:[%s2773_s29 + $0x6a0] sm:$0xff]  ;;  %1951 = vst [vmem:[%s2788_s20 + $0x680] sm:$0xff] %v1439_v52  ;;  %v1442_v61 = vadd.f32 %v930_v58, %v418_v56  ;;  %v420_v63 = vld [vmem:[%s2766_s3 + $0x6a8] sm:$0xff] }
  0xf8   : > { %1952 = vst [vmem:[%s2788_s20 + $0x688] sm:$0xff] %v1440_v53  ;;  %v1443_v62 = vadd.f32 %v931_v60, %v419_v59  ;;  %v932_v0 = vld [vmem:[%s2773_s29 + $0x6a8] sm:$0xff]  ;;  %v421_v1 = vld [vmem:[%s2766_s3 + $0x6b0] sm:$0xff]  ;;  %v422_v4 = vld [vmem:[%s2766_s3 + $0x6b8] sm:$0xff] }
  0xf9   : > { %1953 = vst [vmem:[%s2788_s20 + $0x690] sm:$0xff] %v1441_v57  ;;  %v1444_v2 = vadd.f32 %v932_v0, %v420_v63  ;;  %v933_v3 = vld [vmem:[%s2773_s29 + $0x6b0] sm:$0xff]  ;;  %v934_v5 = vld [vmem:[%s2773_s29 + $0x6b8] sm:$0xff]  ;;  %1954 = vst [vmem:[%s2788_s20 + $0x698] sm:$0xff] %v1442_v61 }
  0xfa   : > { %1955 = vst [vmem:[%s2788_s20 + $0x6a0] sm:$0xff] %v1443_v62  ;;  %v1445_v6 = vadd.f32 %v933_v3, %v421_v1  ;;  %v1446_v7 = vadd.f32 %v934_v5, %v422_v4  ;;  %v423_v8 = vld [vmem:[%s2766_s3 + $0x6c0] sm:$0xff]  ;;  %v424_v10 = vld [vmem:[%s2766_s3 + $0x6c8] sm:$0xff]  ;;  %v425_v13 = vld [vmem:[%s2766_s3 + $0x6d0] sm:$0xff] }
  0xfb   : > { %v935_v9 = vld [vmem:[%s2773_s29 + $0x6c0] sm:$0xff]  ;;  %1956 = vst [vmem:[%s2788_s20 + $0x6a8] sm:$0xff] %v1444_v2  ;;  %v936_v12 = vld [vmem:[%s2773_s29 + $0x6c8] sm:$0xff]  ;;  %v937_v14 = vld [vmem:[%s2773_s29 + $0x6d0] sm:$0xff] }
  0xfc   : > { %v1447_v11 = vadd.f32 %v935_v9, %v423_v8  ;;  %1957 = vst [vmem:[%s2788_s20 + $0x6b0] sm:$0xff] %v1445_v6  ;;  %1958 = vst [vmem:[%s2788_s20 + $0x6b8] sm:$0xff] %v1446_v7  ;;  %v1448_v15 = vadd.f32 %v936_v12, %v424_v10  ;;  %v1449_v16 = vadd.f32 %v937_v14, %v425_v13  ;;  %v426_v17 = vld [vmem:[%s2766_s3 + $0x6d8] sm:$0xff]  ;;  %v427_v19 = vld [vmem:[%s2766_s3 + $0x6e0] sm:$0xff] }
  0xfd   : > { %v938_v18 = vld [vmem:[%s2773_s29 + $0x6d8] sm:$0xff]  ;;  %v939_v21 = vld [vmem:[%s2773_s29 + $0x6e0] sm:$0xff]  ;;  %v428_v22 = vld [vmem:[%s2766_s3 + $0x6e8] sm:$0xff] }
  0xfe   : > { %1959 = vst [vmem:[%s2788_s20 + $0x6c0] sm:$0xff] %v1447_v11  ;;  %v1450_v20 = vadd.f32 %v938_v18, %v426_v17  ;;  %v940_v23 = vld [vmem:[%s2773_s29 + $0x6e8] sm:$0xff]  ;;  %1960 = vst [vmem:[%s2788_s20 + $0x6c8] sm:$0xff] %v1448_v15  ;;  %v1451_v24 = vadd.f32 %v939_v21, %v427_v19  ;;  %v429_v26 = vld [vmem:[%s2766_s3 + $0x6f0] sm:$0xff] }
  0xff   : > { %1961 = vst [vmem:[%s2788_s20 + $0x6d0] sm:$0xff] %v1449_v16  ;;  %v1452_v25 = vadd.f32 %v940_v23, %v428_v22  ;;  %v941_v27 = vld [vmem:[%s2773_s29 + $0x6f0] sm:$0xff]  ;;  %v430_v28 = vld [vmem:[%s2766_s3 + $0x6f8] sm:$0xff]  ;;  %v431_v31 = vld [vmem:[%s2766_s3 + $0x700] sm:$0xff] }
 0x100   : > { %1962 = vst [vmem:[%s2788_s20 + $0x6d8] sm:$0xff] %v1450_v20  ;;  %v1453_v29 = vadd.f32 %v941_v27, %v429_v26  ;;  %v942_v30 = vld [vmem:[%s2773_s29 + $0x6f8] sm:$0xff]  ;;  %v943_v32 = vld [vmem:[%s2773_s29 + $0x700] sm:$0xff]  ;;  %1963 = vst [vmem:[%s2788_s20 + $0x6e0] sm:$0xff] %v1451_v24 }
 0x101   : > { %1964 = vst [vmem:[%s2788_s20 + $0x6e8] sm:$0xff] %v1452_v25  ;;  %v1454_v33 = vadd.f32 %v942_v30, %v430_v28  ;;  %v1455_v34 = vadd.f32 %v943_v32, %v431_v31  ;;  %v432_v35 = vld [vmem:[%s2766_s3 + $0x708] sm:$0xff]  ;;  %v433_v37 = vld [vmem:[%s2766_s3 + $0x710] sm:$0xff]  ;;  %v434_v40 = vld [vmem:[%s2766_s3 + $0x718] sm:$0xff] }
 0x102   : > { %v944_v36 = vld [vmem:[%s2773_s29 + $0x708] sm:$0xff]  ;;  %1965 = vst [vmem:[%s2788_s20 + $0x6f0] sm:$0xff] %v1453_v29  ;;  %v945_v39 = vld [vmem:[%s2773_s29 + $0x710] sm:$0xff]  ;;  %v946_v41 = vld [vmem:[%s2773_s29 + $0x718] sm:$0xff] }
 0x103   : > { %v1456_v38 = vadd.f32 %v944_v36, %v432_v35  ;;  %1966 = vst [vmem:[%s2788_s20 + $0x6f8] sm:$0xff] %v1454_v33  ;;  %1967 = vst [vmem:[%s2788_s20 + $0x700] sm:$0xff] %v1455_v34  ;;  %v1457_v42 = vadd.f32 %v945_v39, %v433_v37  ;;  %v1458_v43 = vadd.f32 %v946_v41, %v434_v40  ;;  %v435_v44 = vld [vmem:[%s2766_s3 + $0x720] sm:$0xff]  ;;  %v436_v46 = vld [vmem:[%s2766_s3 + $0x728] sm:$0xff] }
 0x104   : > { %v947_v45 = vld [vmem:[%s2773_s29 + $0x720] sm:$0xff]  ;;  %v948_v48 = vld [vmem:[%s2773_s29 + $0x728] sm:$0xff]  ;;  %v437_v49 = vld [vmem:[%s2766_s3 + $0x730] sm:$0xff] }
 0x105   : > { %1968 = vst [vmem:[%s2788_s20 + $0x708] sm:$0xff] %v1456_v38  ;;  %v1459_v47 = vadd.f32 %v947_v45, %v435_v44  ;;  %v949_v50 = vld [vmem:[%s2773_s29 + $0x730] sm:$0xff]  ;;  %1969 = vst [vmem:[%s2788_s20 + $0x710] sm:$0xff] %v1457_v42  ;;  %v1460_v51 = vadd.f32 %v948_v48, %v436_v46  ;;  %v438_v53 = vld [vmem:[%s2766_s3 + $0x738] sm:$0xff] }
 0x106   : > { %1970 = vst [vmem:[%s2788_s20 + $0x718] sm:$0xff] %v1458_v43  ;;  %v1461_v52 = vadd.f32 %v949_v50, %v437_v49  ;;  %v950_v54 = vld [vmem:[%s2773_s29 + $0x738] sm:$0xff]  ;;  %v439_v55 = vld [vmem:[%s2766_s3 + $0x740] sm:$0xff]  ;;  %v440_v58 = vld [vmem:[%s2766_s3 + $0x748] sm:$0xff] }
 0x107   : > { %1971 = vst [vmem:[%s2788_s20 + $0x720] sm:$0xff] %v1459_v47  ;;  %v1462_v56 = vadd.f32 %v950_v54, %v438_v53  ;;  %v951_v57 = vld [vmem:[%s2773_s29 + $0x740] sm:$0xff]  ;;  %v952_v59 = vld [vmem:[%s2773_s29 + $0x748] sm:$0xff]  ;;  %1972 = vst [vmem:[%s2788_s20 + $0x728] sm:$0xff] %v1460_v51 }
 0x108   : > { %1973 = vst [vmem:[%s2788_s20 + $0x730] sm:$0xff] %v1461_v52  ;;  %v1463_v60 = vadd.f32 %v951_v57, %v439_v55  ;;  %v1464_v61 = vadd.f32 %v952_v59, %v440_v58  ;;  %v441_v62 = vld [vmem:[%s2766_s3 + $0x750] sm:$0xff]  ;;  %v442_v0 = vld [vmem:[%s2766_s3 + $0x758] sm:$0xff]  ;;  %v443_v3 = vld [vmem:[%s2766_s3 + $0x760] sm:$0xff] }
 0x109   : > { %v953_v63 = vld [vmem:[%s2773_s29 + $0x750] sm:$0xff]  ;;  %1974 = vst [vmem:[%s2788_s20 + $0x738] sm:$0xff] %v1462_v56  ;;  %v954_v2 = vld [vmem:[%s2773_s29 + $0x758] sm:$0xff]  ;;  %v955_v4 = vld [vmem:[%s2773_s29 + $0x760] sm:$0xff] }
 0x10a   : > { %v1465_v1 = vadd.f32 %v953_v63, %v441_v62  ;;  %1975 = vst [vmem:[%s2788_s20 + $0x740] sm:$0xff] %v1463_v60  ;;  %1976 = vst [vmem:[%s2788_s20 + $0x748] sm:$0xff] %v1464_v61  ;;  %v1466_v5 = vadd.f32 %v954_v2, %v442_v0  ;;  %v1467_v6 = vadd.f32 %v955_v4, %v443_v3  ;;  %v444_v7 = vld [vmem:[%s2766_s3 + $0x768] sm:$0xff]  ;;  %v445_v9 = vld [vmem:[%s2766_s3 + $0x770] sm:$0xff] }
 0x10b   : > { %v956_v8 = vld [vmem:[%s2773_s29 + $0x768] sm:$0xff]  ;;  %v957_v11 = vld [vmem:[%s2773_s29 + $0x770] sm:$0xff]  ;;  %v446_v12 = vld [vmem:[%s2766_s3 + $0x778] sm:$0xff] }
 0x10c   : > { %1977 = vst [vmem:[%s2788_s20 + $0x750] sm:$0xff] %v1465_v1  ;;  %v1468_v10 = vadd.f32 %v956_v8, %v444_v7  ;;  %v958_v13 = vld [vmem:[%s2773_s29 + $0x778] sm:$0xff]  ;;  %1978 = vst [vmem:[%s2788_s20 + $0x758] sm:$0xff] %v1466_v5  ;;  %v1469_v14 = vadd.f32 %v957_v11, %v445_v9  ;;  %v447_v16 = vld [vmem:[%s2766_s3 + $0x780] sm:$0xff] }
 0x10d   : > { %1979 = vst [vmem:[%s2788_s20 + $0x760] sm:$0xff] %v1467_v6  ;;  %v1470_v15 = vadd.f32 %v958_v13, %v446_v12  ;;  %v959_v17 = vld [vmem:[%s2773_s29 + $0x780] sm:$0xff]  ;;  %v448_v18 = vld [vmem:[%s2766_s3 + $0x788] sm:$0xff]  ;;  %v449_v21 = vld [vmem:[%s2766_s3 + $0x790] sm:$0xff] }
 0x10e   : > { %1980 = vst [vmem:[%s2788_s20 + $0x768] sm:$0xff] %v1468_v10  ;;  %v1471_v19 = vadd.f32 %v959_v17, %v447_v16  ;;  %v960_v20 = vld [vmem:[%s2773_s29 + $0x788] sm:$0xff]  ;;  %v961_v22 = vld [vmem:[%s2773_s29 + $0x790] sm:$0xff]  ;;  %1981 = vst [vmem:[%s2788_s20 + $0x770] sm:$0xff] %v1469_v14 }
 0x10f   : > { %1982 = vst [vmem:[%s2788_s20 + $0x778] sm:$0xff] %v1470_v15  ;;  %v1472_v23 = vadd.f32 %v960_v20, %v448_v18  ;;  %v1473_v24 = vadd.f32 %v961_v22, %v449_v21  ;;  %v450_v25 = vld [vmem:[%s2766_s3 + $0x798] sm:$0xff]  ;;  %v451_v27 = vld [vmem:[%s2766_s3 + $0x7a0] sm:$0xff]  ;;  %v452_v30 = vld [vmem:[%s2766_s3 + $0x7a8] sm:$0xff] }
 0x110   : > { %v962_v26 = vld [vmem:[%s2773_s29 + $0x798] sm:$0xff]  ;;  %1983 = vst [vmem:[%s2788_s20 + $0x780] sm:$0xff] %v1471_v19  ;;  %v963_v29 = vld [vmem:[%s2773_s29 + $0x7a0] sm:$0xff]  ;;  %v964_v31 = vld [vmem:[%s2773_s29 + $0x7a8] sm:$0xff] }
 0x111   : > { %v1474_v28 = vadd.f32 %v962_v26, %v450_v25  ;;  %1984 = vst [vmem:[%s2788_s20 + $0x788] sm:$0xff] %v1472_v23  ;;  %1985 = vst [vmem:[%s2788_s20 + $0x790] sm:$0xff] %v1473_v24  ;;  %v1475_v32 = vadd.f32 %v963_v29, %v451_v27  ;;  %v1476_v33 = vadd.f32 %v964_v31, %v452_v30  ;;  %v453_v34 = vld [vmem:[%s2766_s3 + $0x7b0] sm:$0xff]  ;;  %v454_v36 = vld [vmem:[%s2766_s3 + $0x7b8] sm:$0xff] }
 0x112   : > { %v965_v35 = vld [vmem:[%s2773_s29 + $0x7b0] sm:$0xff]  ;;  %v966_v38 = vld [vmem:[%s2773_s29 + $0x7b8] sm:$0xff]  ;;  %v455_v39 = vld [vmem:[%s2766_s3 + $0x7c0] sm:$0xff] }
 0x113   : > { %1986 = vst [vmem:[%s2788_s20 + $0x798] sm:$0xff] %v1474_v28  ;;  %v1477_v37 = vadd.f32 %v965_v35, %v453_v34  ;;  %v967_v40 = vld [vmem:[%s2773_s29 + $0x7c0] sm:$0xff]  ;;  %1987 = vst [vmem:[%s2788_s20 + $0x7a0] sm:$0xff] %v1475_v32  ;;  %v1478_v41 = vadd.f32 %v966_v38, %v454_v36  ;;  %v456_v43 = vld [vmem:[%s2766_s3 + $0x7c8] sm:$0xff] }
 0x114   : > { %1988 = vst [vmem:[%s2788_s20 + $0x7a8] sm:$0xff] %v1476_v33  ;;  %v1479_v42 = vadd.f32 %v967_v40, %v455_v39  ;;  %v968_v44 = vld [vmem:[%s2773_s29 + $0x7c8] sm:$0xff]  ;;  %v457_v45 = vld [vmem:[%s2766_s3 + $0x7d0] sm:$0xff]  ;;  %v458_v48 = vld [vmem:[%s2766_s3 + $0x7d8] sm:$0xff] }
 0x115   : > { %1989 = vst [vmem:[%s2788_s20 + $0x7b0] sm:$0xff] %v1477_v37  ;;  %v1480_v46 = vadd.f32 %v968_v44, %v456_v43  ;;  %v969_v47 = vld [vmem:[%s2773_s29 + $0x7d0] sm:$0xff]  ;;  %v970_v49 = vld [vmem:[%s2773_s29 + $0x7d8] sm:$0xff]  ;;  %1990 = vst [vmem:[%s2788_s20 + $0x7b8] sm:$0xff] %v1478_v41 }
 0x116   : > { %1991 = vst [vmem:[%s2788_s20 + $0x7c0] sm:$0xff] %v1479_v42  ;;  %v1481_v50 = vadd.f32 %v969_v47, %v457_v45  ;;  %v1482_v51 = vadd.f32 %v970_v49, %v458_v48  ;;  %v459_v52 = vld [vmem:[%s2766_s3 + $0x7e0] sm:$0xff]  ;;  %v460_v54 = vld [vmem:[%s2766_s3 + $0x7e8] sm:$0xff]  ;;  %v461_v57 = vld [vmem:[%s2766_s3 + $0x7f0] sm:$0xff] }
 0x117   : > { %v971_v53 = vld [vmem:[%s2773_s29 + $0x7e0] sm:$0xff]  ;;  %1992 = vst [vmem:[%s2788_s20 + $0x7c8] sm:$0xff] %v1480_v46  ;;  %v972_v56 = vld [vmem:[%s2773_s29 + $0x7e8] sm:$0xff]  ;;  %v973_v58 = vld [vmem:[%s2773_s29 + $0x7f0] sm:$0xff] }
 0x118   : > { %v1483_v55 = vadd.f32 %v971_v53, %v459_v52  ;;  %1993 = vst [vmem:[%s2788_s20 + $0x7d0] sm:$0xff] %v1481_v50  ;;  %1994 = vst [vmem:[%s2788_s20 + $0x7d8] sm:$0xff] %v1482_v51  ;;  %v1484_v59 = vadd.f32 %v972_v56, %v460_v54  ;;  %v1485_v60 = vadd.f32 %v973_v58, %v461_v57  ;;  %v462_v61 = vld [vmem:[%s2766_s3 + $0x7f8] sm:$0xff]  ;;  %v463_v63 = vld [vmem:[%s2766_s3 + $0x800] sm:$0xff] }
 0x119   : > { %v974_v62 = vld [vmem:[%s2773_s29 + $0x7f8] sm:$0xff]  ;;  %v975_v1 = vld [vmem:[%s2773_s29 + $0x800] sm:$0xff]  ;;  %v464_v2 = vld [vmem:[%s2766_s3 + $0x808] sm:$0xff] }
 0x11a   : > { %1995 = vst [vmem:[%s2788_s20 + $0x7e0] sm:$0xff] %v1483_v55  ;;  %v1486_v0 = vadd.f32 %v974_v62, %v462_v61  ;;  %v976_v3 = vld [vmem:[%s2773_s29 + $0x808] sm:$0xff]  ;;  %1996 = vst [vmem:[%s2788_s20 + $0x7e8] sm:$0xff] %v1484_v59  ;;  %v1487_v4 = vadd.f32 %v975_v1, %v463_v63  ;;  %v465_v6 = vld [vmem:[%s2766_s3 + $0x810] sm:$0xff] }
 0x11b   : > { %1997 = vst [vmem:[%s2788_s20 + $0x7f0] sm:$0xff] %v1485_v60  ;;  %v1488_v5 = vadd.f32 %v976_v3, %v464_v2  ;;  %v977_v7 = vld [vmem:[%s2773_s29 + $0x810] sm:$0xff]  ;;  %v466_v8 = vld [vmem:[%s2766_s3 + $0x818] sm:$0xff]  ;;  %v467_v11 = vld [vmem:[%s2766_s3 + $0x820] sm:$0xff] }
 0x11c   : > { %1998 = vst [vmem:[%s2788_s20 + $0x7f8] sm:$0xff] %v1486_v0  ;;  %v1489_v9 = vadd.f32 %v977_v7, %v465_v6  ;;  %v978_v10 = vld [vmem:[%s2773_s29 + $0x818] sm:$0xff]  ;;  %v979_v12 = vld [vmem:[%s2773_s29 + $0x820] sm:$0xff]  ;;  %1999 = vst [vmem:[%s2788_s20 + $0x800] sm:$0xff] %v1487_v4 }
 0x11d   : > { %2000 = vst [vmem:[%s2788_s20 + $0x808] sm:$0xff] %v1488_v5  ;;  %v1490_v13 = vadd.f32 %v978_v10, %v466_v8  ;;  %v1491_v14 = vadd.f32 %v979_v12, %v467_v11  ;;  %v468_v15 = vld [vmem:[%s2766_s3 + $0x828] sm:$0xff]  ;;  %v469_v17 = vld [vmem:[%s2766_s3 + $0x830] sm:$0xff]  ;;  %v470_v20 = vld [vmem:[%s2766_s3 + $0x838] sm:$0xff] }
 0x11e   : > { %v980_v16 = vld [vmem:[%s2773_s29 + $0x828] sm:$0xff]  ;;  %2001 = vst [vmem:[%s2788_s20 + $0x810] sm:$0xff] %v1489_v9  ;;  %v981_v19 = vld [vmem:[%s2773_s29 + $0x830] sm:$0xff]  ;;  %v982_v21 = vld [vmem:[%s2773_s29 + $0x838] sm:$0xff] }
 0x11f   : > { %v1492_v18 = vadd.f32 %v980_v16, %v468_v15  ;;  %2002 = vst [vmem:[%s2788_s20 + $0x818] sm:$0xff] %v1490_v13  ;;  %2003 = vst [vmem:[%s2788_s20 + $0x820] sm:$0xff] %v1491_v14  ;;  %v1493_v22 = vadd.f32 %v981_v19, %v469_v17  ;;  %v1494_v23 = vadd.f32 %v982_v21, %v470_v20  ;;  %v471_v24 = vld [vmem:[%s2766_s3 + $0x840] sm:$0xff]  ;;  %v472_v26 = vld [vmem:[%s2766_s3 + $0x848] sm:$0xff] }
 0x120   : > { %v983_v25 = vld [vmem:[%s2773_s29 + $0x840] sm:$0xff]  ;;  %v984_v28 = vld [vmem:[%s2773_s29 + $0x848] sm:$0xff]  ;;  %v473_v29 = vld [vmem:[%s2766_s3 + $0x850] sm:$0xff] }
 0x121   : > { %2004 = vst [vmem:[%s2788_s20 + $0x828] sm:$0xff] %v1492_v18  ;;  %v1495_v27 = vadd.f32 %v983_v25, %v471_v24  ;;  %v985_v30 = vld [vmem:[%s2773_s29 + $0x850] sm:$0xff]  ;;  %2005 = vst [vmem:[%s2788_s20 + $0x830] sm:$0xff] %v1493_v22  ;;  %v1496_v31 = vadd.f32 %v984_v28, %v472_v26  ;;  %v474_v33 = vld [vmem:[%s2766_s3 + $0x858] sm:$0xff] }
 0x122   : > { %2006 = vst [vmem:[%s2788_s20 + $0x838] sm:$0xff] %v1494_v23  ;;  %v1497_v32 = vadd.f32 %v985_v30, %v473_v29  ;;  %v986_v34 = vld [vmem:[%s2773_s29 + $0x858] sm:$0xff]  ;;  %v475_v35 = vld [vmem:[%s2766_s3 + $0x860] sm:$0xff]  ;;  %v476_v38 = vld [vmem:[%s2766_s3 + $0x868] sm:$0xff] }
 0x123   : > { %2007 = vst [vmem:[%s2788_s20 + $0x840] sm:$0xff] %v1495_v27  ;;  %v1498_v36 = vadd.f32 %v986_v34, %v474_v33  ;;  %v987_v37 = vld [vmem:[%s2773_s29 + $0x860] sm:$0xff]  ;;  %v988_v39 = vld [vmem:[%s2773_s29 + $0x868] sm:$0xff]  ;;  %2008 = vst [vmem:[%s2788_s20 + $0x848] sm:$0xff] %v1496_v31 }
 0x124   : > { %2009 = vst [vmem:[%s2788_s20 + $0x850] sm:$0xff] %v1497_v32  ;;  %v1499_v40 = vadd.f32 %v987_v37, %v475_v35  ;;  %v1500_v41 = vadd.f32 %v988_v39, %v476_v38  ;;  %v477_v42 = vld [vmem:[%s2766_s3 + $0x870] sm:$0xff]  ;;  %v478_v44 = vld [vmem:[%s2766_s3 + $0x878] sm:$0xff]  ;;  %v479_v47 = vld [vmem:[%s2766_s3 + $0x880] sm:$0xff] }
 0x125   : > { %v989_v43 = vld [vmem:[%s2773_s29 + $0x870] sm:$0xff]  ;;  %2010 = vst [vmem:[%s2788_s20 + $0x858] sm:$0xff] %v1498_v36  ;;  %v990_v46 = vld [vmem:[%s2773_s29 + $0x878] sm:$0xff]  ;;  %v991_v48 = vld [vmem:[%s2773_s29 + $0x880] sm:$0xff] }
 0x126   : > { %v1501_v45 = vadd.f32 %v989_v43, %v477_v42  ;;  %2011 = vst [vmem:[%s2788_s20 + $0x860] sm:$0xff] %v1499_v40  ;;  %2012 = vst [vmem:[%s2788_s20 + $0x868] sm:$0xff] %v1500_v41  ;;  %v1502_v49 = vadd.f32 %v990_v46, %v478_v44  ;;  %v1503_v50 = vadd.f32 %v991_v48, %v479_v47  ;;  %v480_v51 = vld [vmem:[%s2766_s3 + $0x888] sm:$0xff]  ;;  %v481_v53 = vld [vmem:[%s2766_s3 + $0x890] sm:$0xff] }
 0x127   : > { %v992_v52 = vld [vmem:[%s2773_s29 + $0x888] sm:$0xff]  ;;  %v993_v55 = vld [vmem:[%s2773_s29 + $0x890] sm:$0xff]  ;;  %v482_v56 = vld [vmem:[%s2766_s3 + $0x898] sm:$0xff] }
 0x128   : > { %2013 = vst [vmem:[%s2788_s20 + $0x870] sm:$0xff] %v1501_v45  ;;  %v1504_v54 = vadd.f32 %v992_v52, %v480_v51  ;;  %v994_v57 = vld [vmem:[%s2773_s29 + $0x898] sm:$0xff]  ;;  %2014 = vst [vmem:[%s2788_s20 + $0x878] sm:$0xff] %v1502_v49  ;;  %v1505_v58 = vadd.f32 %v993_v55, %v481_v53  ;;  %v483_v60 = vld [vmem:[%s2766_s3 + $0x8a0] sm:$0xff] }
 0x129   : > { %2015 = vst [vmem:[%s2788_s20 + $0x880] sm:$0xff] %v1503_v50  ;;  %v1506_v59 = vadd.f32 %v994_v57, %v482_v56  ;;  %v995_v61 = vld [vmem:[%s2773_s29 + $0x8a0] sm:$0xff]  ;;  %v484_v62 = vld [vmem:[%s2766_s3 + $0x8a8] sm:$0xff]  ;;  %v485_v1 = vld [vmem:[%s2766_s3 + $0x8b0] sm:$0xff] }
 0x12a   : > { %2016 = vst [vmem:[%s2788_s20 + $0x888] sm:$0xff] %v1504_v54  ;;  %v1507_v63 = vadd.f32 %v995_v61, %v483_v60  ;;  %v996_v0 = vld [vmem:[%s2773_s29 + $0x8a8] sm:$0xff]  ;;  %v997_v2 = vld [vmem:[%s2773_s29 + $0x8b0] sm:$0xff]  ;;  %2017 = vst [vmem:[%s2788_s20 + $0x890] sm:$0xff] %v1505_v58 }
 0x12b   : > { %2018 = vst [vmem:[%s2788_s20 + $0x898] sm:$0xff] %v1506_v59  ;;  %v1508_v3 = vadd.f32 %v996_v0, %v484_v62  ;;  %v1509_v4 = vadd.f32 %v997_v2, %v485_v1  ;;  %v486_v5 = vld [vmem:[%s2766_s3 + $0x8b8] sm:$0xff]  ;;  %v487_v7 = vld [vmem:[%s2766_s3 + $0x8c0] sm:$0xff]  ;;  %v488_v10 = vld [vmem:[%s2766_s3 + $0x8c8] sm:$0xff] }
 0x12c   : > { %v998_v6 = vld [vmem:[%s2773_s29 + $0x8b8] sm:$0xff]  ;;  %2019 = vst [vmem:[%s2788_s20 + $0x8a0] sm:$0xff] %v1507_v63  ;;  %v999_v9 = vld [vmem:[%s2773_s29 + $0x8c0] sm:$0xff]  ;;  %v1000_v11 = vld [vmem:[%s2773_s29 + $0x8c8] sm:$0xff] }
 0x12d   : > { %v1510_v8 = vadd.f32 %v998_v6, %v486_v5  ;;  %2020 = vst [vmem:[%s2788_s20 + $0x8a8] sm:$0xff] %v1508_v3  ;;  %2021 = vst [vmem:[%s2788_s20 + $0x8b0] sm:$0xff] %v1509_v4  ;;  %v1511_v12 = vadd.f32 %v999_v9, %v487_v7  ;;  %v1512_v13 = vadd.f32 %v1000_v11, %v488_v10  ;;  %v489_v14 = vld [vmem:[%s2766_s3 + $0x8d0] sm:$0xff]  ;;  %v490_v16 = vld [vmem:[%s2766_s3 + $0x8d8] sm:$0xff] }
 0x12e   : > { %v1001_v15 = vld [vmem:[%s2773_s29 + $0x8d0] sm:$0xff]  ;;  %v1002_v18 = vld [vmem:[%s2773_s29 + $0x8d8] sm:$0xff]  ;;  %v491_v19 = vld [vmem:[%s2766_s3 + $0x8e0] sm:$0xff] }
 0x12f   : > { %2022 = vst [vmem:[%s2788_s20 + $0x8b8] sm:$0xff] %v1510_v8  ;;  %v1513_v17 = vadd.f32 %v1001_v15, %v489_v14  ;;  %v1003_v20 = vld [vmem:[%s2773_s29 + $0x8e0] sm:$0xff]  ;;  %2023 = vst [vmem:[%s2788_s20 + $0x8c0] sm:$0xff] %v1511_v12  ;;  %v1514_v21 = vadd.f32 %v1002_v18, %v490_v16  ;;  %v492_v23 = vld [vmem:[%s2766_s3 + $0x8e8] sm:$0xff] }
 0x130   : > { %2024 = vst [vmem:[%s2788_s20 + $0x8c8] sm:$0xff] %v1512_v13  ;;  %v1515_v22 = vadd.f32 %v1003_v20, %v491_v19  ;;  %v1004_v24 = vld [vmem:[%s2773_s29 + $0x8e8] sm:$0xff]  ;;  %v493_v25 = vld [vmem:[%s2766_s3 + $0x8f0] sm:$0xff]  ;;  %v494_v28 = vld [vmem:[%s2766_s3 + $0x8f8] sm:$0xff] }
 0x131   : > { %2025 = vst [vmem:[%s2788_s20 + $0x8d0] sm:$0xff] %v1513_v17  ;;  %v1516_v26 = vadd.f32 %v1004_v24, %v492_v23  ;;  %v1005_v27 = vld [vmem:[%s2773_s29 + $0x8f0] sm:$0xff]  ;;  %v1006_v29 = vld [vmem:[%s2773_s29 + $0x8f8] sm:$0xff]  ;;  %2026 = vst [vmem:[%s2788_s20 + $0x8d8] sm:$0xff] %v1514_v21 }
 0x132   : > { %2027 = vst [vmem:[%s2788_s20 + $0x8e0] sm:$0xff] %v1515_v22  ;;  %v1517_v30 = vadd.f32 %v1005_v27, %v493_v25  ;;  %v1518_v31 = vadd.f32 %v1006_v29, %v494_v28  ;;  %v495_v32 = vld [vmem:[%s2766_s3 + $0x900] sm:$0xff]  ;;  %v496_v34 = vld [vmem:[%s2766_s3 + $0x908] sm:$0xff]  ;;  %v497_v37 = vld [vmem:[%s2766_s3 + $0x910] sm:$0xff] }
 0x133   : > { %v1007_v33 = vld [vmem:[%s2773_s29 + $0x900] sm:$0xff]  ;;  %2028 = vst [vmem:[%s2788_s20 + $0x8e8] sm:$0xff] %v1516_v26  ;;  %v1008_v36 = vld [vmem:[%s2773_s29 + $0x908] sm:$0xff]  ;;  %v1009_v38 = vld [vmem:[%s2773_s29 + $0x910] sm:$0xff] }
 0x134   : > { %v1519_v35 = vadd.f32 %v1007_v33, %v495_v32  ;;  %2029 = vst [vmem:[%s2788_s20 + $0x8f0] sm:$0xff] %v1517_v30  ;;  %2030 = vst [vmem:[%s2788_s20 + $0x8f8] sm:$0xff] %v1518_v31  ;;  %v1520_v39 = vadd.f32 %v1008_v36, %v496_v34  ;;  %v1521_v40 = vadd.f32 %v1009_v38, %v497_v37  ;;  %v498_v41 = vld [vmem:[%s2766_s3 + $0x918] sm:$0xff]  ;;  %v499_v43 = vld [vmem:[%s2766_s3 + $0x920] sm:$0xff] }
 0x135   : > { %v1010_v42 = vld [vmem:[%s2773_s29 + $0x918] sm:$0xff]  ;;  %v1011_v45 = vld [vmem:[%s2773_s29 + $0x920] sm:$0xff]  ;;  %v500_v46 = vld [vmem:[%s2766_s3 + $0x928] sm:$0xff] }
 0x136   : > { %2031 = vst [vmem:[%s2788_s20 + $0x900] sm:$0xff] %v1519_v35  ;;  %v1522_v44 = vadd.f32 %v1010_v42, %v498_v41  ;;  %v1012_v47 = vld [vmem:[%s2773_s29 + $0x928] sm:$0xff]  ;;  %2032 = vst [vmem:[%s2788_s20 + $0x908] sm:$0xff] %v1520_v39  ;;  %v1523_v48 = vadd.f32 %v1011_v45, %v499_v43  ;;  %v501_v50 = vld [vmem:[%s2766_s3 + $0x930] sm:$0xff] }
 0x137   : > { %2033 = vst [vmem:[%s2788_s20 + $0x910] sm:$0xff] %v1521_v40  ;;  %v1524_v49 = vadd.f32 %v1012_v47, %v500_v46  ;;  %v1013_v51 = vld [vmem:[%s2773_s29 + $0x930] sm:$0xff]  ;;  %v502_v52 = vld [vmem:[%s2766_s3 + $0x938] sm:$0xff]  ;;  %v503_v55 = vld [vmem:[%s2766_s3 + $0x940] sm:$0xff] }
 0x138   : > { %2034 = vst [vmem:[%s2788_s20 + $0x918] sm:$0xff] %v1522_v44  ;;  %v1525_v53 = vadd.f32 %v1013_v51, %v501_v50  ;;  %v1014_v54 = vld [vmem:[%s2773_s29 + $0x938] sm:$0xff]  ;;  %v1015_v56 = vld [vmem:[%s2773_s29 + $0x940] sm:$0xff]  ;;  %2035 = vst [vmem:[%s2788_s20 + $0x920] sm:$0xff] %v1523_v48 }
 0x139   : > { %2036 = vst [vmem:[%s2788_s20 + $0x928] sm:$0xff] %v1524_v49  ;;  %v1526_v57 = vadd.f32 %v1014_v54, %v502_v52  ;;  %v1527_v58 = vadd.f32 %v1015_v56, %v503_v55  ;;  %v504_v59 = vld [vmem:[%s2766_s3 + $0x948] sm:$0xff]  ;;  %v505_v61 = vld [vmem:[%s2766_s3 + $0x950] sm:$0xff]  ;;  %v506_v0 = vld [vmem:[%s2766_s3 + $0x958] sm:$0xff] }
 0x13a   : > { %v1016_v60 = vld [vmem:[%s2773_s29 + $0x948] sm:$0xff]  ;;  %2037 = vst [vmem:[%s2788_s20 + $0x930] sm:$0xff] %v1525_v53  ;;  %v1017_v63 = vld [vmem:[%s2773_s29 + $0x950] sm:$0xff]  ;;  %v1018_v1 = vld [vmem:[%s2773_s29 + $0x958] sm:$0xff] }
 0x13b   : > { %v1528_v62 = vadd.f32 %v1016_v60, %v504_v59  ;;  %2038 = vst [vmem:[%s2788_s20 + $0x938] sm:$0xff] %v1526_v57  ;;  %2039 = vst [vmem:[%s2788_s20 + $0x940] sm:$0xff] %v1527_v58  ;;  %v1529_v2 = vadd.f32 %v1017_v63, %v505_v61  ;;  %v1530_v3 = vadd.f32 %v1018_v1, %v506_v0  ;;  %v507_v4 = vld [vmem:[%s2766_s3 + $0x960] sm:$0xff]  ;;  %v508_v6 = vld [vmem:[%s2766_s3 + $0x968] sm:$0xff] }
 0x13c   : > { %v1019_v5 = vld [vmem:[%s2773_s29 + $0x960] sm:$0xff]  ;;  %v1020_v8 = vld [vmem:[%s2773_s29 + $0x968] sm:$0xff]  ;;  %v509_v9 = vld [vmem:[%s2766_s3 + $0x970] sm:$0xff] }
 0x13d   : > { %2040 = vst [vmem:[%s2788_s20 + $0x948] sm:$0xff] %v1528_v62  ;;  %v1531_v7 = vadd.f32 %v1019_v5, %v507_v4  ;;  %v1021_v10 = vld [vmem:[%s2773_s29 + $0x970] sm:$0xff]  ;;  %2041 = vst [vmem:[%s2788_s20 + $0x950] sm:$0xff] %v1529_v2  ;;  %v1532_v11 = vadd.f32 %v1020_v8, %v508_v6  ;;  %v510_v13 = vld [vmem:[%s2766_s3 + $0x978] sm:$0xff] }
 0x13e   : > { %2042 = vst [vmem:[%s2788_s20 + $0x958] sm:$0xff] %v1530_v3  ;;  %v1533_v12 = vadd.f32 %v1021_v10, %v509_v9  ;;  %v1022_v14 = vld [vmem:[%s2773_s29 + $0x978] sm:$0xff]  ;;  %v511_v15 = vld [vmem:[%s2766_s3 + $0x980] sm:$0xff]  ;;  %v512_v18 = vld [vmem:[%s2766_s3 + $0x988] sm:$0xff] }
 0x13f   : > { %2043 = vst [vmem:[%s2788_s20 + $0x960] sm:$0xff] %v1531_v7  ;;  %v1534_v16 = vadd.f32 %v1022_v14, %v510_v13  ;;  %v1023_v17 = vld [vmem:[%s2773_s29 + $0x980] sm:$0xff]  ;;  %v1024_v19 = vld [vmem:[%s2773_s29 + $0x988] sm:$0xff]  ;;  %2044 = vst [vmem:[%s2788_s20 + $0x968] sm:$0xff] %v1532_v11 }
 0x140   : > { %2045 = vst [vmem:[%s2788_s20 + $0x970] sm:$0xff] %v1533_v12  ;;  %v1535_v20 = vadd.f32 %v1023_v17, %v511_v15  ;;  %v1536_v21 = vadd.f32 %v1024_v19, %v512_v18  ;;  %v513_v22 = vld [vmem:[%s2766_s3 + $0x990] sm:$0xff]  ;;  %v514_v24 = vld [vmem:[%s2766_s3 + $0x998] sm:$0xff]  ;;  %v515_v27 = vld [vmem:[%s2766_s3 + $0x9a0] sm:$0xff] }
 0x141   : > { %v1025_v23 = vld [vmem:[%s2773_s29 + $0x990] sm:$0xff]  ;;  %2046 = vst [vmem:[%s2788_s20 + $0x978] sm:$0xff] %v1534_v16  ;;  %v1026_v26 = vld [vmem:[%s2773_s29 + $0x998] sm:$0xff]  ;;  %v1027_v28 = vld [vmem:[%s2773_s29 + $0x9a0] sm:$0xff] }
 0x142   : > { %v1537_v25 = vadd.f32 %v1025_v23, %v513_v22  ;;  %2047 = vst [vmem:[%s2788_s20 + $0x980] sm:$0xff] %v1535_v20  ;;  %2048 = vst [vmem:[%s2788_s20 + $0x988] sm:$0xff] %v1536_v21  ;;  %v1538_v29 = vadd.f32 %v1026_v26, %v514_v24  ;;  %v1539_v30 = vadd.f32 %v1027_v28, %v515_v27  ;;  %v516_v31 = vld [vmem:[%s2766_s3 + $0x9a8] sm:$0xff]  ;;  %v517_v33 = vld [vmem:[%s2766_s3 + $0x9b0] sm:$0xff] }
 0x143   : > { %v1028_v32 = vld [vmem:[%s2773_s29 + $0x9a8] sm:$0xff]  ;;  %v1029_v35 = vld [vmem:[%s2773_s29 + $0x9b0] sm:$0xff]  ;;  %v518_v36 = vld [vmem:[%s2766_s3 + $0x9b8] sm:$0xff] }
 0x144   : > { %2049 = vst [vmem:[%s2788_s20 + $0x990] sm:$0xff] %v1537_v25  ;;  %v1540_v34 = vadd.f32 %v1028_v32, %v516_v31  ;;  %v1030_v37 = vld [vmem:[%s2773_s29 + $0x9b8] sm:$0xff]  ;;  %2050 = vst [vmem:[%s2788_s20 + $0x998] sm:$0xff] %v1538_v29  ;;  %v1541_v38 = vadd.f32 %v1029_v35, %v517_v33  ;;  %v519_v40 = vld [vmem:[%s2766_s3 + $0x9c0] sm:$0xff] }
 0x145   : > { %2051 = vst [vmem:[%s2788_s20 + $0x9a0] sm:$0xff] %v1539_v30  ;;  %v1542_v39 = vadd.f32 %v1030_v37, %v518_v36  ;;  %v1031_v41 = vld [vmem:[%s2773_s29 + $0x9c0] sm:$0xff]  ;;  %v520_v42 = vld [vmem:[%s2766_s3 + $0x9c8] sm:$0xff]  ;;  %v521_v45 = vld [vmem:[%s2766_s3 + $0x9d0] sm:$0xff] }
 0x146   : > { %2052 = vst [vmem:[%s2788_s20 + $0x9a8] sm:$0xff] %v1540_v34  ;;  %v1543_v43 = vadd.f32 %v1031_v41, %v519_v40  ;;  %v1032_v44 = vld [vmem:[%s2773_s29 + $0x9c8] sm:$0xff]  ;;  %v1033_v46 = vld [vmem:[%s2773_s29 + $0x9d0] sm:$0xff]  ;;  %2053 = vst [vmem:[%s2788_s20 + $0x9b0] sm:$0xff] %v1541_v38 }
 0x147   : > { %2054 = vst [vmem:[%s2788_s20 + $0x9b8] sm:$0xff] %v1542_v39  ;;  %v1544_v47 = vadd.f32 %v1032_v44, %v520_v42  ;;  %v1545_v48 = vadd.f32 %v1033_v46, %v521_v45  ;;  %v522_v49 = vld [vmem:[%s2766_s3 + $0x9d8] sm:$0xff]  ;;  %v523_v51 = vld [vmem:[%s2766_s3 + $0x9e0] sm:$0xff]  ;;  %v524_v54 = vld [vmem:[%s2766_s3 + $0x9e8] sm:$0xff] }
 0x148   : > { %v1034_v50 = vld [vmem:[%s2773_s29 + $0x9d8] sm:$0xff]  ;;  %2055 = vst [vmem:[%s2788_s20 + $0x9c0] sm:$0xff] %v1543_v43  ;;  %v1035_v53 = vld [vmem:[%s2773_s29 + $0x9e0] sm:$0xff]  ;;  %v1036_v55 = vld [vmem:[%s2773_s29 + $0x9e8] sm:$0xff] }
 0x149   : > { %v1546_v52 = vadd.f32 %v1034_v50, %v522_v49  ;;  %2056 = vst [vmem:[%s2788_s20 + $0x9c8] sm:$0xff] %v1544_v47  ;;  %2057 = vst [vmem:[%s2788_s20 + $0x9d0] sm:$0xff] %v1545_v48  ;;  %v1547_v56 = vadd.f32 %v1035_v53, %v523_v51  ;;  %v1548_v57 = vadd.f32 %v1036_v55, %v524_v54  ;;  %v525_v58 = vld [vmem:[%s2766_s3 + $0x9f0] sm:$0xff]  ;;  %v526_v60 = vld [vmem:[%s2766_s3 + $0x9f8] sm:$0xff] }
 0x14a   : > { %v1037_v59 = vld [vmem:[%s2773_s29 + $0x9f0] sm:$0xff]  ;;  %v1038_v62 = vld [vmem:[%s2773_s29 + $0x9f8] sm:$0xff]  ;;  %v527_v63 = vld [vmem:[%s2766_s3 + $0xa00] sm:$0xff] }
 0x14b   : > { %2058 = vst [vmem:[%s2788_s20 + $0x9d8] sm:$0xff] %v1546_v52  ;;  %v1549_v61 = vadd.f32 %v1037_v59, %v525_v58  ;;  %v1039_v0 = vld [vmem:[%s2773_s29 + $0xa00] sm:$0xff]  ;;  %2059 = vst [vmem:[%s2788_s20 + $0x9e0] sm:$0xff] %v1547_v56  ;;  %v1550_v1 = vadd.f32 %v1038_v62, %v526_v60  ;;  %v528_v3 = vld [vmem:[%s2766_s3 + $0xa08] sm:$0xff] }
 0x14c   : > { %2060 = vst [vmem:[%s2788_s20 + $0x9e8] sm:$0xff] %v1548_v57  ;;  %v1551_v2 = vadd.f32 %v1039_v0, %v527_v63  ;;  %v1040_v4 = vld [vmem:[%s2773_s29 + $0xa08] sm:$0xff]  ;;  %v529_v5 = vld [vmem:[%s2766_s3 + $0xa10] sm:$0xff]  ;;  %v530_v8 = vld [vmem:[%s2766_s3 + $0xa18] sm:$0xff] }
 0x14d   : > { %2061 = vst [vmem:[%s2788_s20 + $0x9f0] sm:$0xff] %v1549_v61  ;;  %v1552_v6 = vadd.f32 %v1040_v4, %v528_v3  ;;  %v1041_v7 = vld [vmem:[%s2773_s29 + $0xa10] sm:$0xff]  ;;  %v1042_v9 = vld [vmem:[%s2773_s29 + $0xa18] sm:$0xff]  ;;  %2062 = vst [vmem:[%s2788_s20 + $0x9f8] sm:$0xff] %v1550_v1 }
 0x14e   : > { %2063 = vst [vmem:[%s2788_s20 + $0xa00] sm:$0xff] %v1551_v2  ;;  %v1553_v10 = vadd.f32 %v1041_v7, %v529_v5  ;;  %v1554_v11 = vadd.f32 %v1042_v9, %v530_v8  ;;  %v531_v12 = vld [vmem:[%s2766_s3 + $0xa20] sm:$0xff]  ;;  %v532_v14 = vld [vmem:[%s2766_s3 + $0xa28] sm:$0xff]  ;;  %v533_v17 = vld [vmem:[%s2766_s3 + $0xa30] sm:$0xff] }
 0x14f   : > { %v1043_v13 = vld [vmem:[%s2773_s29 + $0xa20] sm:$0xff]  ;;  %2064 = vst [vmem:[%s2788_s20 + $0xa08] sm:$0xff] %v1552_v6  ;;  %v1044_v16 = vld [vmem:[%s2773_s29 + $0xa28] sm:$0xff]  ;;  %v1045_v18 = vld [vmem:[%s2773_s29 + $0xa30] sm:$0xff] }
 0x150   : > { %v1555_v15 = vadd.f32 %v1043_v13, %v531_v12  ;;  %2065 = vst [vmem:[%s2788_s20 + $0xa10] sm:$0xff] %v1553_v10  ;;  %2066 = vst [vmem:[%s2788_s20 + $0xa18] sm:$0xff] %v1554_v11  ;;  %v1556_v19 = vadd.f32 %v1044_v16, %v532_v14  ;;  %v1557_v20 = vadd.f32 %v1045_v18, %v533_v17  ;;  %v534_v21 = vld [vmem:[%s2766_s3 + $0xa38] sm:$0xff]  ;;  %v535_v23 = vld [vmem:[%s2766_s3 + $0xa40] sm:$0xff] }
 0x151   : > { %v1046_v22 = vld [vmem:[%s2773_s29 + $0xa38] sm:$0xff]  ;;  %v1047_v25 = vld [vmem:[%s2773_s29 + $0xa40] sm:$0xff]  ;;  %v536_v26 = vld [vmem:[%s2766_s3 + $0xa48] sm:$0xff] }
 0x152   : > { %2067 = vst [vmem:[%s2788_s20 + $0xa20] sm:$0xff] %v1555_v15  ;;  %v1558_v24 = vadd.f32 %v1046_v22, %v534_v21  ;;  %v1048_v27 = vld [vmem:[%s2773_s29 + $0xa48] sm:$0xff]  ;;  %2068 = vst [vmem:[%s2788_s20 + $0xa28] sm:$0xff] %v1556_v19  ;;  %v1559_v28 = vadd.f32 %v1047_v25, %v535_v23  ;;  %v537_v30 = vld [vmem:[%s2766_s3 + $0xa50] sm:$0xff] }
 0x153   : > { %2069 = vst [vmem:[%s2788_s20 + $0xa30] sm:$0xff] %v1557_v20  ;;  %v1560_v29 = vadd.f32 %v1048_v27, %v536_v26  ;;  %v1049_v31 = vld [vmem:[%s2773_s29 + $0xa50] sm:$0xff]  ;;  %v538_v32 = vld [vmem:[%s2766_s3 + $0xa58] sm:$0xff]  ;;  %v539_v35 = vld [vmem:[%s2766_s3 + $0xa60] sm:$0xff] }
 0x154   : > { %2070 = vst [vmem:[%s2788_s20 + $0xa38] sm:$0xff] %v1558_v24  ;;  %v1561_v33 = vadd.f32 %v1049_v31, %v537_v30  ;;  %v1050_v34 = vld [vmem:[%s2773_s29 + $0xa58] sm:$0xff]  ;;  %v1051_v36 = vld [vmem:[%s2773_s29 + $0xa60] sm:$0xff]  ;;  %2071 = vst [vmem:[%s2788_s20 + $0xa40] sm:$0xff] %v1559_v28 }
 0x155   : > { %2072 = vst [vmem:[%s2788_s20 + $0xa48] sm:$0xff] %v1560_v29  ;;  %v1562_v37 = vadd.f32 %v1050_v34, %v538_v32  ;;  %v1563_v38 = vadd.f32 %v1051_v36, %v539_v35  ;;  %v540_v39 = vld [vmem:[%s2766_s3 + $0xa68] sm:$0xff]  ;;  %v541_v41 = vld [vmem:[%s2766_s3 + $0xa70] sm:$0xff]  ;;  %v542_v44 = vld [vmem:[%s2766_s3 + $0xa78] sm:$0xff] }
 0x156   : > { %v1052_v40 = vld [vmem:[%s2773_s29 + $0xa68] sm:$0xff]  ;;  %2073 = vst [vmem:[%s2788_s20 + $0xa50] sm:$0xff] %v1561_v33  ;;  %v1053_v43 = vld [vmem:[%s2773_s29 + $0xa70] sm:$0xff]  ;;  %v1054_v45 = vld [vmem:[%s2773_s29 + $0xa78] sm:$0xff] }
 0x157   : > { %v1564_v42 = vadd.f32 %v1052_v40, %v540_v39  ;;  %2074 = vst [vmem:[%s2788_s20 + $0xa58] sm:$0xff] %v1562_v37  ;;  %2075 = vst [vmem:[%s2788_s20 + $0xa60] sm:$0xff] %v1563_v38  ;;  %v1565_v46 = vadd.f32 %v1053_v43, %v541_v41  ;;  %v1566_v47 = vadd.f32 %v1054_v45, %v542_v44  ;;  %v543_v48 = vld [vmem:[%s2766_s3 + $0xa80] sm:$0xff]  ;;  %v544_v50 = vld [vmem:[%s2766_s3 + $0xa88] sm:$0xff] }
 0x158   : > { %v1055_v49 = vld [vmem:[%s2773_s29 + $0xa80] sm:$0xff]  ;;  %v1056_v52 = vld [vmem:[%s2773_s29 + $0xa88] sm:$0xff]  ;;  %v545_v53 = vld [vmem:[%s2766_s3 + $0xa90] sm:$0xff] }
 0x159   : > { %2076 = vst [vmem:[%s2788_s20 + $0xa68] sm:$0xff] %v1564_v42  ;;  %v1567_v51 = vadd.f32 %v1055_v49, %v543_v48  ;;  %v1057_v54 = vld [vmem:[%s2773_s29 + $0xa90] sm:$0xff]  ;;  %2077 = vst [vmem:[%s2788_s20 + $0xa70] sm:$0xff] %v1565_v46  ;;  %v1568_v55 = vadd.f32 %v1056_v52, %v544_v50  ;;  %v546_v57 = vld [vmem:[%s2766_s3 + $0xa98] sm:$0xff] }
 0x15a   : > { %2078 = vst [vmem:[%s2788_s20 + $0xa78] sm:$0xff] %v1566_v47  ;;  %v1569_v56 = vadd.f32 %v1057_v54, %v545_v53  ;;  %v1058_v58 = vld [vmem:[%s2773_s29 + $0xa98] sm:$0xff]  ;;  %v547_v59 = vld [vmem:[%s2766_s3 + $0xaa0] sm:$0xff]  ;;  %v548_v62 = vld [vmem:[%s2766_s3 + $0xaa8] sm:$0xff] }
 0x15b   : > { %2079 = vst [vmem:[%s2788_s20 + $0xa80] sm:$0xff] %v1567_v51  ;;  %v1570_v60 = vadd.f32 %v1058_v58, %v546_v57  ;;  %v1059_v61 = vld [vmem:[%s2773_s29 + $0xaa0] sm:$0xff]  ;;  %v1060_v63 = vld [vmem:[%s2773_s29 + $0xaa8] sm:$0xff]  ;;  %2080 = vst [vmem:[%s2788_s20 + $0xa88] sm:$0xff] %v1568_v55 }
 0x15c   : > { %2081 = vst [vmem:[%s2788_s20 + $0xa90] sm:$0xff] %v1569_v56  ;;  %v1571_v0 = vadd.f32 %v1059_v61, %v547_v59  ;;  %v1572_v1 = vadd.f32 %v1060_v63, %v548_v62  ;;  %v549_v2 = vld [vmem:[%s2766_s3 + $0xab0] sm:$0xff]  ;;  %v550_v4 = vld [vmem:[%s2766_s3 + $0xab8] sm:$0xff]  ;;  %v551_v7 = vld [vmem:[%s2766_s3 + $0xac0] sm:$0xff] }
 0x15d   : > { %v1061_v3 = vld [vmem:[%s2773_s29 + $0xab0] sm:$0xff]  ;;  %2082 = vst [vmem:[%s2788_s20 + $0xa98] sm:$0xff] %v1570_v60  ;;  %v1062_v6 = vld [vmem:[%s2773_s29 + $0xab8] sm:$0xff]  ;;  %v1063_v8 = vld [vmem:[%s2773_s29 + $0xac0] sm:$0xff] }
 0x15e   : > { %v1573_v5 = vadd.f32 %v1061_v3, %v549_v2  ;;  %2083 = vst [vmem:[%s2788_s20 + $0xaa0] sm:$0xff] %v1571_v0  ;;  %2084 = vst [vmem:[%s2788_s20 + $0xaa8] sm:$0xff] %v1572_v1  ;;  %v1574_v9 = vadd.f32 %v1062_v6, %v550_v4  ;;  %v1575_v10 = vadd.f32 %v1063_v8, %v551_v7  ;;  %v552_v11 = vld [vmem:[%s2766_s3 + $0xac8] sm:$0xff]  ;;  %v553_v13 = vld [vmem:[%s2766_s3 + $0xad0] sm:$0xff] }
 0x15f   : > { %v1064_v12 = vld [vmem:[%s2773_s29 + $0xac8] sm:$0xff]  ;;  %v1065_v15 = vld [vmem:[%s2773_s29 + $0xad0] sm:$0xff]  ;;  %v554_v16 = vld [vmem:[%s2766_s3 + $0xad8] sm:$0xff] }
 0x160   : > { %2085 = vst [vmem:[%s2788_s20 + $0xab0] sm:$0xff] %v1573_v5  ;;  %v1576_v14 = vadd.f32 %v1064_v12, %v552_v11  ;;  %v1066_v17 = vld [vmem:[%s2773_s29 + $0xad8] sm:$0xff]  ;;  %2086 = vst [vmem:[%s2788_s20 + $0xab8] sm:$0xff] %v1574_v9  ;;  %v1577_v18 = vadd.f32 %v1065_v15, %v553_v13  ;;  %v555_v20 = vld [vmem:[%s2766_s3 + $0xae0] sm:$0xff] }
 0x161   : > { %2087 = vst [vmem:[%s2788_s20 + $0xac0] sm:$0xff] %v1575_v10  ;;  %v1578_v19 = vadd.f32 %v1066_v17, %v554_v16  ;;  %v1067_v21 = vld [vmem:[%s2773_s29 + $0xae0] sm:$0xff]  ;;  %v556_v22 = vld [vmem:[%s2766_s3 + $0xae8] sm:$0xff]  ;;  %v557_v25 = vld [vmem:[%s2766_s3 + $0xaf0] sm:$0xff] }
 0x162   : > { %2088 = vst [vmem:[%s2788_s20 + $0xac8] sm:$0xff] %v1576_v14  ;;  %v1579_v23 = vadd.f32 %v1067_v21, %v555_v20  ;;  %v1068_v24 = vld [vmem:[%s2773_s29 + $0xae8] sm:$0xff]  ;;  %v1069_v26 = vld [vmem:[%s2773_s29 + $0xaf0] sm:$0xff]  ;;  %2089 = vst [vmem:[%s2788_s20 + $0xad0] sm:$0xff] %v1577_v18 }
 0x163   : > { %2090 = vst [vmem:[%s2788_s20 + $0xad8] sm:$0xff] %v1578_v19  ;;  %v1580_v27 = vadd.f32 %v1068_v24, %v556_v22  ;;  %v1581_v28 = vadd.f32 %v1069_v26, %v557_v25  ;;  %v558_v29 = vld [vmem:[%s2766_s3 + $0xaf8] sm:$0xff]  ;;  %v559_v31 = vld [vmem:[%s2766_s3 + $0xb00] sm:$0xff]  ;;  %v560_v34 = vld [vmem:[%s2766_s3 + $0xb08] sm:$0xff] }
 0x164   : > { %v1070_v30 = vld [vmem:[%s2773_s29 + $0xaf8] sm:$0xff]  ;;  %2091 = vst [vmem:[%s2788_s20 + $0xae0] sm:$0xff] %v1579_v23  ;;  %v1071_v33 = vld [vmem:[%s2773_s29 + $0xb00] sm:$0xff]  ;;  %v1072_v35 = vld [vmem:[%s2773_s29 + $0xb08] sm:$0xff] }
 0x165   : > { %v1582_v32 = vadd.f32 %v1070_v30, %v558_v29  ;;  %2092 = vst [vmem:[%s2788_s20 + $0xae8] sm:$0xff] %v1580_v27  ;;  %2093 = vst [vmem:[%s2788_s20 + $0xaf0] sm:$0xff] %v1581_v28  ;;  %v1583_v36 = vadd.f32 %v1071_v33, %v559_v31  ;;  %v1584_v37 = vadd.f32 %v1072_v35, %v560_v34  ;;  %v561_v38 = vld [vmem:[%s2766_s3 + $0xb10] sm:$0xff]  ;;  %v562_v40 = vld [vmem:[%s2766_s3 + $0xb18] sm:$0xff] }
 0x166   : > { %v1073_v39 = vld [vmem:[%s2773_s29 + $0xb10] sm:$0xff]  ;;  %v1074_v42 = vld [vmem:[%s2773_s29 + $0xb18] sm:$0xff]  ;;  %v563_v43 = vld [vmem:[%s2766_s3 + $0xb20] sm:$0xff] }
 0x167   : > { %2094 = vst [vmem:[%s2788_s20 + $0xaf8] sm:$0xff] %v1582_v32  ;;  %v1585_v41 = vadd.f32 %v1073_v39, %v561_v38  ;;  %v1075_v44 = vld [vmem:[%s2773_s29 + $0xb20] sm:$0xff]  ;;  %2095 = vst [vmem:[%s2788_s20 + $0xb00] sm:$0xff] %v1583_v36  ;;  %v1586_v45 = vadd.f32 %v1074_v42, %v562_v40  ;;  %v564_v47 = vld [vmem:[%s2766_s3 + $0xb28] sm:$0xff] }
 0x168   : > { %2096 = vst [vmem:[%s2788_s20 + $0xb08] sm:$0xff] %v1584_v37  ;;  %v1587_v46 = vadd.f32 %v1075_v44, %v563_v43  ;;  %v1076_v48 = vld [vmem:[%s2773_s29 + $0xb28] sm:$0xff]  ;;  %v565_v49 = vld [vmem:[%s2766_s3 + $0xb30] sm:$0xff]  ;;  %v566_v52 = vld [vmem:[%s2766_s3 + $0xb38] sm:$0xff] }
 0x169   : > { %2097 = vst [vmem:[%s2788_s20 + $0xb10] sm:$0xff] %v1585_v41  ;;  %v1588_v50 = vadd.f32 %v1076_v48, %v564_v47  ;;  %v1077_v51 = vld [vmem:[%s2773_s29 + $0xb30] sm:$0xff]  ;;  %v1078_v53 = vld [vmem:[%s2773_s29 + $0xb38] sm:$0xff]  ;;  %2098 = vst [vmem:[%s2788_s20 + $0xb18] sm:$0xff] %v1586_v45 }
 0x16a   : > { %2099 = vst [vmem:[%s2788_s20 + $0xb20] sm:$0xff] %v1587_v46  ;;  %v1589_v54 = vadd.f32 %v1077_v51, %v565_v49  ;;  %v1590_v55 = vadd.f32 %v1078_v53, %v566_v52  ;;  %v567_v56 = vld [vmem:[%s2766_s3 + $0xb40] sm:$0xff]  ;;  %v568_v58 = vld [vmem:[%s2766_s3 + $0xb48] sm:$0xff]  ;;  %v569_v61 = vld [vmem:[%s2766_s3 + $0xb50] sm:$0xff] }
 0x16b   : > { %v1079_v57 = vld [vmem:[%s2773_s29 + $0xb40] sm:$0xff]  ;;  %2100 = vst [vmem:[%s2788_s20 + $0xb28] sm:$0xff] %v1588_v50  ;;  %v1080_v60 = vld [vmem:[%s2773_s29 + $0xb48] sm:$0xff]  ;;  %v1081_v62 = vld [vmem:[%s2773_s29 + $0xb50] sm:$0xff] }
 0x16c   : > { %v1591_v59 = vadd.f32 %v1079_v57, %v567_v56  ;;  %2101 = vst [vmem:[%s2788_s20 + $0xb30] sm:$0xff] %v1589_v54  ;;  %2102 = vst [vmem:[%s2788_s20 + $0xb38] sm:$0xff] %v1590_v55  ;;  %v1592_v63 = vadd.f32 %v1080_v60, %v568_v58  ;;  %v1593_v0 = vadd.f32 %v1081_v62, %v569_v61  ;;  %v570_v1 = vld [vmem:[%s2766_s3 + $0xb58] sm:$0xff]  ;;  %v571_v3 = vld [vmem:[%s2766_s3 + $0xb60] sm:$0xff] }
 0x16d   : > { %v1082_v2 = vld [vmem:[%s2773_s29 + $0xb58] sm:$0xff]  ;;  %v1083_v5 = vld [vmem:[%s2773_s29 + $0xb60] sm:$0xff]  ;;  %v572_v6 = vld [vmem:[%s2766_s3 + $0xb68] sm:$0xff] }
 0x16e   : > { %2103 = vst [vmem:[%s2788_s20 + $0xb40] sm:$0xff] %v1591_v59  ;;  %v1594_v4 = vadd.f32 %v1082_v2, %v570_v1  ;;  %v1084_v7 = vld [vmem:[%s2773_s29 + $0xb68] sm:$0xff]  ;;  %2104 = vst [vmem:[%s2788_s20 + $0xb48] sm:$0xff] %v1592_v63  ;;  %v1595_v8 = vadd.f32 %v1083_v5, %v571_v3  ;;  %v573_v10 = vld [vmem:[%s2766_s3 + $0xb70] sm:$0xff] }
 0x16f   : > { %2105 = vst [vmem:[%s2788_s20 + $0xb50] sm:$0xff] %v1593_v0  ;;  %v1596_v9 = vadd.f32 %v1084_v7, %v572_v6  ;;  %v1085_v11 = vld [vmem:[%s2773_s29 + $0xb70] sm:$0xff]  ;;  %v574_v12 = vld [vmem:[%s2766_s3 + $0xb78] sm:$0xff]  ;;  %v575_v15 = vld [vmem:[%s2766_s3 + $0xb80] sm:$0xff] }
 0x170   : > { %2106 = vst [vmem:[%s2788_s20 + $0xb58] sm:$0xff] %v1594_v4  ;;  %v1597_v13 = vadd.f32 %v1085_v11, %v573_v10  ;;  %v1086_v14 = vld [vmem:[%s2773_s29 + $0xb78] sm:$0xff]  ;;  %v1087_v16 = vld [vmem:[%s2773_s29 + $0xb80] sm:$0xff]  ;;  %2107 = vst [vmem:[%s2788_s20 + $0xb60] sm:$0xff] %v1595_v8 }
 0x171   : > { %2108 = vst [vmem:[%s2788_s20 + $0xb68] sm:$0xff] %v1596_v9  ;;  %v1598_v17 = vadd.f32 %v1086_v14, %v574_v12  ;;  %v1599_v18 = vadd.f32 %v1087_v16, %v575_v15  ;;  %v576_v19 = vld [vmem:[%s2766_s3 + $0xb88] sm:$0xff]  ;;  %v577_v21 = vld [vmem:[%s2766_s3 + $0xb90] sm:$0xff]  ;;  %v578_v24 = vld [vmem:[%s2766_s3 + $0xb98] sm:$0xff] }
 0x172   : > { %v1088_v20 = vld [vmem:[%s2773_s29 + $0xb88] sm:$0xff]  ;;  %2109 = vst [vmem:[%s2788_s20 + $0xb70] sm:$0xff] %v1597_v13  ;;  %v1089_v23 = vld [vmem:[%s2773_s29 + $0xb90] sm:$0xff]  ;;  %v1090_v25 = vld [vmem:[%s2773_s29 + $0xb98] sm:$0xff] }
 0x173   : > { %v1600_v22 = vadd.f32 %v1088_v20, %v576_v19  ;;  %2110 = vst [vmem:[%s2788_s20 + $0xb78] sm:$0xff] %v1598_v17  ;;  %2111 = vst [vmem:[%s2788_s20 + $0xb80] sm:$0xff] %v1599_v18  ;;  %v1601_v26 = vadd.f32 %v1089_v23, %v577_v21  ;;  %v1602_v27 = vadd.f32 %v1090_v25, %v578_v24  ;;  %v579_v28 = vld [vmem:[%s2766_s3 + $0xba0] sm:$0xff]  ;;  %v580_v30 = vld [vmem:[%s2766_s3 + $0xba8] sm:$0xff] }
 0x174   : > { %v1091_v29 = vld [vmem:[%s2773_s29 + $0xba0] sm:$0xff]  ;;  %v1092_v32 = vld [vmem:[%s2773_s29 + $0xba8] sm:$0xff]  ;;  %v581_v33 = vld [vmem:[%s2766_s3 + $0xbb0] sm:$0xff] }
 0x175   : > { %2112 = vst [vmem:[%s2788_s20 + $0xb88] sm:$0xff] %v1600_v22  ;;  %v1603_v31 = vadd.f32 %v1091_v29, %v579_v28  ;;  %v1093_v34 = vld [vmem:[%s2773_s29 + $0xbb0] sm:$0xff]  ;;  %2113 = vst [vmem:[%s2788_s20 + $0xb90] sm:$0xff] %v1601_v26  ;;  %v1604_v35 = vadd.f32 %v1092_v32, %v580_v30  ;;  %v582_v37 = vld [vmem:[%s2766_s3 + $0xbb8] sm:$0xff] }
 0x176   : > { %2114 = vst [vmem:[%s2788_s20 + $0xb98] sm:$0xff] %v1602_v27  ;;  %v1605_v36 = vadd.f32 %v1093_v34, %v581_v33  ;;  %v1094_v38 = vld [vmem:[%s2773_s29 + $0xbb8] sm:$0xff]  ;;  %v583_v39 = vld [vmem:[%s2766_s3 + $0xbc0] sm:$0xff]  ;;  %v584_v42 = vld [vmem:[%s2766_s3 + $0xbc8] sm:$0xff] }
 0x177   : > { %2115 = vst [vmem:[%s2788_s20 + $0xba0] sm:$0xff] %v1603_v31  ;;  %v1606_v40 = vadd.f32 %v1094_v38, %v582_v37  ;;  %v1095_v41 = vld [vmem:[%s2773_s29 + $0xbc0] sm:$0xff]  ;;  %v1096_v43 = vld [vmem:[%s2773_s29 + $0xbc8] sm:$0xff]  ;;  %2116 = vst [vmem:[%s2788_s20 + $0xba8] sm:$0xff] %v1604_v35 }
 0x178   : > { %2117 = vst [vmem:[%s2788_s20 + $0xbb0] sm:$0xff] %v1605_v36  ;;  %v1607_v44 = vadd.f32 %v1095_v41, %v583_v39  ;;  %v1608_v45 = vadd.f32 %v1096_v43, %v584_v42  ;;  %v585_v46 = vld [vmem:[%s2766_s3 + $0xbd0] sm:$0xff]  ;;  %v586_v48 = vld [vmem:[%s2766_s3 + $0xbd8] sm:$0xff]  ;;  %v587_v51 = vld [vmem:[%s2766_s3 + $0xbe0] sm:$0xff] }
 0x179   : > { %v1097_v47 = vld [vmem:[%s2773_s29 + $0xbd0] sm:$0xff]  ;;  %2118 = vst [vmem:[%s2788_s20 + $0xbb8] sm:$0xff] %v1606_v40  ;;  %v1098_v50 = vld [vmem:[%s2773_s29 + $0xbd8] sm:$0xff]  ;;  %v1099_v52 = vld [vmem:[%s2773_s29 + $0xbe0] sm:$0xff] }
 0x17a   : > { %v1609_v49 = vadd.f32 %v1097_v47, %v585_v46  ;;  %2119 = vst [vmem:[%s2788_s20 + $0xbc0] sm:$0xff] %v1607_v44  ;;  %2120 = vst [vmem:[%s2788_s20 + $0xbc8] sm:$0xff] %v1608_v45  ;;  %v1610_v53 = vadd.f32 %v1098_v50, %v586_v48  ;;  %v1611_v54 = vadd.f32 %v1099_v52, %v587_v51  ;;  %v588_v55 = vld [vmem:[%s2766_s3 + $0xbe8] sm:$0xff]  ;;  %v589_v57 = vld [vmem:[%s2766_s3 + $0xbf0] sm:$0xff] }
 0x17b   : > { %v1100_v56 = vld [vmem:[%s2773_s29 + $0xbe8] sm:$0xff]  ;;  %v1101_v59 = vld [vmem:[%s2773_s29 + $0xbf0] sm:$0xff]  ;;  %v590_v60 = vld [vmem:[%s2766_s3 + $0xbf8] sm:$0xff] }
 0x17c   : > { %2121 = vst [vmem:[%s2788_s20 + $0xbd0] sm:$0xff] %v1609_v49  ;;  %v1612_v58 = vadd.f32 %v1100_v56, %v588_v55  ;;  %v1102_v61 = vld [vmem:[%s2773_s29 + $0xbf8] sm:$0xff]  ;;  %2122 = vst [vmem:[%s2788_s20 + $0xbd8] sm:$0xff] %v1610_v53  ;;  %v1613_v62 = vadd.f32 %v1101_v59, %v589_v57  ;;  %v591_v0 = vld [vmem:[%s2766_s3 + $0xc00] sm:$0xff] }
 0x17d   : > { %2123 = vst [vmem:[%s2788_s20 + $0xbe0] sm:$0xff] %v1611_v54  ;;  %v1614_v63 = vadd.f32 %v1102_v61, %v590_v60  ;;  %v1103_v1 = vld [vmem:[%s2773_s29 + $0xc00] sm:$0xff]  ;;  %v592_v2 = vld [vmem:[%s2766_s3 + $0xc08] sm:$0xff]  ;;  %v593_v5 = vld [vmem:[%s2766_s3 + $0xc10] sm:$0xff] }
 0x17e   : > { %2124 = vst [vmem:[%s2788_s20 + $0xbe8] sm:$0xff] %v1612_v58  ;;  %v1615_v3 = vadd.f32 %v1103_v1, %v591_v0  ;;  %v1104_v4 = vld [vmem:[%s2773_s29 + $0xc08] sm:$0xff]  ;;  %v1105_v6 = vld [vmem:[%s2773_s29 + $0xc10] sm:$0xff]  ;;  %2125 = vst [vmem:[%s2788_s20 + $0xbf0] sm:$0xff] %v1613_v62 }
 0x17f   : > { %2126 = vst [vmem:[%s2788_s20 + $0xbf8] sm:$0xff] %v1614_v63  ;;  %v1616_v7 = vadd.f32 %v1104_v4, %v592_v2  ;;  %v1617_v8 = vadd.f32 %v1105_v6, %v593_v5  ;;  %v594_v9 = vld [vmem:[%s2766_s3 + $0xc18] sm:$0xff]  ;;  %v595_v11 = vld [vmem:[%s2766_s3 + $0xc20] sm:$0xff]  ;;  %v596_v14 = vld [vmem:[%s2766_s3 + $0xc28] sm:$0xff] }
 0x180   : > { %v1106_v10 = vld [vmem:[%s2773_s29 + $0xc18] sm:$0xff]  ;;  %2127 = vst [vmem:[%s2788_s20 + $0xc00] sm:$0xff] %v1615_v3  ;;  %v1107_v13 = vld [vmem:[%s2773_s29 + $0xc20] sm:$0xff]  ;;  %v1108_v15 = vld [vmem:[%s2773_s29 + $0xc28] sm:$0xff] }
 0x181   : > { %v1618_v12 = vadd.f32 %v1106_v10, %v594_v9  ;;  %2128 = vst [vmem:[%s2788_s20 + $0xc08] sm:$0xff] %v1616_v7  ;;  %2129 = vst [vmem:[%s2788_s20 + $0xc10] sm:$0xff] %v1617_v8  ;;  %v1619_v16 = vadd.f32 %v1107_v13, %v595_v11  ;;  %v1620_v17 = vadd.f32 %v1108_v15, %v596_v14  ;;  %v597_v18 = vld [vmem:[%s2766_s3 + $0xc30] sm:$0xff]  ;;  %v598_v20 = vld [vmem:[%s2766_s3 + $0xc38] sm:$0xff] }
 0x182   : > { %v1109_v19 = vld [vmem:[%s2773_s29 + $0xc30] sm:$0xff]  ;;  %v1110_v22 = vld [vmem:[%s2773_s29 + $0xc38] sm:$0xff]  ;;  %v599_v23 = vld [vmem:[%s2766_s3 + $0xc40] sm:$0xff] }
 0x183   : > { %2130 = vst [vmem:[%s2788_s20 + $0xc18] sm:$0xff] %v1618_v12  ;;  %v1621_v21 = vadd.f32 %v1109_v19, %v597_v18  ;;  %v1111_v24 = vld [vmem:[%s2773_s29 + $0xc40] sm:$0xff]  ;;  %2131 = vst [vmem:[%s2788_s20 + $0xc20] sm:$0xff] %v1619_v16  ;;  %v1622_v25 = vadd.f32 %v1110_v22, %v598_v20  ;;  %v600_v27 = vld [vmem:[%s2766_s3 + $0xc48] sm:$0xff] }
 0x184   : > { %2132 = vst [vmem:[%s2788_s20 + $0xc28] sm:$0xff] %v1620_v17  ;;  %v1623_v26 = vadd.f32 %v1111_v24, %v599_v23  ;;  %v1112_v28 = vld [vmem:[%s2773_s29 + $0xc48] sm:$0xff]  ;;  %v601_v29 = vld [vmem:[%s2766_s3 + $0xc50] sm:$0xff]  ;;  %v602_v32 = vld [vmem:[%s2766_s3 + $0xc58] sm:$0xff] }
 0x185   : > { %2133 = vst [vmem:[%s2788_s20 + $0xc30] sm:$0xff] %v1621_v21  ;;  %v1624_v30 = vadd.f32 %v1112_v28, %v600_v27  ;;  %v1113_v31 = vld [vmem:[%s2773_s29 + $0xc50] sm:$0xff]  ;;  %v1114_v33 = vld [vmem:[%s2773_s29 + $0xc58] sm:$0xff]  ;;  %2134 = vst [vmem:[%s2788_s20 + $0xc38] sm:$0xff] %v1622_v25 }
 0x186   : > { %2135 = vst [vmem:[%s2788_s20 + $0xc40] sm:$0xff] %v1623_v26  ;;  %v1625_v34 = vadd.f32 %v1113_v31, %v601_v29  ;;  %v1626_v35 = vadd.f32 %v1114_v33, %v602_v32  ;;  %v603_v36 = vld [vmem:[%s2766_s3 + $0xc60] sm:$0xff]  ;;  %v604_v38 = vld [vmem:[%s2766_s3 + $0xc68] sm:$0xff]  ;;  %v605_v41 = vld [vmem:[%s2766_s3 + $0xc70] sm:$0xff] }
 0x187   : > { %v1115_v37 = vld [vmem:[%s2773_s29 + $0xc60] sm:$0xff]  ;;  %2136 = vst [vmem:[%s2788_s20 + $0xc48] sm:$0xff] %v1624_v30  ;;  %v1116_v40 = vld [vmem:[%s2773_s29 + $0xc68] sm:$0xff]  ;;  %v1117_v42 = vld [vmem:[%s2773_s29 + $0xc70] sm:$0xff] }
 0x188   : > { %v1627_v39 = vadd.f32 %v1115_v37, %v603_v36  ;;  %2137 = vst [vmem:[%s2788_s20 + $0xc50] sm:$0xff] %v1625_v34  ;;  %2138 = vst [vmem:[%s2788_s20 + $0xc58] sm:$0xff] %v1626_v35  ;;  %v1628_v43 = vadd.f32 %v1116_v40, %v604_v38  ;;  %v1629_v44 = vadd.f32 %v1117_v42, %v605_v41  ;;  %v606_v45 = vld [vmem:[%s2766_s3 + $0xc78] sm:$0xff]  ;;  %v607_v47 = vld [vmem:[%s2766_s3 + $0xc80] sm:$0xff] }
 0x189   : > { %v1118_v46 = vld [vmem:[%s2773_s29 + $0xc78] sm:$0xff]  ;;  %v1119_v49 = vld [vmem:[%s2773_s29 + $0xc80] sm:$0xff]  ;;  %v608_v50 = vld [vmem:[%s2766_s3 + $0xc88] sm:$0xff] }
 0x18a   : > { %2139 = vst [vmem:[%s2788_s20 + $0xc60] sm:$0xff] %v1627_v39  ;;  %v1630_v48 = vadd.f32 %v1118_v46, %v606_v45  ;;  %v1120_v51 = vld [vmem:[%s2773_s29 + $0xc88] sm:$0xff]  ;;  %2140 = vst [vmem:[%s2788_s20 + $0xc68] sm:$0xff] %v1628_v43  ;;  %v1631_v52 = vadd.f32 %v1119_v49, %v607_v47  ;;  %v609_v54 = vld [vmem:[%s2766_s3 + $0xc90] sm:$0xff] }
 0x18b   : > { %2141 = vst [vmem:[%s2788_s20 + $0xc70] sm:$0xff] %v1629_v44  ;;  %v1632_v53 = vadd.f32 %v1120_v51, %v608_v50  ;;  %v1121_v55 = vld [vmem:[%s2773_s29 + $0xc90] sm:$0xff]  ;;  %v610_v56 = vld [vmem:[%s2766_s3 + $0xc98] sm:$0xff]  ;;  %v611_v59 = vld [vmem:[%s2766_s3 + $0xca0] sm:$0xff] }
 0x18c   : > { %2142 = vst [vmem:[%s2788_s20 + $0xc78] sm:$0xff] %v1630_v48  ;;  %v1633_v57 = vadd.f32 %v1121_v55, %v609_v54  ;;  %v1122_v58 = vld [vmem:[%s2773_s29 + $0xc98] sm:$0xff]  ;;  %v1123_v60 = vld [vmem:[%s2773_s29 + $0xca0] sm:$0xff]  ;;  %2143 = vst [vmem:[%s2788_s20 + $0xc80] sm:$0xff] %v1631_v52 }
 0x18d   : > { %2144 = vst [vmem:[%s2788_s20 + $0xc88] sm:$0xff] %v1632_v53  ;;  %v1634_v61 = vadd.f32 %v1122_v58, %v610_v56  ;;  %v1635_v62 = vadd.f32 %v1123_v60, %v611_v59  ;;  %v612_v63 = vld [vmem:[%s2766_s3 + $0xca8] sm:$0xff]  ;;  %v613_v1 = vld [vmem:[%s2766_s3 + $0xcb0] sm:$0xff]  ;;  %v614_v4 = vld [vmem:[%s2766_s3 + $0xcb8] sm:$0xff] }
 0x18e   : > { %v1124_v0 = vld [vmem:[%s2773_s29 + $0xca8] sm:$0xff]  ;;  %2145 = vst [vmem:[%s2788_s20 + $0xc90] sm:$0xff] %v1633_v57  ;;  %v1125_v3 = vld [vmem:[%s2773_s29 + $0xcb0] sm:$0xff]  ;;  %v1126_v5 = vld [vmem:[%s2773_s29 + $0xcb8] sm:$0xff] }
 0x18f   : > { %v1636_v2 = vadd.f32 %v1124_v0, %v612_v63  ;;  %2146 = vst [vmem:[%s2788_s20 + $0xc98] sm:$0xff] %v1634_v61  ;;  %2147 = vst [vmem:[%s2788_s20 + $0xca0] sm:$0xff] %v1635_v62  ;;  %v1637_v6 = vadd.f32 %v1125_v3, %v613_v1  ;;  %v1638_v7 = vadd.f32 %v1126_v5, %v614_v4  ;;  %v615_v8 = vld [vmem:[%s2766_s3 + $0xcc0] sm:$0xff]  ;;  %v616_v10 = vld [vmem:[%s2766_s3 + $0xcc8] sm:$0xff] }
 0x190   : > { %v1127_v9 = vld [vmem:[%s2773_s29 + $0xcc0] sm:$0xff]  ;;  %v1128_v12 = vld [vmem:[%s2773_s29 + $0xcc8] sm:$0xff]  ;;  %v617_v13 = vld [vmem:[%s2766_s3 + $0xcd0] sm:$0xff] }
 0x191   : > { %2148 = vst [vmem:[%s2788_s20 + $0xca8] sm:$0xff] %v1636_v2  ;;  %v1639_v11 = vadd.f32 %v1127_v9, %v615_v8  ;;  %v1129_v14 = vld [vmem:[%s2773_s29 + $0xcd0] sm:$0xff]  ;;  %2149 = vst [vmem:[%s2788_s20 + $0xcb0] sm:$0xff] %v1637_v6  ;;  %v1640_v15 = vadd.f32 %v1128_v12, %v616_v10  ;;  %v618_v17 = vld [vmem:[%s2766_s3 + $0xcd8] sm:$0xff] }
 0x192   : > { %2150 = vst [vmem:[%s2788_s20 + $0xcb8] sm:$0xff] %v1638_v7  ;;  %v1641_v16 = vadd.f32 %v1129_v14, %v617_v13  ;;  %v1130_v18 = vld [vmem:[%s2773_s29 + $0xcd8] sm:$0xff]  ;;  %v619_v19 = vld [vmem:[%s2766_s3 + $0xce0] sm:$0xff]  ;;  %v620_v22 = vld [vmem:[%s2766_s3 + $0xce8] sm:$0xff] }
 0x193   : > { %2151 = vst [vmem:[%s2788_s20 + $0xcc0] sm:$0xff] %v1639_v11  ;;  %v1642_v20 = vadd.f32 %v1130_v18, %v618_v17  ;;  %v1131_v21 = vld [vmem:[%s2773_s29 + $0xce0] sm:$0xff]  ;;  %v1132_v23 = vld [vmem:[%s2773_s29 + $0xce8] sm:$0xff]  ;;  %2152 = vst [vmem:[%s2788_s20 + $0xcc8] sm:$0xff] %v1640_v15 }
 0x194   : > { %2153 = vst [vmem:[%s2788_s20 + $0xcd0] sm:$0xff] %v1641_v16  ;;  %v1643_v24 = vadd.f32 %v1131_v21, %v619_v19  ;;  %v1644_v25 = vadd.f32 %v1132_v23, %v620_v22  ;;  %v621_v26 = vld [vmem:[%s2766_s3 + $0xcf0] sm:$0xff]  ;;  %v622_v28 = vld [vmem:[%s2766_s3 + $0xcf8] sm:$0xff]  ;;  %v623_v31 = vld [vmem:[%s2766_s3 + $0xd00] sm:$0xff] }
 0x195   : > { %v1133_v27 = vld [vmem:[%s2773_s29 + $0xcf0] sm:$0xff]  ;;  %2154 = vst [vmem:[%s2788_s20 + $0xcd8] sm:$0xff] %v1642_v20  ;;  %v1134_v30 = vld [vmem:[%s2773_s29 + $0xcf8] sm:$0xff]  ;;  %v1135_v32 = vld [vmem:[%s2773_s29 + $0xd00] sm:$0xff] }
 0x196   : > { %v1645_v29 = vadd.f32 %v1133_v27, %v621_v26  ;;  %2155 = vst [vmem:[%s2788_s20 + $0xce0] sm:$0xff] %v1643_v24  ;;  %2156 = vst [vmem:[%s2788_s20 + $0xce8] sm:$0xff] %v1644_v25  ;;  %v1646_v33 = vadd.f32 %v1134_v30, %v622_v28  ;;  %v1647_v34 = vadd.f32 %v1135_v32, %v623_v31  ;;  %v624_v35 = vld [vmem:[%s2766_s3 + $0xd08] sm:$0xff]  ;;  %v625_v37 = vld [vmem:[%s2766_s3 + $0xd10] sm:$0xff] }
 0x197   : > { %v1136_v36 = vld [vmem:[%s2773_s29 + $0xd08] sm:$0xff]  ;;  %v1137_v39 = vld [vmem:[%s2773_s29 + $0xd10] sm:$0xff]  ;;  %v626_v40 = vld [vmem:[%s2766_s3 + $0xd18] sm:$0xff] }
 0x198   : > { %2157 = vst [vmem:[%s2788_s20 + $0xcf0] sm:$0xff] %v1645_v29  ;;  %v1648_v38 = vadd.f32 %v1136_v36, %v624_v35  ;;  %v1138_v41 = vld [vmem:[%s2773_s29 + $0xd18] sm:$0xff]  ;;  %2158 = vst [vmem:[%s2788_s20 + $0xcf8] sm:$0xff] %v1646_v33  ;;  %v1649_v42 = vadd.f32 %v1137_v39, %v625_v37  ;;  %v627_v44 = vld [vmem:[%s2766_s3 + $0xd20] sm:$0xff] }
 0x199   : > { %2159 = vst [vmem:[%s2788_s20 + $0xd00] sm:$0xff] %v1647_v34  ;;  %v1650_v43 = vadd.f32 %v1138_v41, %v626_v40  ;;  %v1139_v45 = vld [vmem:[%s2773_s29 + $0xd20] sm:$0xff]  ;;  %v628_v46 = vld [vmem:[%s2766_s3 + $0xd28] sm:$0xff]  ;;  %v629_v49 = vld [vmem:[%s2766_s3 + $0xd30] sm:$0xff] }
 0x19a   : > { %2160 = vst [vmem:[%s2788_s20 + $0xd08] sm:$0xff] %v1648_v38  ;;  %v1651_v47 = vadd.f32 %v1139_v45, %v627_v44  ;;  %v1140_v48 = vld [vmem:[%s2773_s29 + $0xd28] sm:$0xff]  ;;  %v1141_v50 = vld [vmem:[%s2773_s29 + $0xd30] sm:$0xff]  ;;  %2161 = vst [vmem:[%s2788_s20 + $0xd10] sm:$0xff] %v1649_v42 }
 0x19b   : > { %2162 = vst [vmem:[%s2788_s20 + $0xd18] sm:$0xff] %v1650_v43  ;;  %v1652_v51 = vadd.f32 %v1140_v48, %v628_v46  ;;  %v1653_v52 = vadd.f32 %v1141_v50, %v629_v49  ;;  %v630_v53 = vld [vmem:[%s2766_s3 + $0xd38] sm:$0xff]  ;;  %v631_v55 = vld [vmem:[%s2766_s3 + $0xd40] sm:$0xff]  ;;  %v632_v58 = vld [vmem:[%s2766_s3 + $0xd48] sm:$0xff] }
 0x19c   : > { %v1142_v54 = vld [vmem:[%s2773_s29 + $0xd38] sm:$0xff]  ;;  %2163 = vst [vmem:[%s2788_s20 + $0xd20] sm:$0xff] %v1651_v47  ;;  %v1143_v57 = vld [vmem:[%s2773_s29 + $0xd40] sm:$0xff]  ;;  %v1144_v59 = vld [vmem:[%s2773_s29 + $0xd48] sm:$0xff] }
 0x19d   : > { %v1654_v56 = vadd.f32 %v1142_v54, %v630_v53  ;;  %2164 = vst [vmem:[%s2788_s20 + $0xd28] sm:$0xff] %v1652_v51  ;;  %2165 = vst [vmem:[%s2788_s20 + $0xd30] sm:$0xff] %v1653_v52  ;;  %v1655_v60 = vadd.f32 %v1143_v57, %v631_v55  ;;  %v1656_v61 = vadd.f32 %v1144_v59, %v632_v58  ;;  %v633_v62 = vld [vmem:[%s2766_s3 + $0xd50] sm:$0xff]  ;;  %v634_v0 = vld [vmem:[%s2766_s3 + $0xd58] sm:$0xff] }
 0x19e   : > { %v1145_v63 = vld [vmem:[%s2773_s29 + $0xd50] sm:$0xff]  ;;  %v1146_v2 = vld [vmem:[%s2773_s29 + $0xd58] sm:$0xff]  ;;  %v635_v3 = vld [vmem:[%s2766_s3 + $0xd60] sm:$0xff] }
 0x19f   : > { %2166 = vst [vmem:[%s2788_s20 + $0xd38] sm:$0xff] %v1654_v56  ;;  %v1657_v1 = vadd.f32 %v1145_v63, %v633_v62  ;;  %v1147_v4 = vld [vmem:[%s2773_s29 + $0xd60] sm:$0xff]  ;;  %2167 = vst [vmem:[%s2788_s20 + $0xd40] sm:$0xff] %v1655_v60  ;;  %v1658_v5 = vadd.f32 %v1146_v2, %v634_v0  ;;  %v636_v7 = vld [vmem:[%s2766_s3 + $0xd68] sm:$0xff] }
 0x1a0   : > { %2168 = vst [vmem:[%s2788_s20 + $0xd48] sm:$0xff] %v1656_v61  ;;  %v1659_v6 = vadd.f32 %v1147_v4, %v635_v3  ;;  %v1148_v8 = vld [vmem:[%s2773_s29 + $0xd68] sm:$0xff]  ;;  %v637_v9 = vld [vmem:[%s2766_s3 + $0xd70] sm:$0xff]  ;;  %v638_v12 = vld [vmem:[%s2766_s3 + $0xd78] sm:$0xff] }
 0x1a1   : > { %2169 = vst [vmem:[%s2788_s20 + $0xd50] sm:$0xff] %v1657_v1  ;;  %v1660_v10 = vadd.f32 %v1148_v8, %v636_v7  ;;  %v1149_v11 = vld [vmem:[%s2773_s29 + $0xd70] sm:$0xff]  ;;  %v1150_v13 = vld [vmem:[%s2773_s29 + $0xd78] sm:$0xff]  ;;  %2170 = vst [vmem:[%s2788_s20 + $0xd58] sm:$0xff] %v1658_v5 }
 0x1a2   : > { %2171 = vst [vmem:[%s2788_s20 + $0xd60] sm:$0xff] %v1659_v6  ;;  %v1661_v14 = vadd.f32 %v1149_v11, %v637_v9  ;;  %v1662_v15 = vadd.f32 %v1150_v13, %v638_v12  ;;  %v639_v16 = vld [vmem:[%s2766_s3 + $0xd80] sm:$0xff]  ;;  %v640_v18 = vld [vmem:[%s2766_s3 + $0xd88] sm:$0xff]  ;;  %v641_v21 = vld [vmem:[%s2766_s3 + $0xd90] sm:$0xff] }
 0x1a3   : > { %v1151_v17 = vld [vmem:[%s2773_s29 + $0xd80] sm:$0xff]  ;;  %2172 = vst [vmem:[%s2788_s20 + $0xd68] sm:$0xff] %v1660_v10  ;;  %v1152_v20 = vld [vmem:[%s2773_s29 + $0xd88] sm:$0xff]  ;;  %v1153_v22 = vld [vmem:[%s2773_s29 + $0xd90] sm:$0xff] }
 0x1a4   : > { %v1663_v19 = vadd.f32 %v1151_v17, %v639_v16  ;;  %2173 = vst [vmem:[%s2788_s20 + $0xd70] sm:$0xff] %v1661_v14  ;;  %2174 = vst [vmem:[%s2788_s20 + $0xd78] sm:$0xff] %v1662_v15  ;;  %v1664_v23 = vadd.f32 %v1152_v20, %v640_v18  ;;  %v1665_v24 = vadd.f32 %v1153_v22, %v641_v21  ;;  %v642_v25 = vld [vmem:[%s2766_s3 + $0xd98] sm:$0xff]  ;;  %v643_v27 = vld [vmem:[%s2766_s3 + $0xda0] sm:$0xff] }
 0x1a5   : > { %v1154_v26 = vld [vmem:[%s2773_s29 + $0xd98] sm:$0xff]  ;;  %v1155_v29 = vld [vmem:[%s2773_s29 + $0xda0] sm:$0xff]  ;;  %v644_v30 = vld [vmem:[%s2766_s3 + $0xda8] sm:$0xff] }
 0x1a6   : > { %2175 = vst [vmem:[%s2788_s20 + $0xd80] sm:$0xff] %v1663_v19  ;;  %v1666_v28 = vadd.f32 %v1154_v26, %v642_v25  ;;  %v1156_v31 = vld [vmem:[%s2773_s29 + $0xda8] sm:$0xff]  ;;  %2176 = vst [vmem:[%s2788_s20 + $0xd88] sm:$0xff] %v1664_v23  ;;  %v1667_v32 = vadd.f32 %v1155_v29, %v643_v27  ;;  %v645_v34 = vld [vmem:[%s2766_s3 + $0xdb0] sm:$0xff] }
 0x1a7   : > { %2177 = vst [vmem:[%s2788_s20 + $0xd90] sm:$0xff] %v1665_v24  ;;  %v1668_v33 = vadd.f32 %v1156_v31, %v644_v30  ;;  %v1157_v35 = vld [vmem:[%s2773_s29 + $0xdb0] sm:$0xff]  ;;  %v646_v36 = vld [vmem:[%s2766_s3 + $0xdb8] sm:$0xff]  ;;  %v647_v39 = vld [vmem:[%s2766_s3 + $0xdc0] sm:$0xff] }
 0x1a8   : > { %2178 = vst [vmem:[%s2788_s20 + $0xd98] sm:$0xff] %v1666_v28  ;;  %v1669_v37 = vadd.f32 %v1157_v35, %v645_v34  ;;  %v1158_v38 = vld [vmem:[%s2773_s29 + $0xdb8] sm:$0xff]  ;;  %v1159_v40 = vld [vmem:[%s2773_s29 + $0xdc0] sm:$0xff]  ;;  %2179 = vst [vmem:[%s2788_s20 + $0xda0] sm:$0xff] %v1667_v32 }
 0x1a9   : > { %2180 = vst [vmem:[%s2788_s20 + $0xda8] sm:$0xff] %v1668_v33  ;;  %v1670_v41 = vadd.f32 %v1158_v38, %v646_v36  ;;  %v1671_v42 = vadd.f32 %v1159_v40, %v647_v39  ;;  %v648_v43 = vld [vmem:[%s2766_s3 + $0xdc8] sm:$0xff]  ;;  %v649_v45 = vld [vmem:[%s2766_s3 + $0xdd0] sm:$0xff]  ;;  %v650_v48 = vld [vmem:[%s2766_s3 + $0xdd8] sm:$0xff] }
 0x1aa   : > { %v1160_v44 = vld [vmem:[%s2773_s29 + $0xdc8] sm:$0xff]  ;;  %2181 = vst [vmem:[%s2788_s20 + $0xdb0] sm:$0xff] %v1669_v37  ;;  %v1161_v47 = vld [vmem:[%s2773_s29 + $0xdd0] sm:$0xff]  ;;  %v1162_v49 = vld [vmem:[%s2773_s29 + $0xdd8] sm:$0xff] }
 0x1ab   : > { %v1672_v46 = vadd.f32 %v1160_v44, %v648_v43  ;;  %2182 = vst [vmem:[%s2788_s20 + $0xdb8] sm:$0xff] %v1670_v41  ;;  %2183 = vst [vmem:[%s2788_s20 + $0xdc0] sm:$0xff] %v1671_v42  ;;  %v1673_v50 = vadd.f32 %v1161_v47, %v649_v45  ;;  %v1674_v51 = vadd.f32 %v1162_v49, %v650_v48  ;;  %v651_v52 = vld [vmem:[%s2766_s3 + $0xde0] sm:$0xff]  ;;  %v652_v54 = vld [vmem:[%s2766_s3 + $0xde8] sm:$0xff] }
 0x1ac   : > { %v1163_v53 = vld [vmem:[%s2773_s29 + $0xde0] sm:$0xff]  ;;  %v1164_v56 = vld [vmem:[%s2773_s29 + $0xde8] sm:$0xff]  ;;  %v653_v57 = vld [vmem:[%s2766_s3 + $0xdf0] sm:$0xff] }
 0x1ad   : > { %2184 = vst [vmem:[%s2788_s20 + $0xdc8] sm:$0xff] %v1672_v46  ;;  %v1675_v55 = vadd.f32 %v1163_v53, %v651_v52  ;;  %v1165_v58 = vld [vmem:[%s2773_s29 + $0xdf0] sm:$0xff]  ;;  %2185 = vst [vmem:[%s2788_s20 + $0xdd0] sm:$0xff] %v1673_v50  ;;  %v1676_v59 = vadd.f32 %v1164_v56, %v652_v54  ;;  %v654_v61 = vld [vmem:[%s2766_s3 + $0xdf8] sm:$0xff] }
 0x1ae   : > { %2186 = vst [vmem:[%s2788_s20 + $0xdd8] sm:$0xff] %v1674_v51  ;;  %v1677_v60 = vadd.f32 %v1165_v58, %v653_v57  ;;  %v1166_v62 = vld [vmem:[%s2773_s29 + $0xdf8] sm:$0xff]  ;;  %v655_v63 = vld [vmem:[%s2766_s3 + $0xe00] sm:$0xff]  ;;  %v656_v2 = vld [vmem:[%s2766_s3 + $0xe08] sm:$0xff] }
 0x1af   : > { %2187 = vst [vmem:[%s2788_s20 + $0xde0] sm:$0xff] %v1675_v55  ;;  %v1678_v0 = vadd.f32 %v1166_v62, %v654_v61  ;;  %v1167_v1 = vld [vmem:[%s2773_s29 + $0xe00] sm:$0xff]  ;;  %v1168_v3 = vld [vmem:[%s2773_s29 + $0xe08] sm:$0xff]  ;;  %2188 = vst [vmem:[%s2788_s20 + $0xde8] sm:$0xff] %v1676_v59 }
 0x1b0   : > { %2189 = vst [vmem:[%s2788_s20 + $0xdf0] sm:$0xff] %v1677_v60  ;;  %v1679_v4 = vadd.f32 %v1167_v1, %v655_v63  ;;  %v1680_v5 = vadd.f32 %v1168_v3, %v656_v2  ;;  %v657_v6 = vld [vmem:[%s2766_s3 + $0xe10] sm:$0xff]  ;;  %v658_v8 = vld [vmem:[%s2766_s3 + $0xe18] sm:$0xff]  ;;  %v659_v11 = vld [vmem:[%s2766_s3 + $0xe20] sm:$0xff] }
 0x1b1   : > { %v1169_v7 = vld [vmem:[%s2773_s29 + $0xe10] sm:$0xff]  ;;  %2190 = vst [vmem:[%s2788_s20 + $0xdf8] sm:$0xff] %v1678_v0  ;;  %v1170_v10 = vld [vmem:[%s2773_s29 + $0xe18] sm:$0xff]  ;;  %v1171_v12 = vld [vmem:[%s2773_s29 + $0xe20] sm:$0xff] }
 0x1b2   : > { %v1681_v9 = vadd.f32 %v1169_v7, %v657_v6  ;;  %2191 = vst [vmem:[%s2788_s20 + $0xe00] sm:$0xff] %v1679_v4  ;;  %2192 = vst [vmem:[%s2788_s20 + $0xe08] sm:$0xff] %v1680_v5  ;;  %v1682_v13 = vadd.f32 %v1170_v10, %v658_v8  ;;  %v1683_v14 = vadd.f32 %v1171_v12, %v659_v11  ;;  %v660_v15 = vld [vmem:[%s2766_s3 + $0xe28] sm:$0xff]  ;;  %v661_v17 = vld [vmem:[%s2766_s3 + $0xe30] sm:$0xff] }
 0x1b3   : > { %v1172_v16 = vld [vmem:[%s2773_s29 + $0xe28] sm:$0xff]  ;;  %v1173_v19 = vld [vmem:[%s2773_s29 + $0xe30] sm:$0xff]  ;;  %v662_v20 = vld [vmem:[%s2766_s3 + $0xe38] sm:$0xff] }
 0x1b4   : > { %2193 = vst [vmem:[%s2788_s20 + $0xe10] sm:$0xff] %v1681_v9  ;;  %v1684_v18 = vadd.f32 %v1172_v16, %v660_v15  ;;  %v1174_v21 = vld [vmem:[%s2773_s29 + $0xe38] sm:$0xff]  ;;  %2194 = vst [vmem:[%s2788_s20 + $0xe18] sm:$0xff] %v1682_v13  ;;  %v1685_v22 = vadd.f32 %v1173_v19, %v661_v17  ;;  %v663_v24 = vld [vmem:[%s2766_s3 + $0xe40] sm:$0xff] }
 0x1b5   : > { %2195 = vst [vmem:[%s2788_s20 + $0xe20] sm:$0xff] %v1683_v14  ;;  %v1686_v23 = vadd.f32 %v1174_v21, %v662_v20  ;;  %v1175_v25 = vld [vmem:[%s2773_s29 + $0xe40] sm:$0xff]  ;;  %v664_v26 = vld [vmem:[%s2766_s3 + $0xe48] sm:$0xff]  ;;  %v665_v29 = vld [vmem:[%s2766_s3 + $0xe50] sm:$0xff] }
 0x1b6   : > { %2196 = vst [vmem:[%s2788_s20 + $0xe28] sm:$0xff] %v1684_v18  ;;  %v1687_v27 = vadd.f32 %v1175_v25, %v663_v24  ;;  %v1176_v28 = vld [vmem:[%s2773_s29 + $0xe48] sm:$0xff]  ;;  %v1177_v30 = vld [vmem:[%s2773_s29 + $0xe50] sm:$0xff]  ;;  %2197 = vst [vmem:[%s2788_s20 + $0xe30] sm:$0xff] %v1685_v22 }
 0x1b7   : > { %2198 = vst [vmem:[%s2788_s20 + $0xe38] sm:$0xff] %v1686_v23  ;;  %v1688_v31 = vadd.f32 %v1176_v28, %v664_v26  ;;  %v1689_v32 = vadd.f32 %v1177_v30, %v665_v29  ;;  %v666_v33 = vld [vmem:[%s2766_s3 + $0xe58] sm:$0xff]  ;;  %v667_v35 = vld [vmem:[%s2766_s3 + $0xe60] sm:$0xff]  ;;  %v668_v38 = vld [vmem:[%s2766_s3 + $0xe68] sm:$0xff] }
 0x1b8   : > { %v1178_v34 = vld [vmem:[%s2773_s29 + $0xe58] sm:$0xff]  ;;  %2199 = vst [vmem:[%s2788_s20 + $0xe40] sm:$0xff] %v1687_v27  ;;  %v1179_v37 = vld [vmem:[%s2773_s29 + $0xe60] sm:$0xff]  ;;  %v1180_v39 = vld [vmem:[%s2773_s29 + $0xe68] sm:$0xff] }
 0x1b9   : > { %v1690_v36 = vadd.f32 %v1178_v34, %v666_v33  ;;  %2200 = vst [vmem:[%s2788_s20 + $0xe48] sm:$0xff] %v1688_v31  ;;  %2201 = vst [vmem:[%s2788_s20 + $0xe50] sm:$0xff] %v1689_v32  ;;  %v1691_v40 = vadd.f32 %v1179_v37, %v667_v35  ;;  %v1692_v41 = vadd.f32 %v1180_v39, %v668_v38  ;;  %v669_v42 = vld [vmem:[%s2766_s3 + $0xe70] sm:$0xff]  ;;  %v670_v44 = vld [vmem:[%s2766_s3 + $0xe78] sm:$0xff] }
 0x1ba   : > { %v1181_v43 = vld [vmem:[%s2773_s29 + $0xe70] sm:$0xff]  ;;  %v1182_v46 = vld [vmem:[%s2773_s29 + $0xe78] sm:$0xff]  ;;  %v671_v47 = vld [vmem:[%s2766_s3 + $0xe80] sm:$0xff] }
 0x1bb   : > { %2202 = vst [vmem:[%s2788_s20 + $0xe58] sm:$0xff] %v1690_v36  ;;  %v1693_v45 = vadd.f32 %v1181_v43, %v669_v42  ;;  %v1183_v48 = vld [vmem:[%s2773_s29 + $0xe80] sm:$0xff]  ;;  %2203 = vst [vmem:[%s2788_s20 + $0xe60] sm:$0xff] %v1691_v40  ;;  %v1694_v49 = vadd.f32 %v1182_v46, %v670_v44  ;;  %v672_v51 = vld [vmem:[%s2766_s3 + $0xe88] sm:$0xff] }
 0x1bc   : > { %2204 = vst [vmem:[%s2788_s20 + $0xe68] sm:$0xff] %v1692_v41  ;;  %v1695_v50 = vadd.f32 %v1183_v48, %v671_v47  ;;  %v1184_v52 = vld [vmem:[%s2773_s29 + $0xe88] sm:$0xff]  ;;  %v673_v53 = vld [vmem:[%s2766_s3 + $0xe90] sm:$0xff]  ;;  %v674_v56 = vld [vmem:[%s2766_s3 + $0xe98] sm:$0xff] }
 0x1bd   : > { %2205 = vst [vmem:[%s2788_s20 + $0xe70] sm:$0xff] %v1693_v45  ;;  %v1696_v54 = vadd.f32 %v1184_v52, %v672_v51  ;;  %v1185_v55 = vld [vmem:[%s2773_s29 + $0xe90] sm:$0xff]  ;;  %v1186_v57 = vld [vmem:[%s2773_s29 + $0xe98] sm:$0xff]  ;;  %2206 = vst [vmem:[%s2788_s20 + $0xe78] sm:$0xff] %v1694_v49 }
 0x1be   : > { %2207 = vst [vmem:[%s2788_s20 + $0xe80] sm:$0xff] %v1695_v50  ;;  %v1697_v58 = vadd.f32 %v1185_v55, %v673_v53  ;;  %v1698_v59 = vadd.f32 %v1186_v57, %v674_v56  ;;  %v675_v60 = vld [vmem:[%s2766_s3 + $0xea0] sm:$0xff]  ;;  %v676_v62 = vld [vmem:[%s2766_s3 + $0xea8] sm:$0xff]  ;;  %v677_v1 = vld [vmem:[%s2766_s3 + $0xeb0] sm:$0xff] }
 0x1bf   : > { %v1187_v61 = vld [vmem:[%s2773_s29 + $0xea0] sm:$0xff]  ;;  %2208 = vst [vmem:[%s2788_s20 + $0xe88] sm:$0xff] %v1696_v54  ;;  %v1188_v0 = vld [vmem:[%s2773_s29 + $0xea8] sm:$0xff]  ;;  %v1189_v2 = vld [vmem:[%s2773_s29 + $0xeb0] sm:$0xff] }
 0x1c0   : > { %v1699_v63 = vadd.f32 %v1187_v61, %v675_v60  ;;  %2209 = vst [vmem:[%s2788_s20 + $0xe90] sm:$0xff] %v1697_v58  ;;  %2210 = vst [vmem:[%s2788_s20 + $0xe98] sm:$0xff] %v1698_v59  ;;  %v1700_v3 = vadd.f32 %v1188_v0, %v676_v62  ;;  %v1701_v4 = vadd.f32 %v1189_v2, %v677_v1  ;;  %v678_v5 = vld [vmem:[%s2766_s3 + $0xeb8] sm:$0xff]  ;;  %v679_v7 = vld [vmem:[%s2766_s3 + $0xec0] sm:$0xff] }
 0x1c1   : > { %v1190_v6 = vld [vmem:[%s2773_s29 + $0xeb8] sm:$0xff]  ;;  %v1191_v9 = vld [vmem:[%s2773_s29 + $0xec0] sm:$0xff]  ;;  %v680_v10 = vld [vmem:[%s2766_s3 + $0xec8] sm:$0xff] }
 0x1c2   : > { %2211 = vst [vmem:[%s2788_s20 + $0xea0] sm:$0xff] %v1699_v63  ;;  %v1702_v8 = vadd.f32 %v1190_v6, %v678_v5  ;;  %v1192_v11 = vld [vmem:[%s2773_s29 + $0xec8] sm:$0xff]  ;;  %2212 = vst [vmem:[%s2788_s20 + $0xea8] sm:$0xff] %v1700_v3  ;;  %v1703_v12 = vadd.f32 %v1191_v9, %v679_v7  ;;  %v681_v14 = vld [vmem:[%s2766_s3 + $0xed0] sm:$0xff] }
 0x1c3   : > { %2213 = vst [vmem:[%s2788_s20 + $0xeb0] sm:$0xff] %v1701_v4  ;;  %v1704_v13 = vadd.f32 %v1192_v11, %v680_v10  ;;  %v1193_v15 = vld [vmem:[%s2773_s29 + $0xed0] sm:$0xff]  ;;  %v682_v16 = vld [vmem:[%s2766_s3 + $0xed8] sm:$0xff]  ;;  %v683_v19 = vld [vmem:[%s2766_s3 + $0xee0] sm:$0xff] }
 0x1c4   : > { %2214 = vst [vmem:[%s2788_s20 + $0xeb8] sm:$0xff] %v1702_v8  ;;  %v1705_v17 = vadd.f32 %v1193_v15, %v681_v14  ;;  %v1194_v18 = vld [vmem:[%s2773_s29 + $0xed8] sm:$0xff]  ;;  %v1195_v20 = vld [vmem:[%s2773_s29 + $0xee0] sm:$0xff]  ;;  %2215 = vst [vmem:[%s2788_s20 + $0xec0] sm:$0xff] %v1703_v12 }
 0x1c5   : > { %2216 = vst [vmem:[%s2788_s20 + $0xec8] sm:$0xff] %v1704_v13  ;;  %v1706_v21 = vadd.f32 %v1194_v18, %v682_v16  ;;  %v1707_v22 = vadd.f32 %v1195_v20, %v683_v19  ;;  %v684_v23 = vld [vmem:[%s2766_s3 + $0xee8] sm:$0xff]  ;;  %v685_v25 = vld [vmem:[%s2766_s3 + $0xef0] sm:$0xff]  ;;  %v686_v28 = vld [vmem:[%s2766_s3 + $0xef8] sm:$0xff] }
 0x1c6   : > { %v1196_v24 = vld [vmem:[%s2773_s29 + $0xee8] sm:$0xff]  ;;  %2217 = vst [vmem:[%s2788_s20 + $0xed0] sm:$0xff] %v1705_v17  ;;  %v1197_v27 = vld [vmem:[%s2773_s29 + $0xef0] sm:$0xff]  ;;  %v1198_v29 = vld [vmem:[%s2773_s29 + $0xef8] sm:$0xff] }
 0x1c7   : > { %v1708_v26 = vadd.f32 %v1196_v24, %v684_v23  ;;  %2218 = vst [vmem:[%s2788_s20 + $0xed8] sm:$0xff] %v1706_v21  ;;  %2219 = vst [vmem:[%s2788_s20 + $0xee0] sm:$0xff] %v1707_v22  ;;  %v1709_v30 = vadd.f32 %v1197_v27, %v685_v25  ;;  %v1710_v31 = vadd.f32 %v1198_v29, %v686_v28  ;;  %v687_v32 = vld [vmem:[%s2766_s3 + $0xf00] sm:$0xff]  ;;  %v688_v34 = vld [vmem:[%s2766_s3 + $0xf08] sm:$0xff] }
 0x1c8   : > { %v1199_v33 = vld [vmem:[%s2773_s29 + $0xf00] sm:$0xff]  ;;  %v1200_v36 = vld [vmem:[%s2773_s29 + $0xf08] sm:$0xff]  ;;  %v689_v37 = vld [vmem:[%s2766_s3 + $0xf10] sm:$0xff] }
 0x1c9   : > { %2220 = vst [vmem:[%s2788_s20 + $0xee8] sm:$0xff] %v1708_v26  ;;  %v1711_v35 = vadd.f32 %v1199_v33, %v687_v32  ;;  %v1201_v38 = vld [vmem:[%s2773_s29 + $0xf10] sm:$0xff]  ;;  %2221 = vst [vmem:[%s2788_s20 + $0xef0] sm:$0xff] %v1709_v30  ;;  %v1712_v39 = vadd.f32 %v1200_v36, %v688_v34  ;;  %v690_v41 = vld [vmem:[%s2766_s3 + $0xf18] sm:$0xff] }
 0x1ca   : > { %2222 = vst [vmem:[%s2788_s20 + $0xef8] sm:$0xff] %v1710_v31  ;;  %v1713_v40 = vadd.f32 %v1201_v38, %v689_v37  ;;  %v1202_v42 = vld [vmem:[%s2773_s29 + $0xf18] sm:$0xff]  ;;  %v691_v43 = vld [vmem:[%s2766_s3 + $0xf20] sm:$0xff]  ;;  %v692_v46 = vld [vmem:[%s2766_s3 + $0xf28] sm:$0xff] }
 0x1cb   : > { %2223 = vst [vmem:[%s2788_s20 + $0xf00] sm:$0xff] %v1711_v35  ;;  %v1714_v44 = vadd.f32 %v1202_v42, %v690_v41  ;;  %v1203_v45 = vld [vmem:[%s2773_s29 + $0xf20] sm:$0xff]  ;;  %v1204_v47 = vld [vmem:[%s2773_s29 + $0xf28] sm:$0xff]  ;;  %2224 = vst [vmem:[%s2788_s20 + $0xf08] sm:$0xff] %v1712_v39 }
 0x1cc   : > { %2225 = vst [vmem:[%s2788_s20 + $0xf10] sm:$0xff] %v1713_v40  ;;  %v1715_v48 = vadd.f32 %v1203_v45, %v691_v43  ;;  %v1716_v49 = vadd.f32 %v1204_v47, %v692_v46  ;;  %v693_v50 = vld [vmem:[%s2766_s3 + $0xf30] sm:$0xff]  ;;  %v694_v52 = vld [vmem:[%s2766_s3 + $0xf38] sm:$0xff]  ;;  %v695_v55 = vld [vmem:[%s2766_s3 + $0xf40] sm:$0xff] }
 0x1cd   : > { %v1205_v51 = vld [vmem:[%s2773_s29 + $0xf30] sm:$0xff]  ;;  %2226 = vst [vmem:[%s2788_s20 + $0xf18] sm:$0xff] %v1714_v44  ;;  %v1206_v54 = vld [vmem:[%s2773_s29 + $0xf38] sm:$0xff]  ;;  %v1207_v56 = vld [vmem:[%s2773_s29 + $0xf40] sm:$0xff] }
 0x1ce   : > { %v1717_v53 = vadd.f32 %v1205_v51, %v693_v50  ;;  %2227 = vst [vmem:[%s2788_s20 + $0xf20] sm:$0xff] %v1715_v48  ;;  %2228 = vst [vmem:[%s2788_s20 + $0xf28] sm:$0xff] %v1716_v49  ;;  %v1718_v57 = vadd.f32 %v1206_v54, %v694_v52  ;;  %v1719_v58 = vadd.f32 %v1207_v56, %v695_v55  ;;  %v696_v59 = vld [vmem:[%s2766_s3 + $0xf48] sm:$0xff]  ;;  %v697_v61 = vld [vmem:[%s2766_s3 + $0xf50] sm:$0xff] }
 0x1cf   : > { %v1208_v60 = vld [vmem:[%s2773_s29 + $0xf48] sm:$0xff]  ;;  %v1209_v63 = vld [vmem:[%s2773_s29 + $0xf50] sm:$0xff]  ;;  %v698_v0 = vld [vmem:[%s2766_s3 + $0xf58] sm:$0xff] }
 0x1d0   : > { %2229 = vst [vmem:[%s2788_s20 + $0xf30] sm:$0xff] %v1717_v53  ;;  %v1720_v62 = vadd.f32 %v1208_v60, %v696_v59  ;;  %v1210_v1 = vld [vmem:[%s2773_s29 + $0xf58] sm:$0xff]  ;;  %2230 = vst [vmem:[%s2788_s20 + $0xf38] sm:$0xff] %v1718_v57  ;;  %v1721_v2 = vadd.f32 %v1209_v63, %v697_v61  ;;  %v699_v4 = vld [vmem:[%s2766_s3 + $0xf60] sm:$0xff] }
 0x1d1   : > { %2231 = vst [vmem:[%s2788_s20 + $0xf40] sm:$0xff] %v1719_v58  ;;  %v1722_v3 = vadd.f32 %v1210_v1, %v698_v0  ;;  %v1211_v5 = vld [vmem:[%s2773_s29 + $0xf60] sm:$0xff]  ;;  %v700_v6 = vld [vmem:[%s2766_s3 + $0xf68] sm:$0xff]  ;;  %v701_v9 = vld [vmem:[%s2766_s3 + $0xf70] sm:$0xff] }
 0x1d2   : > { %2232 = vst [vmem:[%s2788_s20 + $0xf48] sm:$0xff] %v1720_v62  ;;  %v1723_v7 = vadd.f32 %v1211_v5, %v699_v4  ;;  %v1212_v8 = vld [vmem:[%s2773_s29 + $0xf68] sm:$0xff]  ;;  %v1213_v10 = vld [vmem:[%s2773_s29 + $0xf70] sm:$0xff]  ;;  %2233 = vst [vmem:[%s2788_s20 + $0xf50] sm:$0xff] %v1721_v2 }
 0x1d3   : > { %2234 = vst [vmem:[%s2788_s20 + $0xf58] sm:$0xff] %v1722_v3  ;;  %v1724_v11 = vadd.f32 %v1212_v8, %v700_v6  ;;  %v1725_v12 = vadd.f32 %v1213_v10, %v701_v9  ;;  %v702_v13 = vld [vmem:[%s2766_s3 + $0xf78] sm:$0xff]  ;;  %v703_v15 = vld [vmem:[%s2766_s3 + $0xf80] sm:$0xff]  ;;  %v704_v18 = vld [vmem:[%s2766_s3 + $0xf88] sm:$0xff] }
 0x1d4   : > { %v1214_v14 = vld [vmem:[%s2773_s29 + $0xf78] sm:$0xff]  ;;  %2235 = vst [vmem:[%s2788_s20 + $0xf60] sm:$0xff] %v1723_v7  ;;  %v1215_v17 = vld [vmem:[%s2773_s29 + $0xf80] sm:$0xff]  ;;  %v1216_v19 = vld [vmem:[%s2773_s29 + $0xf88] sm:$0xff] }
 0x1d5   : > { %v1726_v16 = vadd.f32 %v1214_v14, %v702_v13  ;;  %2236 = vst [vmem:[%s2788_s20 + $0xf68] sm:$0xff] %v1724_v11  ;;  %2237 = vst [vmem:[%s2788_s20 + $0xf70] sm:$0xff] %v1725_v12  ;;  %v1727_v20 = vadd.f32 %v1215_v17, %v703_v15  ;;  %v1728_v21 = vadd.f32 %v1216_v19, %v704_v18  ;;  %v705_v22 = vld [vmem:[%s2766_s3 + $0xf90] sm:$0xff]  ;;  %v706_v24 = vld [vmem:[%s2766_s3 + $0xf98] sm:$0xff] }
 0x1d6   : > { %v1217_v23 = vld [vmem:[%s2773_s29 + $0xf90] sm:$0xff]  ;;  %v1218_v26 = vld [vmem:[%s2773_s29 + $0xf98] sm:$0xff]  ;;  %v707_v27 = vld [vmem:[%s2766_s3 + $0xfa0] sm:$0xff] }
 0x1d7   : > { %2238 = vst [vmem:[%s2788_s20 + $0xf78] sm:$0xff] %v1726_v16  ;;  %v1729_v25 = vadd.f32 %v1217_v23, %v705_v22  ;;  %v1219_v28 = vld [vmem:[%s2773_s29 + $0xfa0] sm:$0xff]  ;;  %2239 = vst [vmem:[%s2788_s20 + $0xf80] sm:$0xff] %v1727_v20  ;;  %v1730_v29 = vadd.f32 %v1218_v26, %v706_v24  ;;  %v708_v31 = vld [vmem:[%s2766_s3 + $0xfa8] sm:$0xff] }
 0x1d8   : > { %2240 = vst [vmem:[%s2788_s20 + $0xf88] sm:$0xff] %v1728_v21  ;;  %v1731_v30 = vadd.f32 %v1219_v28, %v707_v27  ;;  %v1220_v32 = vld [vmem:[%s2773_s29 + $0xfa8] sm:$0xff]  ;;  %v709_v33 = vld [vmem:[%s2766_s3 + $0xfb0] sm:$0xff]  ;;  %v710_v36 = vld [vmem:[%s2766_s3 + $0xfb8] sm:$0xff] }
 0x1d9   : > { %2241 = vst [vmem:[%s2788_s20 + $0xf90] sm:$0xff] %v1729_v25  ;;  %v1732_v34 = vadd.f32 %v1220_v32, %v708_v31  ;;  %v1221_v35 = vld [vmem:[%s2773_s29 + $0xfb0] sm:$0xff]  ;;  %v1222_v37 = vld [vmem:[%s2773_s29 + $0xfb8] sm:$0xff]  ;;  %2242 = vst [vmem:[%s2788_s20 + $0xf98] sm:$0xff] %v1730_v29 }
 0x1da   : > { %2243 = vst [vmem:[%s2788_s20 + $0xfa0] sm:$0xff] %v1731_v30  ;;  %v1733_v38 = vadd.f32 %v1221_v35, %v709_v33  ;;  %v1734_v39 = vadd.f32 %v1222_v37, %v710_v36  ;;  %v711_v40 = vld [vmem:[%s2766_s3 + $0xfc0] sm:$0xff]  ;;  %v712_v42 = vld [vmem:[%s2766_s3 + $0xfc8] sm:$0xff]  ;;  %v713_v45 = vld [vmem:[%s2766_s3 + $0xfd0] sm:$0xff] }
 0x1db   : > { %v1223_v41 = vld [vmem:[%s2773_s29 + $0xfc0] sm:$0xff]  ;;  %2244 = vst [vmem:[%s2788_s20 + $0xfa8] sm:$0xff] %v1732_v34  ;;  %v1224_v44 = vld [vmem:[%s2773_s29 + $0xfc8] sm:$0xff]  ;;  %v1225_v46 = vld [vmem:[%s2773_s29 + $0xfd0] sm:$0xff] }
 0x1dc   : > { %v1735_v43 = vadd.f32 %v1223_v41, %v711_v40  ;;  %2245 = vst [vmem:[%s2788_s20 + $0xfb0] sm:$0xff] %v1733_v38  ;;  %2246 = vst [vmem:[%s2788_s20 + $0xfb8] sm:$0xff] %v1734_v39  ;;  %v1736_v47 = vadd.f32 %v1224_v44, %v712_v42  ;;  %v1737_v48 = vadd.f32 %v1225_v46, %v713_v45  ;;  %v714_v49 = vld [vmem:[%s2766_s3 + $0xfd8] sm:$0xff]  ;;  %v715_v51 = vld [vmem:[%s2766_s3 + $0xfe0] sm:$0xff] }
 0x1dd   : > { %v1226_v50 = vld [vmem:[%s2773_s29 + $0xfd8] sm:$0xff]  ;;  %v1227_v53 = vld [vmem:[%s2773_s29 + $0xfe0] sm:$0xff]  ;;  %v716_v54 = vld [vmem:[%s2766_s3 + $0xfe8] sm:$0xff] }
 0x1de   : > { %2247 = vst [vmem:[%s2788_s20 + $0xfc0] sm:$0xff] %v1735_v43  ;;  %v1738_v52 = vadd.f32 %v1226_v50, %v714_v49  ;;  %v1228_v55 = vld [vmem:[%s2773_s29 + $0xfe8] sm:$0xff]  ;;  %2248 = vst [vmem:[%s2788_s20 + $0xfc8] sm:$0xff] %v1736_v47  ;;  %v1739_v56 = vadd.f32 %v1227_v53, %v715_v51  ;;  %v717_v58 = vld [vmem:[%s2766_s3 + $0xff0] sm:$0xff] }
 0x1df   : > { %2249 = vst [vmem:[%s2788_s20 + $0xfd0] sm:$0xff] %v1737_v48  ;;  %v1740_v57 = vadd.f32 %v1228_v55, %v716_v54  ;;  %v1229_v59 = vld [vmem:[%s2773_s29 + $0xff0] sm:$0xff]  ;;  %v718_v60 = vld [vmem:[%s2766_s3 + $0xff8] sm:$0xff] }
 0x1e0   : > { %2250 = vst [vmem:[%s2788_s20 + $0xfd8] sm:$0xff] %v1738_v52  ;;  %v1741_v61 = vadd.f32 %v1229_v59, %v717_v58  ;;  %v1230_v62 = vld [vmem:[%s2773_s29 + $0xff8] sm:$0xff]  ;;  %2251 = vst [vmem:[%s2788_s20 + $0xfe0] sm:$0xff] %v1739_v56 }
 0x1e1   : > { %2252 = vst [vmem:[%s2788_s20 + $0xfe8] sm:$0xff] %v1740_v57  ;;  %v1742_v63 = vadd.f32 %v1230_v62, %v718_v60 }
 0x1e2   : > { %2253 = vst [vmem:[%s2788_s20 + $0xff0] sm:$0xff] %v1741_v61 }
 0x1e3   : > { %2254 = vst [vmem:[%s2788_s20 + $0xff8] sm:$0xff] %v1742_v63 }
 0x1e4   : > { %2521 = shalt.err (!%p2518_p11)
}
 0x1e5   : > { %s2522_s7 = scalar_lea.hbm %s4318_s17, 65536  ;;  %s2526_s4 = scalar_lea.hbm %s4370_s2, 131072 }
 0x1e6   : > { %p2523_p3 = scmp.ne.s32.totalorder %s4318_s17, %s2522_s7  ;;  %p2527_p2 = scmp.lt.u32.totalorder %s4318_s17, %s4370_s2 }
 0x1e7   : > { %p2528_p4 = scmp.lt.u32.totalorder %s2526_s4, %s2522_s7  ;;  %p2530_p13 = scmp.lt.u32.totalorder %s2522_s7, %s4318_s17 }
 0x1e8   : > { %p2524_p8 = pnand %p2523_p3, %p4380_p1 }
 0x1e9   : > { %p2529_p6 = por %p2528_p4, %p2527_p2 }
 0x1ea   : > { %p2525_p0 = pneg %p2524_p8 }
 0x1eb   : > { %p2531_p12 = por %p2530_p13, %p2529_p6 }
 0x1ed   : > { %p2532_p10 = pnand %p2531_p12, %p2525_p0 }
 0x1ef   : > { %2535 = shalt.err (!%p2532_p10)
}
 0x1f0   : > { %s2585_s23 = smov 1024   ;;  %s2586_s29 = smov 64  }
 0x1f1   : > { %2397 = dma.vmem_to_hbm [thread:$0]  (%p4380_p1), %s4320_s6, 65536, %s4318_s17, %s2256_s28, %s2585_s23, %s2585_s23, %s2586_s29  }
 0x1f2 PF: > { %s2285_s20 = sand.u32 1, %s2566_s9   ;;  %p4381_p5 = scmp.ne.s32.totalorder %s4376_s22, 0 }
 0x1f3   : > { %p4382_p7 = scmp.ge.s32.totalorder %s2578_s12, 2  ;;  %s2286_s5 = scalar_lea.sflag [#allocation4], %s2285_s20 }
 0x1f5   : > { %p2407_p9 = pnand %p4382_p7, %p4381_p5 }
 0x1f7   : > { %2561 = dma.done.wait (!%p2407_p9), %s2286_s5, 65536  }
 0x1f8   : > { %2563 = vsyncadd (!%p2407_p9), %s2286_s5, 4294901760  ;;  %p18_p11 = scmp.ge.s32.totalorder %s2627_s15, 4   ;;  %s4383_s9 = smov %s2570_s10 }
 0x1f9   : > { %s4384_s10 = smov %s2574_s11  ;;  %s4385_s11 = smov %s2639_s18 }
 0x1fa   : > { %s4386_s12 = smov %s2627_s15  ;;  %20 = sbr.rel (!%p18_p11) target bundleno = 7 (0x7), region = 86 }
 0x201   :  { %2291 = vsyncpa [#allocation3], 1 }
 0x202   :  { %2293 = vsyncpa [#allocation3 + $0x1], 1 }
 0x203   :  { %2294 = vsyncpa [#allocation6], 1 }
 0x204   :  { %2296 = vsyncpa [#allocation6 + $0x1], 1 }
 0x205   :  { %2297 = vsyncpa [#allocation4], 1 }
 0x206   :  { %2299 = vsyncpa [#allocation4 + $0x1], 1 }

</bundles_post_ra>
